<compile_context>
chip_gen: v6e
topology: v6e:2x2x1
jax: 0.10.0
libtpu: 0.0.40
codegen_flags: <defaults>
</compile_context>

<pallas_src>
import jax
import jax.numpy as jnp
from jax.experimental import pallas as pl
from jax.experimental.pallas import tpu as pltpu

SLACK = 8  # spare sublane rows around the H-halo'd plane for the +/-1 shifts


def bottleneck_kernel(x_ref, w1_ref, b1_ref, w2_ref, b2_ref, w3_ref, b3_ref,
                      o_ref, pad_ref, shift_ref):
  # x_ref : (1, H, W, Cp)  bf16      w1: (Cp, Wd) bf16        b1: (1, Wd) f32
  # w2    : (9, Wd, Wd) bf16 (BN2 folded, slot = kh*3 + kw)   b2: (1, Wd) f32
  # w3    : (Wd, Cp) bf16  b3: (1, Cp) f32        o_ref: (1, H, W, Cp) bf16
  # pad_ref  : ((H+2)*W + 2*SLACK, Wd) bf16   (H-halo'd flattened plane)
  # shift_ref: ((H+2)*W, Wd) bf16             (masked +/-1 column shift slab)
  _, H, W, Cp = x_ref.shape
  Wd = w1_ref.shape[2] if w1_ref.ndim == 3 else w1_ref.shape[1]
  P = (H + 2) * W                       # flattened H-halo'd plane rows

  # ---- conv1x1 (+ folded BN1) + ReLU -> bf16 halo plane -------------------
  out1 = jnp.dot(x_ref[0].reshape(H * W, Cp), w1_ref[...],
                 preferred_element_type=jnp.float32)
  out1 = jnp.maximum(out1 + b1_ref[...], 0.0)           # (H*W, Wd) f32

  # Zero only the halo/slack rows (interior is fully overwritten each step;
  # zero every step since "parallel" sharding forbids program_id==0 init).
  pad_ref[0:SLACK + W, :] = jnp.zeros((SLACK + W, Wd), jnp.bfloat16)
  pad_ref[SLACK + (H + 1) * W:2 * SLACK + P, :] = (
      jnp.zeros((W + SLACK, Wd), jnp.bfloat16))
  pad_ref[SLACK + W:SLACK + (H + 1) * W, :] = out1.astype(jnp.bfloat16)

  # ---- conv3x3 (+ folded BN2) + ReLU: 9 accumulating MXU taps, no im2col --
  acc2 = jnp.zeros((H * W, Wd), jnp.float32)

  # Center column (kw=1): aligned views straight from the halo plane.
  for kh in range(3):
    start = SLACK + kh * W
    acc2 = acc2 + jnp.dot(pad_ref[start:start + H * W, :],
                          w2_ref[kh * 3 + 1],
                          preferred_element_type=jnp.float32)

  # Shifted columns (kw=0 / kw=2): one masked bf16 slab each, 3 aligned taps.
  j = jax.lax.broadcasted_iota(jnp.int32, (H + 2, W, 1), 1)
  for kwi, off in ((0, -1), (2, 1)):
    sh = pad_ref[SLACK + off:SLACK + off + P, :].reshape(H + 2, W, Wd)
    valid = jnp.logical_and(j + off >= 0, j + off < W)   # zero row-boundary wrap
    shift_ref[...] = jnp.where(valid, sh, 0).reshape(P, Wd)
    for kh in range(3):
      start = kh * W
      acc2 = acc2 + jnp.dot(shift_ref[start:start + H * W, :],
                            w2_ref[kh * 3 + kwi],
                            preferred_element_type=jnp.float32)

  out2 = jnp.maximum(acc2 + b2_ref[...], 0.0)            # (H*W, Wd) f32

  # ---- conv1x1 (+ folded BN3) + residual add + ReLU -> bf16 output --------
  out3 = jnp.dot(out2.astype(jnp.bfloat16), w3_ref[...],
                 preferred_element_type=jnp.float32) + b3_ref[...]
  res = jnp.maximum(out3 + x_ref[0].reshape(H * W, Cp).astype(jnp.float32), 0.0)
  o_ref[0] = res.astype(jnp.bfloat16).reshape(H, W, Cp)


def _round_up(n, m):
  return ((n + m - 1) // m) * m


def bottleneck_forward(x_nchw, params):
  """Fused Bottleneck. Input NCHW f32; output NCHW bf16 (PyTorch layout)."""
  w1, s1, b1 = params["w1"], params["s1"], params["b1"]
  w2, s2, b2 = params["w2"], params["s2"], params["b2"]
  w3, s3, b3 = params["w3"], params["s3"], params["b3"]

  Cin, width = w1.shape
  Cout = w3.shape[1]
  assert Cin == Cout, "identity add requires inplanes == planes * expansion"

  Wd = _round_up(width, 128)            # 3x3 width, padded to full lanes
  Cp = _round_up(Cin, 128)              # in/out channels, padded to full lanes

  # ---- fold BN scales into conv weights, pad channels, cast to bf16 -------
  w1f = jnp.zeros((Cp, Wd), jnp.float32).at[:Cin, :width].set(w1 * s1[0][None, :])
  w2s = w2 * s2[0][None, None, None, :]
  w2f = jnp.zeros((3, 3, Wd, Wd), jnp.float32).at[:, :, :width, :width].set(w2s)
  w2f = w2f.reshape(9, Wd, Wd)          # slot = kh*3 + kw
  w3f = jnp.zeros((Wd, Cp), jnp.float32).at[:width, :Cout].set(w3 * s3[0][None, :])
  w1f = w1f.astype(jnp.bfloat16)
  w2f = w2f.astype(jnp.bfloat16)
  w3f = w3f.astype(jnp.bfloat16)
  b1p = jnp.zeros((1, Wd), jnp.float32).at[:, :width].set(b1)
  b2p = jnp.zeros((1, Wd), jnp.float32).at[:, :width].set(b2)
  b3p = jnp.zeros((1, Cp), jnp.float32).at[:, :Cout].set(b3)

  # ---- NCHW -> NHWC, pad channels to 128 lanes, bf16 for the MXU ----------
  x = jnp.transpose(x_nchw, (0, 2, 3, 1))
  N, H, W, _ = x.shape
  x = jnp.pad(x, ((0, 0), (0, 0), (0, 0), (0, Cp - Cin))).astype(jnp.bfloat16)

  full = lambda a: pl.BlockSpec(a.shape, lambda n: (0,) * a.ndim)

  out = pl.pallas_call(
      bottleneck_kernel,
      out_shape=jax.ShapeDtypeStruct((N, H, W, Cp), jnp.bfloat16),
      grid_spec=pltpu.PrefetchScalarGridSpec(
          num_scalar_prefetch=0,
          grid=(N,),
          in_specs=[
              pl.BlockSpec((1, H, W, Cp), lambda n: (n, 0, 0, 0)),
              full(w1f), full(b1p),
              full(w2f), full(b2p),
              full(w3f), full(b3p),
          ],
          out_specs=pl.BlockSpec((1, H, W, Cp), lambda n: (n, 0, 0, 0)),
          scratch_shapes=[
              pltpu.VMEM(((H + 2) * W + 2 * SLACK, Wd), jnp.bfloat16),
              pltpu.VMEM(((H + 2) * W, Wd), jnp.bfloat16),
          ],
      ),
      compiler_params=pltpu.CompilerParams(
          dimension_semantics=("parallel",),
          vmem_limit_bytes=48 * 1024 * 1024),  # fits v7x's 64 MiB physical VMEM
  )(x, w1f, b1p, w2f, b2p, w3f, b3p)

  out = out[..., :Cout]                         # drop channel padding
  return jnp.transpose(out, (0, 3, 1, 2))       # NHWC -> NCHW (PyTorch interface)


def bottleneck_reference(x_nchw, p):
  """Pure-JAX (lax.conv, f32) reference for correctness checking."""
  conv = lambda x, w, pad: jax.lax.conv_general_dilated(
      x, w, (1, 1), pad, dimension_numbers=("NCHW", "HWIO", "NCHW"))
  bn = lambda o, s, b: o * s[0][None, :, None, None] + b[0][None, :, None, None]

  o = jnp.maximum(bn(conv(x_nchw, p["w1"][None, None], "VALID"),
                     p["s1"], p["b1"]), 0.0)
  o = jnp.maximum(bn(conv(o, p["w2"], [(1, 1), (1, 1)]),
                     p["s2"], p["b2"]), 0.0)
  o = bn(conv(o, p["w3"][None, None], "VALID"), p["s3"], p["b3"])
  return jnp.maximum(o + x_nchw, 0.0)


def make_params(key, inplanes, planes, base_width=64, groups=1):
  """Deterministic synthetic parameters (shapes follow Bottleneck.__init__)."""
  expansion = 4
  width = int(planes * (base_width / 64.0)) * groups
  cout = planes * expansion
  ks = jax.random.split(key, 12)
  eps = 1e-5

  def fold_bn(k, c):
    gamma = 1.0 + 0.1 * jax.random.normal(k[0], (c,), jnp.float32)
    beta = 0.05 * jax.random.normal(k[1], (c,), jnp.float32)
    mean = 0.1 * jax.random.normal(k[2], (c,), jnp.float32)
    var = jnp.abs(1.0 + 0.1 * jax.random.normal(k[3], (c,), jnp.float32))
    scale = gamma * jax.lax.rsqrt(var + eps)
    bias = beta - mean * scale
    return scale[None, :], bias[None, :]

  s1, b1 = fold_bn(ks[0:4], width)
  s2, b2 = fold_bn(ks[4:8], width)
  s3, b3 = fold_bn(ks[8:12], cout)

  kw1, kw2, kw3 = jax.random.split(jax.random.fold_in(key, 7), 3)
  w1 = 0.1 * jax.random.normal(kw1, (inplanes, width), jnp.float32)      # Cin x Cout
  w2 = 0.1 * jax.random.normal(kw2, (3, 3, width, width), jnp.float32)   # HWIO
  w3 = 0.1 * jax.random.normal(kw3, (width, cout), jnp.float32)          # Cin x Cout
  return dict(w1=w1, s1=s1, b1=b1, w2=w2, s2=s2, b2=b2, w3=w3, s3=s3, b3=b3)


if __name__ == "__main__":
  key = jax.random.PRNGKey(0)
  kx, kp = jax.random.split(key)

  N, inplanes, planes, Hs = 2, 16, 4, 16     # inplanes == planes * expansion
  x = jax.random.normal(kx, (N, inplanes, Hs, Hs), jnp.float32)  # NCHW
  params = make_params(kp, inplanes, planes)

  out = jax.block_until_ready(bottleneck_forward(x, params))
  ref = jax.block_until_ready(bottleneck_reference(x, params))
  assert out.shape == ref.shape == (N, planes * 4, Hs, Hs)
  outf = out.astype(jnp.float32)
  if not jnp.allclose(outf, ref, rtol=3e-2, atol=3e-2):   # bf16 MXU + bf16 output
    err = float(jnp.max(jnp.abs(outf - ref)))
    raise AssertionError(
        f"Pallas bottleneck does not match JAX reference (max abs err {err})")

  print("KERNEL_OK")
</pallas_src>

<mosaic_0001>
module attributes {stable_mosaic.version = 11 : i64} {
  func.func @bottleneck_kernel(%arg0: i32, %arg1: memref<1x16x16x128xbf16, #tpu.memory_space<vmem>>, %arg2: memref<128x128xbf16, #tpu.memory_space<vmem>>, %arg3: memref<1x128xf32, #tpu.memory_space<vmem>>, %arg4: memref<9x128x128xbf16, #tpu.memory_space<vmem>>, %arg5: memref<1x128xf32, #tpu.memory_space<vmem>>, %arg6: memref<128x128xbf16, #tpu.memory_space<vmem>>, %arg7: memref<1x128xf32, #tpu.memory_space<vmem>>, %arg8: memref<1x16x16x128xbf16, #tpu.memory_space<vmem>>, %arg9: memref<304x128xbf16, #tpu.memory_space<vmem>>, %arg10: memref<288x128xbf16, #tpu.memory_space<vmem>>) attributes {dimension_semantics = [#tpu.dimension_semantics<parallel>], iteration_bounds = array<i64: 2>, scalar_prefetch = 0 : i64, scratch_operands = 2 : i64, tpu.core_type = #tpu.core_type<tc>, window_params = [{transform_indices = @transform_0, window_bounds = array<i64: 1, 16, 16, 128>}, {pipeline_mode = #tpu.pipeline_mode<synchronous>, transform_indices = @transform_1, window_bounds = array<i64: 128, 128>}, {pipeline_mode = #tpu.pipeline_mode<synchronous>, transform_indices = @transform_2, window_bounds = array<i64: 1, 128>}, {pipeline_mode = #tpu.pipeline_mode<synchronous>, transform_indices = @transform_3, window_bounds = array<i64: 9, 128, 128>}, {pipeline_mode = #tpu.pipeline_mode<synchronous>, transform_indices = @transform_4, window_bounds = array<i64: 1, 128>}, {pipeline_mode = #tpu.pipeline_mode<synchronous>, transform_indices = @transform_5, window_bounds = array<i64: 128, 128>}, {pipeline_mode = #tpu.pipeline_mode<synchronous>, transform_indices = @transform_6, window_bounds = array<i64: 1, 128>}, {transform_indices = @transform_7, window_bounds = array<i64: 1, 16, 16, 128>}]} {
    %c0 = arith.constant 0 : index
    %c0_0 = arith.constant 0 : index
    %c0_1 = arith.constant 0 : index
    %c0_2 = arith.constant 0 : index
    %0 = vector.load %arg1[%c0, %c0_0, %c0_1, %c0_2] : memref<1x16x16x128xbf16, #tpu.memory_space<vmem>>, vector<1x16x16x128xbf16>
    %1 = vector.shape_cast %0 : vector<1x16x16x128xbf16> to vector<16x16x128xbf16>
    %2 = vector.shape_cast %1 : vector<16x16x128xbf16> to vector<256x128xbf16>
    %c0_3 = arith.constant 0 : index
    %c0_4 = arith.constant 0 : index
    %3 = vector.load %arg2[%c0_3, %c0_4] : memref<128x128xbf16, #tpu.memory_space<vmem>>, vector<128x128xbf16>
    %cst = arith.constant dense<0.000000e+00> : vector<256x128xf32>
    %4 = tpu.matmul %2, %3, %cst {dimension_numbers = #tpu.dot_dimension_numbers<[1], [0], [0], [1], [0, 0, 1, 1], [], []>} : vector<256x128xbf16>, vector<128x128xbf16>, vector<256x128xf32> -> vector<256x128xf32>
    %c0_5 = arith.constant 0 : index
    %c0_6 = arith.constant 0 : index
    %5 = vector.load %arg3[%c0_5, %c0_6] : memref<1x128xf32, #tpu.memory_space<vmem>>, vector<1x128xf32>
    %6 = vector.broadcast %5 : vector<1x128xf32> to vector<256x128xf32>
    %7 = arith.addf %4, %6 : vector<256x128xf32>
    %cst_7 = arith.constant 0.000000e+00 : f32
    %8 = vector.broadcast %cst_7 : f32 to vector<256x128xf32>
    %9 = arith.maximumf %7, %8 : vector<256x128xf32>
    %cst_8 = arith.constant 0.000000e+00 : bf16
    %10 = vector.broadcast %cst_8 : bf16 to vector<24x128xbf16>
    %c0_9 = arith.constant 0 : index
    %c0_10 = arith.constant 0 : index
    %11 = vector.load %arg9[%c0_9, %c0_10] : memref<304x128xbf16, #tpu.memory_space<vmem>>, vector<24x128xbf16>
    tpu.vector_store %arg9[%c0_9, %c0_10], %10 {strides = array<i32>} : memref<304x128xbf16, #tpu.memory_space<vmem>>, vector<24x128xbf16>,
    %cst_11 = arith.constant 0.000000e+00 : bf16
    %12 = vector.broadcast %cst_11 : bf16 to vector<24x128xbf16>
    %c280 = arith.constant 280 : index
    %c0_12 = arith.constant 0 : index
    %13 = vector.load %arg9[%c280, %c0_12] : memref<304x128xbf16, #tpu.memory_space<vmem>>, vector<24x128xbf16>
    tpu.vector_store %arg9[%c280, %c0_12], %12 {strides = array<i32>} : memref<304x128xbf16, #tpu.memory_space<vmem>>, vector<24x128xbf16>,
    %14 = arith.truncf %9 : vector<256x128xf32> to vector<256x128xbf16>
    %c24 = arith.constant 24 : index
    %c0_13 = arith.constant 0 : index
    %15 = vector.load %arg9[%c24, %c0_13] : memref<304x128xbf16, #tpu.memory_space<vmem>>, vector<256x128xbf16>
    tpu.vector_store %arg9[%c24, %c0_13], %14 {strides = array<i32>} : memref<304x128xbf16, #tpu.memory_space<vmem>>, vector<256x128xbf16>,
    %cst_14 = arith.constant 0.000000e+00 : f32
    %16 = vector.broadcast %cst_14 : f32 to vector<256x128xf32>
    %c8 = arith.constant 8 : index
    %c0_15 = arith.constant 0 : index
    %17 = vector.load %arg9[%c8, %c0_15] : memref<304x128xbf16, #tpu.memory_space<vmem>>, vector<256x128xbf16>
    %c1 = arith.constant 1 : index
    %c0_16 = arith.constant 0 : index
    %c0_17 = arith.constant 0 : index
    %18 = vector.load %arg4[%c1, %c0_16, %c0_17] : memref<9x128x128xbf16, #tpu.memory_space<vmem>>, vector<1x128x128xbf16>
    %19 = vector.shape_cast %18 : vector<1x128x128xbf16> to vector<128x128xbf16>
    %cst_18 = arith.constant dense<0.000000e+00> : vector<256x128xf32>
    %20 = tpu.matmul %17, %19, %cst_18 {dimension_numbers = #tpu.dot_dimension_numbers<[1], [0], [0], [1], [0, 0, 1, 1], [], []>} : vector<256x128xbf16>, vector<128x128xbf16>, vector<256x128xf32> -> vector<256x128xf32>
    %21 = arith.addf %16, %20 : vector<256x128xf32>
    %c24_19 = arith.constant 24 : index
    %c0_20 = arith.constant 0 : index
    %22 = vector.load %arg9[%c24_19, %c0_20] : memref<304x128xbf16, #tpu.memory_space<vmem>>, vector<256x128xbf16>
    %c4 = arith.constant 4 : index
    %c0_21 = arith.constant 0 : index
    %c0_22 = arith.constant 0 : index
    %23 = vector.load %arg4[%c4, %c0_21, %c0_22] : memref<9x128x128xbf16, #tpu.memory_space<vmem>>, vector<1x128x128xbf16>
    %24 = vector.shape_cast %23 : vector<1x128x128xbf16> to vector<128x128xbf16>
    %cst_23 = arith.constant dense<0.000000e+00> : vector<256x128xf32>
    %25 = tpu.matmul %22, %24, %cst_23 {dimension_numbers = #tpu.dot_dimension_numbers<[1], [0], [0], [1], [0, 0, 1, 1], [], []>} : vector<256x128xbf16>, vector<128x128xbf16>, vector<256x128xf32> -> vector<256x128xf32>
    %26 = arith.addf %21, %25 : vector<256x128xf32>
    %c40 = arith.constant 40 : index
    %c0_24 = arith.constant 0 : index
    %27 = vector.load %arg9[%c40, %c0_24] : memref<304x128xbf16, #tpu.memory_space<vmem>>, vector<256x128xbf16>
    %c7 = arith.constant 7 : index
    %c0_25 = arith.constant 0 : index
    %c0_26 = arith.constant 0 : index
    %28 = vector.load %arg4[%c7, %c0_25, %c0_26] : memref<9x128x128xbf16, #tpu.memory_space<vmem>>, vector<1x128x128xbf16>
    %29 = vector.shape_cast %28 : vector<1x128x128xbf16> to vector<128x128xbf16>
    %cst_27 = arith.constant dense<0.000000e+00> : vector<256x128xf32>
    %30 = tpu.matmul %27, %29, %cst_27 {dimension_numbers = #tpu.dot_dimension_numbers<[1], [0], [0], [1], [0, 0, 1, 1], [], []>} : vector<256x128xbf16>, vector<128x128xbf16>, vector<256x128xf32> -> vector<256x128xf32>
    %31 = arith.addf %26, %30 : vector<256x128xf32>
    %32 = tpu.iota {dimensions = array<i32: 1>} : vector<18x16x1xi32>
    %c7_28 = arith.constant 7 : index
    %c0_29 = arith.constant 0 : index
    %33 = vector.load %arg9[%c7_28, %c0_29] : memref<304x128xbf16, #tpu.memory_space<vmem>>, vector<288x128xbf16>
    %34 = vector.shape_cast %33 : vector<288x128xbf16> to vector<18x16x128xbf16>
    %c-1_i32 = arith.constant -1 : i32
    %35 = vector.broadcast %c-1_i32 : i32 to vector<18x16x1xi32>
    %36 = arith.addi %32, %35 : vector<18x16x1xi32>
    %c0_i32 = arith.constant 0 : i32
    %37 = vector.broadcast %c0_i32 : i32 to vector<18x16x1xi32>
    %38 = arith.cmpi sge, %36, %37 : vector<18x16x1xi32>
    %c-1_i32_30 = arith.constant -1 : i32
    %39 = vector.broadcast %c-1_i32_30 : i32 to vector<18x16x1xi32>
    %40 = arith.addi %32, %39 : vector<18x16x1xi32>
    %c16_i32 = arith.constant 16 : i32
    %41 = vector.broadcast %c16_i32 : i32 to vector<18x16x1xi32>
    %42 = arith.cmpi slt, %40, %41 : vector<18x16x1xi32>
    %43 = arith.andi %38, %42 : vector<18x16x1xi1>
    %c0_i32_31 = arith.constant 0 : i32
    %44 = arith.sitofp %c0_i32_31 : i32 to bf16
    %45 = vector.shape_cast %43 : vector<18x16x1xi1> to vector<18x16x1xi1>
    %46 = vector.broadcast %45 : vector<18x16x1xi1> to vector<18x16x128xi1>
    %47 = vector.broadcast %44 : bf16 to vector<18x16x128xbf16>
    %48 = arith.select %46, %34, %47 : vector<18x16x128xi1>, vector<18x16x128xbf16>
    %49 = vector.shape_cast %48 : vector<18x16x128xbf16> to vector<288x128xbf16>
    %c0_32 = arith.constant 0 : index
    %c0_33 = arith.constant 0 : index
    %50 = vector.load %arg10[%c0_32, %c0_33] : memref<288x128xbf16, #tpu.memory_space<vmem>>, vector<288x128xbf16>
    tpu.vector_store %arg10[%c0_32, %c0_33], %49 {strides = array<i32>} : memref<288x128xbf16, #tpu.memory_space<vmem>>, vector<288x128xbf16>,
    %c0_34 = arith.constant 0 : index
    %c0_35 = arith.constant 0 : index
    %51 = vector.load %arg10[%c0_34, %c0_35] : memref<288x128xbf16, #tpu.memory_space<vmem>>, vector<256x128xbf16>
    %c0_36 = arith.constant 0 : index
    %c0_37 = arith.constant 0 : index
    %c0_38 = arith.constant 0 : index
    %52 = vector.load %arg4[%c0_36, %c0_37, %c0_38] : memref<9x128x128xbf16, #tpu.memory_space<vmem>>, vector<1x128x128xbf16>
    %53 = vector.shape_cast %52 : vector<1x128x128xbf16> to vector<128x128xbf16>
    %cst_39 = arith.constant dense<0.000000e+00> : vector<256x128xf32>
    %54 = tpu.matmul %51, %53, %cst_39 {dimension_numbers = #tpu.dot_dimension_numbers<[1], [0], [0], [1], [0, 0, 1, 1], [], []>} : vector<256x128xbf16>, vector<128x128xbf16>, vector<256x128xf32> -> vector<256x128xf32>
    %55 = arith.addf %31, %54 : vector<256x128xf32>
    %c16 = arith.constant 16 : index
    %c0_40 = arith.constant 0 : index
    %56 = vector.load %arg10[%c16, %c0_40] : memref<288x128xbf16, #tpu.memory_space<vmem>>, vector<256x128xbf16>
    %c3 = arith.constant 3 : index
    %c0_41 = arith.constant 0 : index
    %c0_42 = arith.constant 0 : index
    %57 = vector.load %arg4[%c3, %c0_41, %c0_42] : memref<9x128x128xbf16, #tpu.memory_space<vmem>>, vector<1x128x128xbf16>
    %58 = vector.shape_cast %57 : vector<1x128x128xbf16> to vector<128x128xbf16>
    %cst_43 = arith.constant dense<0.000000e+00> : vector<256x128xf32>
    %59 = tpu.matmul %56, %58, %cst_43 {dimension_numbers = #tpu.dot_dimension_numbers<[1], [0], [0], [1], [0, 0, 1, 1], [], []>} : vector<256x128xbf16>, vector<128x128xbf16>, vector<256x128xf32> -> vector<256x128xf32>
    %60 = arith.addf %55, %59 : vector<256x128xf32>
    %c32 = arith.constant 32 : index
    %c0_44 = arith.constant 0 : index
    %61 = vector.load %arg10[%c32, %c0_44] : memref<288x128xbf16, #tpu.memory_space<vmem>>, vector<256x128xbf16>
    %c6 = arith.constant 6 : index
    %c0_45 = arith.constant 0 : index
    %c0_46 = arith.constant 0 : index
    %62 = vector.load %arg4[%c6, %c0_45, %c0_46] : memref<9x128x128xbf16, #tpu.memory_space<vmem>>, vector<1x128x128xbf16>
    %63 = vector.shape_cast %62 : vector<1x128x128xbf16> to vector<128x128xbf16>
    %cst_47 = arith.constant dense<0.000000e+00> : vector<256x128xf32>
    %64 = tpu.matmul %61, %63, %cst_47 {dimension_numbers = #tpu.dot_dimension_numbers<[1], [0], [0], [1], [0, 0, 1, 1], [], []>} : vector<256x128xbf16>, vector<128x128xbf16>, vector<256x128xf32> -> vector<256x128xf32>
    %65 = arith.addf %60, %64 : vector<256x128xf32>
    %c9 = arith.constant 9 : index
    %c0_48 = arith.constant 0 : index
    %66 = vector.load %arg9[%c9, %c0_48] : memref<304x128xbf16, #tpu.memory_space<vmem>>, vector<288x128xbf16>
    %67 = vector.shape_cast %66 : vector<288x128xbf16> to vector<18x16x128xbf16>
    %c1_i32 = arith.constant 1 : i32
    %68 = vector.broadcast %c1_i32 : i32 to vector<18x16x1xi32>
    %69 = arith.addi %32, %68 : vector<18x16x1xi32>
    %c0_i32_49 = arith.constant 0 : i32
    %70 = vector.broadcast %c0_i32_49 : i32 to vector<18x16x1xi32>
    %71 = arith.cmpi sge, %69, %70 : vector<18x16x1xi32>
    %c1_i32_50 = arith.constant 1 : i32
    %72 = vector.broadcast %c1_i32_50 : i32 to vector<18x16x1xi32>
    %73 = arith.addi %32, %72 : vector<18x16x1xi32>
    %c16_i32_51 = arith.constant 16 : i32
    %74 = vector.broadcast %c16_i32_51 : i32 to vector<18x16x1xi32>
    %75 = arith.cmpi slt, %73, %74 : vector<18x16x1xi32>
    %76 = arith.andi %71, %75 : vector<18x16x1xi1>
    %c0_i32_52 = arith.constant 0 : i32
    %77 = arith.sitofp %c0_i32_52 : i32 to bf16
    %78 = vector.shape_cast %76 : vector<18x16x1xi1> to vector<18x16x1xi1>
    %79 = vector.broadcast %78 : vector<18x16x1xi1> to vector<18x16x128xi1>
    %80 = vector.broadcast %77 : bf16 to vector<18x16x128xbf16>
    %81 = arith.select %79, %67, %80 : vector<18x16x128xi1>, vector<18x16x128xbf16>
    %82 = vector.shape_cast %81 : vector<18x16x128xbf16> to vector<288x128xbf16>
    %c0_53 = arith.constant 0 : index
    %c0_54 = arith.constant 0 : index
    %83 = vector.load %arg10[%c0_53, %c0_54] : memref<288x128xbf16, #tpu.memory_space<vmem>>, vector<288x128xbf16>
    tpu.vector_store %arg10[%c0_53, %c0_54], %82 {strides = array<i32>} : memref<288x128xbf16, #tpu.memory_space<vmem>>, vector<288x128xbf16>,
    %c0_55 = arith.constant 0 : index
    %c0_56 = arith.constant 0 : index
    %84 = vector.load %arg10[%c0_55, %c0_56] : memref<288x128xbf16, #tpu.memory_space<vmem>>, vector<256x128xbf16>
    %c2 = arith.constant 2 : index
    %c0_57 = arith.constant 0 : index
    %c0_58 = arith.constant 0 : index
    %85 = vector.load %arg4[%c2, %c0_57, %c0_58] : memref<9x128x128xbf16, #tpu.memory_space<vmem>>, vector<1x128x128xbf16>
    %86 = vector.shape_cast %85 : vector<1x128x128xbf16> to vector<128x128xbf16>
    %cst_59 = arith.constant dense<0.000000e+00> : vector<256x128xf32>
    %87 = tpu.matmul %84, %86, %cst_59 {dimension_numbers = #tpu.dot_dimension_numbers<[1], [0], [0], [1], [0, 0, 1, 1], [], []>} : vector<256x128xbf16>, vector<128x128xbf16>, vector<256x128xf32> -> vector<256x128xf32>
    %88 = arith.addf %65, %87 : vector<256x128xf32>
    %c16_60 = arith.constant 16 : index
    %c0_61 = arith.constant 0 : index
    %89 = vector.load %arg10[%c16_60, %c0_61] : memref<288x128xbf16, #tpu.memory_space<vmem>>, vector<256x128xbf16>
    %c5 = arith.constant 5 : index
    %c0_62 = arith.constant 0 : index
    %c0_63 = arith.constant 0 : index
    %90 = vector.load %arg4[%c5, %c0_62, %c0_63] : memref<9x128x128xbf16, #tpu.memory_space<vmem>>, vector<1x128x128xbf16>
    %91 = vector.shape_cast %90 : vector<1x128x128xbf16> to vector<128x128xbf16>
    %cst_64 = arith.constant dense<0.000000e+00> : vector<256x128xf32>
    %92 = tpu.matmul %89, %91, %cst_64 {dimension_numbers = #tpu.dot_dimension_numbers<[1], [0], [0], [1], [0, 0, 1, 1], [], []>} : vector<256x128xbf16>, vector<128x128xbf16>, vector<256x128xf32> -> vector<256x128xf32>
    %93 = arith.addf %88, %92 : vector<256x128xf32>
    %c32_65 = arith.constant 32 : index
    %c0_66 = arith.constant 0 : index
    %94 = vector.load %arg10[%c32_65, %c0_66] : memref<288x128xbf16, #tpu.memory_space<vmem>>, vector<256x128xbf16>
    %c8_67 = arith.constant 8 : index
    %c0_68 = arith.constant 0 : index
    %c0_69 = arith.constant 0 : index
    %95 = vector.load %arg4[%c8_67, %c0_68, %c0_69] : memref<9x128x128xbf16, #tpu.memory_space<vmem>>, vector<1x128x128xbf16>
    %96 = vector.shape_cast %95 : vector<1x128x128xbf16> to vector<128x128xbf16>
    %cst_70 = arith.constant dense<0.000000e+00> : vector<256x128xf32>
    %97 = tpu.matmul %94, %96, %cst_70 {dimension_numbers = #tpu.dot_dimension_numbers<[1], [0], [0], [1], [0, 0, 1, 1], [], []>} : vector<256x128xbf16>, vector<128x128xbf16>, vector<256x128xf32> -> vector<256x128xf32>
    %98 = arith.addf %93, %97 : vector<256x128xf32>
    %c0_71 = arith.constant 0 : index
    %c0_72 = arith.constant 0 : index
    %99 = vector.load %arg5[%c0_71, %c0_72] : memref<1x128xf32, #tpu.memory_space<vmem>>, vector<1x128xf32>
    %100 = vector.broadcast %99 : vector<1x128xf32> to vector<256x128xf32>
    %101 = arith.addf %98, %100 : vector<256x128xf32>
    %cst_73 = arith.constant 0.000000e+00 : f32
    %102 = vector.broadcast %cst_73 : f32 to vector<256x128xf32>
    %103 = arith.maximumf %101, %102 : vector<256x128xf32>
    %104 = arith.truncf %103 : vector<256x128xf32> to vector<256x128xbf16>
    %c0_74 = arith.constant 0 : index
    %c0_75 = arith.constant 0 : index
    %105 = vector.load %arg6[%c0_74, %c0_75] : memref<128x128xbf16, #tpu.memory_space<vmem>>, vector<128x128xbf16>
    %cst_76 = arith.constant dense<0.000000e+00> : vector<256x128xf32>
    %106 = tpu.matmul %104, %105, %cst_76 {dimension_numbers = #tpu.dot_dimension_numbers<[1], [0], [0], [1], [0, 0, 1, 1], [], []>} : vector<256x128xbf16>, vector<128x128xbf16>, vector<256x128xf32> -> vector<256x128xf32>
    %c0_77 = arith.constant 0 : index
    %c0_78 = arith.constant 0 : index
    %107 = vector.load %arg7[%c0_77, %c0_78] : memref<1x128xf32, #tpu.memory_space<vmem>>, vector<1x128xf32>
    %108 = vector.broadcast %107 : vector<1x128xf32> to vector<256x128xf32>
    %109 = arith.addf %106, %108 : vector<256x128xf32>
    %c0_79 = arith.constant 0 : index
    %c0_80 = arith.constant 0 : index
    %c0_81 = arith.constant 0 : index
    %c0_82 = arith.constant 0 : index
    %110 = vector.load %arg1[%c0_79, %c0_80, %c0_81, %c0_82] : memref<1x16x16x128xbf16, #tpu.memory_space<vmem>>, vector<1x16x16x128xbf16>
    %111 = vector.shape_cast %110 : vector<1x16x16x128xbf16> to vector<16x16x128xbf16>
    %112 = vector.shape_cast %111 : vector<16x16x128xbf16> to vector<256x128xbf16>
    %113 = arith.extf %112 : vector<256x128xbf16> to vector<256x128xf32>
    %114 = arith.addf %109, %113 : vector<256x128xf32>
    %cst_83 = arith.constant 0.000000e+00 : f32
    %115 = vector.broadcast %cst_83 : f32 to vector<256x128xf32>
    %116 = arith.maximumf %114, %115 : vector<256x128xf32>
    %117 = arith.truncf %116 : vector<256x128xf32> to vector<256x128xbf16>
    %118 = vector.shape_cast %117 : vector<256x128xbf16> to vector<16x16x128xbf16>
    %c0_84 = arith.constant 0 : index
    %c0_85 = arith.constant 0 : index
    %c0_86 = arith.constant 0 : index
    %c0_87 = arith.constant 0 : index
    %119 = vector.load %arg8[%c0_84, %c0_85, %c0_86, %c0_87] : memref<1x16x16x128xbf16, #tpu.memory_space<vmem>>, vector<1x16x16x128xbf16>
    %120 = vector.shape_cast %119 : vector<1x16x16x128xbf16> to vector<16x16x128xbf16>
    %121 = vector.shape_cast %118 : vector<16x16x128xbf16> to vector<1x16x16x128xbf16>
    tpu.vector_store %arg8[%c0_84, %c0_85, %c0_86, %c0_87], %121 {strides = array<i32>} : memref<1x16x16x128xbf16, #tpu.memory_space<vmem>>, vector<1x16x16x128xbf16>,
    return
  }
  func.func @transform_0(%arg0: i32) -> (i32, i32, i32, i32) {
    %c0_i32 = arith.constant 0 : i32
    %c0_i32_0 = arith.constant 0 : i32
    %c0_i32_1 = arith.constant 0 : i32
    %c0_i32_2 = arith.constant 0 : i32
    return %arg0, %c0_i32, %c0_i32_0, %c0_i32_1 : i32, i32, i32, i32
  }
  func.func @transform_1(%arg0: i32) -> (i32, i32) {
    %c0_i32 = arith.constant 0 : i32
    %c0_i32_0 = arith.constant 0 : i32
    %c0_i32_1 = arith.constant 0 : i32
    return %c0_i32, %c0_i32_0 : i32, i32
  }
  func.func @transform_2(%arg0: i32) -> (i32, i32) {
    %c0_i32 = arith.constant 0 : i32
    %c0_i32_0 = arith.constant 0 : i32
    %c0_i32_1 = arith.constant 0 : i32
    return %c0_i32, %c0_i32_0 : i32, i32
  }
  func.func @transform_3(%arg0: i32) -> (i32, i32, i32) {
    %c0_i32 = arith.constant 0 : i32
    %c0_i32_0 = arith.constant 0 : i32
    %c0_i32_1 = arith.constant 0 : i32
    %c0_i32_2 = arith.constant 0 : i32
    return %c0_i32, %c0_i32_0, %c0_i32_1 : i32, i32, i32
  }
  func.func @transform_4(%arg0: i32) -> (i32, i32) {
    %c0_i32 = arith.constant 0 : i32
    %c0_i32_0 = arith.constant 0 : i32
    %c0_i32_1 = arith.constant 0 : i32
    return %c0_i32, %c0_i32_0 : i32, i32
  }
  func.func @transform_5(%arg0: i32) -> (i32, i32) {
    %c0_i32 = arith.constant 0 : i32
    %c0_i32_0 = arith.constant 0 : i32
    %c0_i32_1 = arith.constant 0 : i32
    return %c0_i32, %c0_i32_0 : i32, i32
  }
  func.func @transform_6(%arg0: i32) -> (i32, i32) {
    %c0_i32 = arith.constant 0 : i32
    %c0_i32_0 = arith.constant 0 : i32
    %c0_i32_1 = arith.constant 0 : i32
    return %c0_i32, %c0_i32_0 : i32, i32
  }
  func.func @transform_7(%arg0: i32) -> (i32, i32, i32, i32) {
    %c0_i32 = arith.constant 0 : i32
    %c0_i32_0 = arith.constant 0 : i32
    %c0_i32_1 = arith.constant 0 : i32
    %c0_i32_2 = arith.constant 0 : i32
    return %arg0, %c0_i32, %c0_i32_0, %c0_i32_1 : i32, i32, i32, i32
  }
}

</mosaic_0001>

<bundles_post_ra>
// kernel: tpu_custom_call.1
= control target key start
LH: loop header
LB: loop body
LE: loop exit
PB: predicated region body
PF: predicated region fallthrough
CT: control target
= control target key end

     0   :  { %s9603_s0 = inlined_call_operand.hbm [shape: bf16[2,16,16,128], index: 0, kind: input, shape index: {}]   ;;  %s9604_s1 = inlined_call_operand.hbm [shape: bf16[128,128], index: 1, kind: input, shape index: {}]   ;;  %s9605_s2 = inlined_call_operand.vmem [shape: f32[1,128], index: 2, kind: input, shape index: {}]   ;;  %s9606_s3 = inlined_call_operand.hbm [shape: bf16[9,128,128], index: 3, kind: input, shape index: {}]   ;;  %s9607_s4 = inlined_call_operand.vmem [shape: f32[1,128], index: 4, kind: input, shape index: {}]   ;;  %s9608_s5 = inlined_call_operand.hbm [shape: bf16[128,128], index: 5, kind: input, shape index: {}]   ;;  %s9609_s6 = inlined_call_operand.vmem [shape: f32[1,128], index: 6, kind: input, shape index: {}]   ;;  %s9610_s7 = inlined_call_operand.hbm [shape: bf16[2,16,16,128], index: 7, kind: output, shape index: {}]  }
   0x1   :  { %9617 = sst [smem:[#allocation42_spill]] %s9604_s1 }
   0x2   :  { %12 = vsyncpa [#allocation5], 0 }
   0x3   :  { %14 = vsyncpa [#allocation5 + $0x1], 0 }
   0x4   :  { %15 = vsyncpa [#allocation8], 0 }
   0x5   :  { %16 = vsyncpa [#allocation11], 0 }
   0x6   :  { %17 = vsyncpa [#allocation6], 0 }
   0x7   :  { %19 = vsyncpa [#allocation6 + $0x1], 0  ;;  %s7905_s24 = smov 0   ;;  %s7907_s25 = smov 0  }
   0x8   :  { %s7909_s26 = smov 0   ;;  %s7911_s27 = smov 0  }
   0x9 LB: > { %s7926_s28 = sadd.s32 4294967295, %s7852_s27   ;;  %s5899_s29 = sadd.s32 4294967294, %s7852_s27   ;;  %s7852_s27 = sphi %s7911_s27, %s9712_s27   ;;  %s7848_s26 = sphi %s7909_s26, %s9711_s26   ;;  %s7844_s25 = sphi %s7907_s25, %s9710_s25   ;;  %s7840_s24 = sphi %s7905_s24, %s9709_s24  }
   0xa   : > { %p45_p0 = scmp.ne.s32.totalorder %s7844_s25, %s7840_s24  ;;  %p9611_p1 = scmp.eq.s32.totalorder %s7926_s28, 0 }
   0xb   : > { %p195_p2 = scmp.eq.s32.totalorder %s7926_s28, 1  ;;  %p201_p3 = scmp.eq.s32.totalorder %s5899_s29, 1 }
   0xc   : > { %p7935_p4 = por %p9611_p1, %p45_p0  ;;  %p5900_p5 = scmp.ge.s32.totalorder %s7852_s27, 1 }
   0xd   : > { %p7940_p6 = por %p201_p3, %p45_p0  ;;  %p208_p7 = scmp.lt.s32.totalorder %s7852_s27, 3 }
   0xe   : > { %s9618_s30 = scalar_select %p7935_p4, 1, 0 }
   0xf   : > { %s9619_s8 = scalar_select %p7940_p6, 1, 0 }
  0x10   : > { %p7945_p8 = pnand %p5900_p5, %p208_p7  ;;  %s7854_s10 = smov [#allocation7]  }
  0x11   : > { %s220_s11 = sshll.u32 %s7854_s10, 4  ;;  %s7855_s13 = smov [#allocation9]   ;;  %s221_s11 = int_to_ptr.vmem [resolvable:$true] %s220_s11 }
  0x12   : > { %s9620_s9 = scalar_select %p7945_p8, 1, 0 }
  0x13   : > { %p7374_p9 = pneg %p7945_p8  ;;  %s236_s14 = sshll.u32 %s7855_s13, 4  ;;  %s237_s14 = int_to_ptr.vmem [resolvable:$true] %s236_s14 }
  0x14   : > { %s7856_s15 = smov [#allocation10]   ;;  %s7685_s17 = scalar_lea.vmem %s221_s11, 1024 }
  0x15   : > { %p7954_p11 = pnand %p7374_p9, %p9611_p1  ;;  %s252_s16 = sshll.u32 %s7856_s15, 4  ;;  %s253_s16 = int_to_ptr.vmem [resolvable:$true] %s252_s16 }
  0x16   : > { %p7686_p13 = scmp.ne.s32.totalorder %s221_s11, %s7685_s17  ;;  %p7693_p5 = scmp.lt.s32.totalorder %s221_s11, %s221_s11 }
  0x17   : > { %p7676_p12 = pneg %p7954_p11  ;;  %p7694_p7 = scmp.lt.s32.totalorder %s7685_s17, %s7685_s17 }
  0x19   : > { %p7688_p0 = pnand %p7686_p13, %p7676_p12  ;;  %p7695_p9 = por %p7694_p7, %p7693_p5 }
  0x1b   : > { %p7689_p3 = pneg %p7688_p0 }
  0x1d   : > { %p7696_p10 = pnand %p7695_p9, %p7689_p3 }
  0x1f   : > { %7699 = shalt.err (!%p7696_p10)
}
  0x20   : > { %s9612_s18 = smov 64   ;;  %s9613_s19 = smov 4  }
  0x21   : > { %s9622_s1 = sld [smem:[#allocation42_spill]]  ;;  %s7711_s22 = scalar_lea.vmem %s237_s14, 9216 }
  0x22   : > { %p7712_p13 = scmp.ne.s32.totalorder %s237_s14, %s7711_s22  ;;  %p7719_p3 = scmp.lt.s32.totalorder %s237_s14, %s237_s14 }
  0x23   : > { %p7720_p10 = scmp.lt.s32.totalorder %s7711_s22, %s7711_s22 }
  0x24   : > { %p7714_p0 = pnand %p7712_p13, %p7676_p12 }
  0x25   : > { %p7721_p7 = por %p7720_p10, %p7719_p3 }
  0x26   : > { %p7715_p5 = pneg %p7714_p0 }
  0x27   : > { %7377 = dma.hbm_to_vmem [thread:$0]  (!%p7954_p11), %s9622_s1, 1024, %s221_s11, [#allocation8], %s9612_s18, %s9612_s18, %s9613_s19  }
  0x28   : > { %p7722_p9 = pnand %p7721_p7, %p7715_p5 }
  0x2a   : > { %7725 = shalt.err (!%p7722_p9)
}
  0x2b   : > { %7380 = dma.hbm_to_vmem [thread:$0]  (!%p7954_p11), %s9606_s3, 9216, %s237_s14, [#allocation8], %s9612_s18, %s9612_s18, %s9613_s19  }
  0x2c   : > { %s7737_s10 = scalar_lea.vmem %s253_s16, 1024  ;;  %p7745_p3 = scmp.lt.s32.totalorder %s253_s16, %s253_s16 }
  0x2d   : > { %p7738_p1 = scmp.ne.s32.totalorder %s253_s16, %s7737_s10  ;;  %p7746_p5 = scmp.lt.s32.totalorder %s7737_s10, %s7737_s10 }
  0x2f   : > { %p7740_p13 = pnand %p7738_p1, %p7676_p12  ;;  %p7747_p10 = por %p7746_p5, %p7745_p3 }
  0x31   : > { %p7741_p0 = pneg %p7740_p13 }
  0x33   : > { %p7748_p7 = pnand %p7747_p10, %p7741_p0 }
  0x35   : > { %7751 = shalt.err (!%p7748_p7)
}
  0x36   : > { %7383 = dma.hbm_to_vmem [thread:$0]  (!%p7954_p11), %s9608_s5, 1024, %s253_s16, [#allocation11], %s9612_s18, %s9612_s18, %s9613_s19  }
  0x37   : > { %s7994_s14 = sadd.s32 1, %s7852_s27   ;;  %s32_s15 = sadd.s32 1, %s7848_s26 }
  0x38   : > { %s29_s12 = ssub.s32 %s7852_s27, %s7994_s14  ;;  %p39_p12 = scmp.ne.s32.totalorder %s7848_s26, %s7844_s25 }
  0x39   : > { %p30_p1 = scmp.eq.s32.totalorder %s29_s12, 0  ;;  %p40_p9 = scmp.eq.s32.totalorder %s7852_s27, 0 }
  0x3a   : > { %p7395_p13 = scmp.lt.s32.totalorder %s7852_s27, 2  ;;  %p8008_p3 = por %p195_p2, %p39_p12 }
  0x3b   : > { %s8004_s17 = scalar_select %p30_p1, %s7848_s26, %s32_s15  }
  0x3c   : > { %p41_p0 = por %p40_p9, %p39_p12  ;;  %s269_s21 = sand.u32 1, %s7848_s26  }
  0x3d   : > { %s9623_s20 = scalar_select %p8008_p3, 1, 0 }
  0x3e   : > { %s6220_s22 = sshll.u32 %s7852_s27, 11  ;;  %s5905_s16 = sshll.u32 %s269_s21, 7 }
  0x3f   : > { %s8017_s10 = scalar_lea.hbm %s9603_s0, %s6220_s22  ;;  %s273_s11 = scalar_lea.vmem [#allocation4], %s5905_s16 }
  0x40   : > { %s280_s13 = sshll.u32 %s273_s11, 4  ;;  %p8019_p11 = pnand %p7395_p13, %p41_p0  ;;  %s8023_s13 = int_to_ptr.vmem [resolvable:$true] %s280_s13 }
  0x41   : > { %s8025_s15 = scalar_lea.sflag [#allocation5], %s269_s21  ;;  %s7752_s18 = scalar_lea.hbm %s8017_s10, 2048 }
  0x42   : > { %p7753_p2 = scmp.ne.s32.totalorder %s8017_s10, %s7752_s18  ;;  %p7754_p5 = pneg %p8019_p11 }
  0x43   : > { %s7757_s16 = scalar_lea.hbm %s9603_s0, 4096  ;;  %p7758_p1 = scmp.lt.s32.totalorder %s8017_s10, %s9603_s0 }
  0x44   : > { %p7755_p10 = pnand %p7754_p5, %p7753_p2  ;;  %p7759_p12 = scmp.lt.s32.totalorder %s7757_s16, %s7752_s18 }
  0x46   : > { %p7756_p7 = pneg %p7755_p10  ;;  %p7760_p9 = por %p7759_p12, %p7758_p1 }
  0x48   : > { %p7761_p13 = pnand %p7760_p9, %p7756_p7 }
  0x4a   : > { %7764 = shalt.err (!%p7761_p13)
}
  0x4b   : > { %s7765_s21 = scalar_lea.vmem %s8023_s13, 2048  ;;  %s7859_s19 = smov [#allocation4]  }
  0x4c   : > { %p7766_p0 = scmp.ne.s32.totalorder %s8023_s13, %s7765_s21  ;;  %s7770_s1 = sshll.u32 %s7859_s19, 4  ;;  %s7771_s1 = int_to_ptr.vmem [resolvable:$false] %s7770_s1 }
  0x4d   : > { %s7772_s22 = scalar_lea.vmem %s7771_s1, 4096  ;;  %p7773_p10 = scmp.lt.s32.totalorder %s8023_s13, %s7771_s1 }
  0x4e   : > { %p7768_p6 = pnand %p7766_p0, %p7754_p5  ;;  %p7774_p3 = scmp.lt.s32.totalorder %s7772_s22, %s7765_s21 }
  0x50   : > { %p7769_p2 = pneg %p7768_p6  ;;  %p7775_p4 = por %p7774_p3, %p7773_p10 }
  0x52   : > { %p7776_p8 = pnand %p7775_p4, %p7769_p2 }
  0x54   : > { %7779 = shalt.err (!%p7776_p8)
}
  0x55   : > { %s9625_s18 = smov 4   ;;  %s9626_s23 = smov 64  }
  0x56   : > { %7387 = dma.hbm_to_vmem [thread:$0]  (!%p8019_p11), %s8017_s10, 2048, %s8023_s13, %s8025_s15, %s9626_s23, %s9626_s23, %s9625_s18  }
  0x57   : > { %p9627_p6 = scmp.ne.s32.totalorder %s9620_s9, 0 }
  0x59   : > { %292 = sbr.rel (%p9627_p6) target bundleno = 1100 (0x44c), region = 48 }
  0x5e   : > { %s8052_s19 = sand.u32 1, %s7844_s25   ;;  %p9628_p4 = scmp.ne.s32.totalorder %s9618_s30, 0 }
  0x5f   : > { %s5909_s1 = sshll.u32 %s8052_s19, 7  ;;  %s295_s16 = scalar_lea.sflag [#allocation5], %s8052_s19 }
  0x60   : > { %s8058_s12 = scalar_lea.vmem [#allocation4], %s5909_s1 }
  0x61   : > { %7823 = dma.done.wait (%p9628_p4), %s295_s16, 2048  }
  0x62   : > { %7825 = vsyncadd (%p9628_p4), %s295_s16, 4294965248  ;;  %p9629_p8 = scmp.eq.s32.totalorder %s7926_s28, 0 }
  0x64   : > { %7827 = dma.done.wait (%p9629_p8), [#allocation8], 10240   ;;  %p9630_p3 = pmov %p9629_p8 }
  0x66   : > { %7829 = vsyncadd (%p9630_p3), [#allocation8], 4294957056  ;;  %p9631_p11 = pmov %p9630_p3 }
  0x67   : > { %p9632_p5 = pmov %p9630_p3 }
  0x68   : > { %7831 = dma.done.wait (%p9631_p11), [#allocation11], 1024  }
  0x69   : > { %7833 = vsyncadd (%p9632_p5), [#allocation11], 4294966272  ;;  %v7441_v0 = vld [vmem:[#allocation7 + $0x38] sm:$0xff]   ;;  %v7442_v1 = vld [vmem:[#allocation7 + $0x30] sm:$0xff]   ;;  %v7860_v29 = vmov 0   ;;  %v1874_v38 = vlaneseq  ;;  %vm7861_vm5 = vmmov 1  }
  0x6a   : > { %6814 = vmatprep.subr.bf16.mxu0 %v7441_v0  ;;  %7342 = vmatprep.subr.bf16.mxu1 %v7441_v0  ;;  %v7443_v2 = vld [vmem:[#allocation7 + $0x28] sm:$0xff]   ;;  %v7444_v3 = vld [vmem:[#allocation7 + $0x20] sm:$0xff]   ;;  %v7445_v5 = vld [vmem:[#allocation7 + $0x18] sm:$0xff]   ;;  %735 = vst [vmem:[#allocation2 + $0x4] sm:$0xf] %v7860_v29  ;;  %s9497_s11 = scalar_lea.vmem [#allocation12], %s5909_s1 }
  0x6b   : > { %6815 = vmatpush3.bf16.msra.mxu0 %v7441_v0  ;;  %7350 = vmatpush3.bf16.msra.mxu1 %v7441_v0  ;;  %v7449_v4 = vld [vmem:[%s8058_s12] sm:$0xff]   ;;  %v7446_v7 = vld [vmem:[#allocation7 + $0x10] sm:$0xff]   ;;  %v7447_v8 = vld [vmem:[#allocation7 + $0x8] sm:$0xff]   ;;  %736 = vst [vmem:[#allocation2 + $0x8] sm:$0xf] %v7860_v29  ;;  %v8088_v42 = vshrl.u32 %v1874_v38, 7 }
  0x6c   : > { %6816 = vmatprep.subr.bf16.mxu0 %v7442_v1  ;;  %7343 = vmatprep.subr.bf16.mxu1 %v7442_v1  ;;  %v7453_v6 = vld [vmem:[%s8058_s12 + $0x40] sm:$0xff]   ;;  %v7465_v10 = vld [vmem:[#allocation9 + $0x78] sm:$0xff]   ;;  %v7450_v11 = vld [vmem:[%s8058_s12 + $0x8] sm:$0xff]   ;;  %734 = vst [vmem:[#allocation2] sm:$0xf] %v7860_v29  ;;  %s6285_s21 = sshll.u32 %s7926_s28, 11 }
  0x6d   : > { %6830 = vmatprep.mubr.bf16.mxu0 %v7449_v4  ;;  %6846 = vmatprep.mubr.bf16.mxu1 %v7453_v6  ;;  %v7448_v9 = vld [vmem:[#allocation7] sm:$0xff]   ;;  %v7454_v12 = vld [vmem:[%s8058_s12 + $0x48] sm:$0xff]   ;;  %v7466_v13 = vld [vmem:[#allocation9 + $0x138] sm:$0xff]   ;;  %737 = vst [vmem:[#allocation2 + $0x8c] sm:$0xf] %v7860_v29  ;;  %v2249_v54 = vadd.s32 4294967295, %v8088_v42  ;;  %s9556_s1 = scalar_lea.hbm %s9610_s7, %s6285_s21 }
  0x6e   : > { %v7451_v14 = vld [vmem:[%s8058_s12 + $0x10] sm:$0xff]   ;;  %v7469_v18 = vld [vmem:[#allocation9 + $0x68] sm:$0xff]   ;;  %v7452_v19 = vld [vmem:[%s8058_s12 + $0x18] sm:$0xff]   ;;  %738 = vst [vmem:[#allocation2 + $0x90] sm:$0xf] %v7860_v29  ;;  %s5797_s22 = sshll.u32 %s9497_s11, 4  ;;  %s9558_s22 = int_to_ptr.vmem [resolvable:$true] %s5797_s22 }
  0x6f   : > { %6817 = vmatpush3.bf16.msra.mxu0 %v7442_v1  ;;  %7351 = vmatpush3.bf16.msra.mxu1 %v7442_v1  ;;  %v7457_v15 = vld [vmem:[%s8058_s12 + $0x50] sm:$0xff]   ;;  %v7458_v20 = vld [vmem:[%s8058_s12 + $0x58] sm:$0xff]   ;;  %v7455_v21 = vld [vmem:[%s8058_s12 + $0x20] sm:$0xff]   ;;  %739 = vst [vmem:[#allocation2 + $0x94] sm:$0xf] %v7860_v29  ;;  %vm2251_vm3 = vcmp.ge.s32.totalorder %v2249_v54, 0 }
  0x70   : > { %6818 = vmatprep.subr.bf16.mxu0 %v7443_v2  ;;  %7344 = vmatprep.subr.bf16.mxu1 %v7443_v2  ;;  %v7467_v16 = vld [vmem:[#allocation9 + $0x70] sm:$0xff]   ;;  %v7461_v22 = vld [vmem:[%s8058_s12 + $0x60] sm:$0xff]   ;;  %v7456_v23 = vld [vmem:[%s8058_s12 + $0x28] sm:$0xff]   ;;  %vm1882_vm0 = vsmask.f32 256  ;;  %s5784_s16 = scalar_lea.sflag [#allocation6], %s8052_s19 }
  0x71   : > { %v7468_v17 = vld [vmem:[#allocation9 + $0x130] sm:$0xff]   ;;  %v7462_v24 = vld [vmem:[%s8058_s12 + $0x68] sm:$0xff]   ;;  %v7460_v27 = vld [vmem:[%s8058_s12 + $0x38] sm:$0xff]   ;;  %vm1883_vm1 = vsmask.f32 4368  ;;  %p9706_p1 = scmp.ne.s32.totalorder %s9623_s20, 0 }
  0x72   : > { %v7459_v25 = vld [vmem:[%s8058_s12 + $0x30] sm:$0xff]   ;;  %v7464_v28 = vld [vmem:[%s8058_s12 + $0x78] sm:$0xff]   ;;  %v7470_v30 = vld [vmem:[#allocation9 + $0x128] sm:$0xff]   ;;  %vm3529_vm7 = vsmask.f32 3328  ;;  %s7862_s28 = smov [#allocation12]  }
  0x73   : > { %6819 = vmatpush3.bf16.msra.mxu0 %v7443_v2  ;;  %7352 = vmatpush3.bf16.msra.mxu1 %v7443_v2  ;;  %v7463_v26 = vld [vmem:[%s8058_s12 + $0x70] sm:$0xff]   ;;  %v7471_v31 = vld [vmem:[#allocation9 + $0x60] sm:$0xff]   ;;  %v7473_v33 = vld [vmem:[#allocation9 + $0x58] sm:$0xff]   ;;  %vm3530_vm8 = vsmask.f32 7440  ;;  %s7784_s30 = sshll.u32 %s7862_s28, 4  ;;  %s7785_s30 = int_to_ptr.vmem [resolvable:$false] %s7784_s30 }
  0x74   : > { %6820 = vmatprep.subr.bf16.mxu0 %v7444_v3  ;;  %7345 = vmatprep.subr.bf16.mxu1 %v7444_v3  ;;  %v7472_v32 = vld [vmem:[#allocation9 + $0x120] sm:$0xff]   ;;  %v7474_v34 = vld [vmem:[#allocation9 + $0x118] sm:$0xff]   ;;  %v7475_v35 = vld [vmem:[#allocation9 + $0x50] sm:$0xff]   ;;  %s7786_s9 = scalar_lea.vmem %s7785_s30, 4096  ;;  %p7787_p13 = scmp.lt.s32.totalorder %s9558_s22, %s7785_s30 }
  0x75   : > { %v7476_v36 = vld [vmem:[#allocation9 + $0x110] sm:$0xff]   ;;  %v7477_v37 = vld [vmem:[#allocation9 + $0x48] sm:$0xff]   ;;  %v7479_v40 = vld [vmem:[#allocation9 + $0x40] sm:$0xff]  }
  0x76   : > { %v7478_v39 = vld [vmem:[#allocation9 + $0x108] sm:$0xff]   ;;  %v7481_v41 = vld [vmem:[#allocation2 + $0x4] sm:$0xff]   ;;  %v1877_v48 = vld [vmem:[#allocation2] sm:$0x8] }
  0x77   : > { %6821 = vmatpush3.bf16.msra.mxu0 %v7444_v3  ;;  %7353 = vmatpush3.bf16.msra.mxu1 %v7444_v3  ;;  %v1878_v43 = vld [vmem:[#allocation2 + $0x4] sm:$0xf]  ;;  %v1879_v44 = vld [vmem:[#allocation2 + $0x8] sm:$0xf]  ;;  %v1886_v49 = vshrl.u32 %v1877_v48, 16  ;;  %vm8093_vm2 = vmor %vm1882_vm0, %vm1883_vm1 }
  0x78   : > { %6822 = vmatprep.subr.bf16.mxu0 %v7445_v5  ;;  %7346 = vmatprep.subr.bf16.mxu1 %v7445_v5  ;;  %v7480_v45 = vld [vmem:[#allocation9 + $0x100] sm:$0xff]   ;;  %v1891_v46 = vshrl.u32 %v1878_v43, 16  ;;  %v1900_v47 = vshrl.u32 %v1879_v44, 16  ;;  %v1894_v51 = vshll.u32 %v1878_v43, 16  ;;  %v1903_v55 = vshll.u32 %v1879_v44, 16  ;;  %vm8099_vm4 = vmpackc.low %vm2251_vm3, %vm2251_vm3 }
  0x79   : > { %v6028_v56 = vrot.slane %v1886_v49, 11  ;;  %v3492_v60 = vld [vmem:[#allocation2 + $0x4] sm:$0xf]  ;;  %v3493_v61 = vld [vmem:[#allocation2 + $0x8] sm:$0xf]  ;;  %vm8105_vm6 = vmpackc.low %vm7861_vm5, %vm7861_vm5 }
  0x7a   : > { %v1893_v50 = vrot.slane %v1891_v46, 7  ;;  %v8090_v52 = vrot.slane %v1900_v47, 7  ;;  %v3533_v0 = vshrl.u32 %v3492_v60, 16  ;;  %v3536_v1 = vshll.u32 %v3492_v60, 16  ;;  %vm8118_vm9 = vmor %vm3529_vm7, %vm3530_vm8  ;;  %v8143_v38 = vld [vmem:[#allocation2 + $0x90] sm:$0xf] }
  0x7b   : > { %6823 = vmatpush3.bf16.msra.mxu0 %v7445_v5  ;;  %7354 = vmatpush3.bf16.msra.mxu1 %v7445_v5  ;;  %v3542_v2 = vshll.u32 %v3493_v61, 16  ;;  %v3546_v6 = vshrl.u32 %v3493_v61, 16  ;;  %v7608_v3 = vld [vmem:[#allocation9 + $0x80] sm:$0xff]  }
  0x7c   : > { %6824 = vmatprep.subr.bf16.mxu0 %v7446_v7  ;;  %7347 = vmatprep.subr.bf16.mxu1 %v7446_v7  ;;  %v1896_v57 = vor.u32 %v1894_v51, %v1893_v50  ;;  %v1898_v58 = vrot.slane %v1893_v50, 4  ;;  %v1905_v59 = vor.u32 %v1903_v55, %v8090_v52  ;;  %v1907_v54 = vrot.slane %v8090_v52, 4 }
  0x7e   : > { %v1897_v63 = vsel %vm8093_vm2, %v6028_v56, %v1896_v57  ;;  %v1906_v4 = vsel %vm8093_vm2, %v1898_v58, %v1905_v59  ;;  %v2206_v56 = vshrl.u32 %v8143_v38, 16 }
  0x7f   : > { %6825 = vmatpush3.bf16.msra.mxu0 %v7446_v7  ;;  %7355 = vmatpush3.bf16.msra.mxu1 %v7446_v7  ;;  %v2263_v5 = vsel %vm8099_vm4, %v1897_v63, 0  ;;  %v2264_v7 = vsel %vm8105_vm6, %v1906_v4, 0 }
  0x80   : > { %6826 = vmatprep.subr.bf16.mxu0 %v7447_v8  ;;  %7348 = vmatprep.subr.bf16.mxu1 %v7447_v8  ;;  %2299 = vst [vmem:[#allocation3] sm:$0xf] %v2263_v5  ;;  %2300 = vst [vmem:[#allocation3 + $0x4] sm:$0xf] %v2264_v7 }
  0x83   : > { %6827 = vmatpush3.bf16.msra.mxu0 %v7447_v8  ;;  %7356 = vmatpush3.bf16.msra.mxu1 %v7447_v8  ;;  %v3535_v8 = vrot.slane %v3533_v0, 4 }
  0x84   : > { %6828 = vmatprep.subr.bf16.mxu0 %v7448_v9  ;;  %7349 = vmatprep.subr.bf16.mxu1 %v7448_v9 }
  0x87   : > { %6829 = vmatpush3.bf16.msra.mxu0 %v7448_v9  ;;  %7357 = vmatpush3.bf16.msra.mxu1 %v7448_v9  ;;  %v3538_v9 = vrot.slane %v3536_v1, 5 }
  0x88   : > { %6910 = vmatprep.subr.bf16.mxu0 %v7465_v10  ;;  %6862 = vmatprep.subr.bf16.mxu1 %v7466_v13 }
  0x8a   : > { %6831 = vmatmul.mubr.bf16.vlgmr.msra.gmra.mxu0 %v7450_v11  ;;  %6847 = vmatmul.mubr.bf16.vlgmr.msra.gmra.mxu1 %v7454_v12  ;;  %v3548_v11 = vrot.slane %v3546_v6, 4  ;;  %v3539_v12 = vor.u32 %v3538_v9, %v3535_v8 }
  0x8b   : > { %6834 = vmatprep.mubr.bf16.mxu0 %v7451_v14  ;;  %6850 = vmatprep.mubr.bf16.mxu1 %v7457_v15  ;;  %v8115_v14 = vld [vmem:[#allocation9 + $0x1f8] sm:$0xff]  }
  0x8c   : > { %6911 = vmatpush3.bf16.msra.mxu0 %v7465_v10  ;;  %6863 = vmatpush3.bf16.msra.mxu1 %v7466_v13  ;;  %v3544_v10 = vrot.slane %v3542_v2, 5  ;;  %v3540_v15 = vrot.slane %v3539_v12, 4 }
  0x8d   : > { %6912 = vmatprep.subr.bf16.mxu0 %v7467_v16  ;;  %6864 = vmatprep.subr.bf16.mxu1 %v7468_v17 }
  0x8e   : > { %v3549_v13 = vor.u32 %v3548_v11, %v3544_v10 }
  0x90   : > { %6913 = vmatpush3.bf16.msra.mxu0 %v7467_v16  ;;  %6865 = vmatpush3.bf16.msra.mxu1 %v7468_v17  ;;  %v3545_v17 = vsel %vm8118_vm9, %v3540_v15, %v3544_v10  ;;  %v8167_v15 = vrot.slane %v2206_v56, 7  ;;  %v7610_v16 = vld [vmem:[#allocation9 + $0x140] sm:$0xff]  }
  0x91   : > { %6914 = vmatprep.subr.bf16.mxu0 %v7469_v18  ;;  %6866 = vmatprep.subr.bf16.mxu1 %v7470_v30 }
  0x92   : > { %6835 = vmatmul.mubr.bf16.gmra.mxu0 %v7452_v19  ;;  %6851 = vmatmul.mubr.bf16.gmra.mxu1 %v7458_v20  ;;  %v3946_v19 = vsel %vm8105_vm6, %v3545_v17, 0  ;;  %v8128_v20 = vld [vmem:[#allocation9 + $0x38] sm:$0xff]  }
  0x93   : > { %6838 = vmatprep.mubr.bf16.mxu0 %v7455_v21  ;;  %6854 = vmatprep.mubr.bf16.mxu1 %v7461_v22 }
  0x94   : > { %6915 = vmatpush3.bf16.msra.mxu0 %v7469_v18  ;;  %6867 = vmatpush3.bf16.msra.mxu1 %v7470_v30  ;;  %v8124_v18 = vld [vmem:[#allocation3] sm:$0xff]  }
  0x95   : > { %6916 = vmatprep.subr.bf16.mxu0 %v7471_v31  ;;  %6868 = vmatprep.subr.bf16.mxu1 %v7472_v32  ;;  %3982 = vst [vmem:[#allocation3] sm:$0xf] %v3946_v19 }
  0x98   : > { %6917 = vmatpush3.bf16.msra.mxu0 %v7471_v31  ;;  %6869 = vmatpush3.bf16.msra.mxu1 %v7472_v32  ;;  %v8139_v32 = vld [vmem:[#allocation2 + $0x8c] sm:$0xf] }
  0x99   : > { %6918 = vmatprep.subr.bf16.mxu0 %v7473_v33  ;;  %6870 = vmatprep.subr.bf16.mxu1 %v7474_v34 }
  0x9a   : > { %6839 = vmatmul.mubr.bf16.gmra.mxu0 %v7456_v23  ;;  %6855 = vmatmul.mubr.bf16.gmra.mxu1 %v7462_v24  ;;  %v8134_v23 = vld [vmem:[%s9605_s2] ss:$0 sm:$0xff] }
  0x9b   : > { %6842 = vmatprep.mubr.bf16.mxu0 %v7459_v25  ;;  %6858 = vmatprep.mubr.bf16.mxu1 %v7463_v26 }
  0x9c   : > { %6919 = vmatpush3.bf16.msra.mxu0 %v7473_v33  ;;  %6871 = vmatpush3.bf16.msra.mxu1 %v7474_v34 }
  0x9d   : > { %6920 = vmatprep.subr.bf16.mxu0 %v7475_v35  ;;  %6872 = vmatprep.subr.bf16.mxu1 %v7476_v36 }
  0xa0   : > { %6921 = vmatpush3.bf16.msra.mxu0 %v7475_v35  ;;  %6873 = vmatpush3.bf16.msra.mxu1 %v7476_v36  ;;  %v1876_v35 = vadd.s32 8, %v8088_v42  ;;  %v8149_v42 = vrot.slane %v3549_v13, 4  ;;  %v2200_v13 = vshll.u32 %v8139_v32, 16 }
  0xa1   : > { %6922 = vmatprep.subr.bf16.mxu0 %v7477_v37  ;;  %6874 = vmatprep.subr.bf16.mxu1 %v7478_v39 }
  0xa2   : > { %6843 = vmatmul.mubr.bf16.gmra.mxu0 %v7460_v27  ;;  %6859 = vmatmul.mubr.bf16.gmra.mxu1 %v7464_v28  ;;  %v8152_v55 = vadd.s32 1, %v1876_v35 }
  0xa3   : > { %6926 = vmatprep.mubr.bf16.mxu0 %v7481_v41 }
  0xa4   : > { %6923 = vmatpush3.bf16.msra.mxu0 %v7477_v37  ;;  %6875 = vmatpush3.bf16.msra.mxu1 %v7478_v39  ;;  %vm3937_vm10 = vcmp.lt.s32.totalorder %v8152_v55, 16 }
  0xa5   : > { %6924 = vmatprep.subr.bf16.mxu0 %v7479_v40  ;;  %6876 = vmatprep.subr.bf16.mxu1 %v7480_v45  ;;  %vm8247_vm11 = vmpackc.low %vm3937_vm10, %vm3937_vm10 }
  0xa8   : > { %6925 = vmatpush3.bf16.msra.mxu0 %v7479_v40  ;;  %6877 = vmatpush3.bf16.msra.mxu1 %v7480_v45  ;;  %v2197_v45 = vshrl.u32 %v8139_v32, 16 }
  0xa9   : > { %6958 = vmatprep.subr.bf16.mxu1 %v8115_v14  ;;  %7006 = vmatprep.subr.bf16.mxu0 %v8128_v20 }
  0xaa   : > { %v8161_v4 = vrot.slane %v2197_v45, 7  ;;  %v7498_v45 = vld [vmem:[#allocation9 + $0x30] sm:$0xff]  }
 0x14a   : > { %v6832_v21 = vpop.f32.mrf.mxu0  ;;  %v6848_v22 = vpop.f32.mrf.mxu1 }
 0x14b   : > { %v648_v28 = vadd.f32 %v6848_v22, %v8134_v23  ;;  %v584_v30 = vadd.f32 %v6832_v21, %v8134_v23 }
 0x14c   : > { %v575_v24 = vpop.f32.mrf.mxu0  ;;  %v639_v25 = vpop.f32.mrf.mxu1 }
 0x14d   : > { %v576_v26 = vadd.f32 %v8134_v23, %v575_v24  ;;  %v720_v40 = vmax.f32 %v648_v28, 0.0  ;;  %v704_v46 = vmax.f32 %v584_v30, 0.0  ;;  %v8157_v59 = vadd.f32 %v8134_v23, %v639_v25 }
 0x14e   : > { %v6833_v27 = vpop.f32.mrf.mxu0  ;;  %v6849_v29 = vpop.f32.mrf.mxu1 }
 0x14f   : > { %v702_v31 = vmax.f32 %v576_v26, 0.0  ;;  %v651_v41 = vadd.f32 %v6849_v29, %v8134_v23  ;;  %v587_v47 = vadd.f32 %v6833_v27, %v8134_v23  ;;  %v718_v21 = vmax.f32 %v8157_v59, 0.0  ;;  %v7508_v59 = vld [vmem:[#allocation9 + $0x10] sm:$0xff]  }
 0x150   : > { %v578_v33 = vpop.f32.mrf.mxu0  ;;  %v642_v34 = vpop.f32.mrf.mxu1 }
 0x151   : > { %v6221_v36 = vpack.c.bf16 %v702_v31, %v702_v31  ;;  %v579_v37 = vadd.f32 %v8134_v23, %v578_v33  ;;  %v643_v43 = vadd.f32 %v8134_v23, %v642_v34  ;;  %v721_v63 = vmax.f32 %v651_v41, 0.0 }
 0x152   : > { %v6836_v39 = vpop.f32.mrf.mxu0  ;;  %v6852_v44 = vpop.f32.mrf.mxu1  ;;  %v705_v5 = vmax.f32 %v587_v47, 0.0 }
 0x153   : > { %868 = vst [vmem:[#allocation2 + $0xc] sm:$0xf] %v6221_v36  ;;  %v703_v48 = vmax.f32 %v579_v37, 0.0  ;;  %v719_v50 = vmax.f32 %v643_v43, 0.0  ;;  %v664_v60 = vadd.f32 %v6852_v44, %v8134_v23  ;;  %v600_v6 = vadd.f32 %v6836_v39, %v8134_v23 }
 0x154   : > { %v591_v49 = vpop.f32.mrf.mxu0  ;;  %v655_v51 = vpop.f32.mrf.mxu1 }
 0x155   : > { %v6289_v57 = vpack.c.bf16 %v704_v46, %v703_v48  ;;  %v592_v58 = vadd.f32 %v8134_v23, %v591_v49  ;;  %v6329_v0 = vpack.c.bf16 %v720_v40, %v719_v50  ;;  %v656_v1 = vadd.f32 %v8134_v23, %v655_v51 }
 0x156   : > { %v6837_v61 = vpop.f32.mrf.mxu0  ;;  %v6853_v2 = vpop.f32.mrf.mxu1  ;;  %v724_v22 = vmax.f32 %v664_v60, 0.0  ;;  %v708_v30 = vmax.f32 %v600_v6, 0.0 }
 0x157   : > { %6505 = vst [vmem:[#allocation2 + $0x10] sm:$0xff] %v6289_v57   ;;  %v706_v7 = vmax.f32 %v592_v58, 0.0  ;;  %v603_v8 = vadd.f32 %v6837_v61, %v8134_v23  ;;  %6513 = vst [vmem:[#allocation2 + $0x50] sm:$0xff] %v6329_v0   ;;  %v722_v10 = vmax.f32 %v656_v1, 0.0  ;;  %v667_v11 = vadd.f32 %v6853_v2, %v8134_v23 }
 0x158   : > { %v594_v9 = vpop.f32.mrf.mxu0  ;;  %v658_v12 = vpop.f32.mrf.mxu1 }
 0x159   : > { %v6294_v17 = vpack.c.bf16 %v706_v7, %v705_v5  ;;  %v595_v19 = vadd.f32 %v8134_v23, %v594_v9  ;;  %v6334_v26 = vpack.c.bf16 %v722_v10, %v721_v63  ;;  %v659_v27 = vadd.f32 %v8134_v23, %v658_v12  ;;  %v7486_v10 = vld [vmem:[#allocation9 + $0x1f0] sm:$0xff]  }
 0x15a   : > { %v1880_v24 = vld [vmem:[#allocation2 + $0xc] sm:$0xf]  ;;  %v6840_v25 = vpop.f32.mrf.mxu0  ;;  %v6856_v28 = vpop.f32.mrf.mxu1  ;;  %v709_v31 = vmax.f32 %v603_v8, 0.0  ;;  %v725_v37 = vmax.f32 %v667_v11, 0.0 }
 0x15b   : > { %v8172_v29 = vld [vmem:[#allocation2 + $0xc] sm:$0xf]  ;;  %6506 = vst [vmem:[#allocation2 + $0x18] sm:$0xff] %v6294_v17   ;;  %v707_v33 = vmax.f32 %v595_v19, 0.0  ;;  %v1909_v34 = vshrl.u32 %v1880_v24, 16  ;;  %v616_v35 = vadd.f32 %v6840_v25, %v8134_v23  ;;  %6514 = vst [vmem:[#allocation2 + $0x58] sm:$0xff] %v6334_v26   ;;  %v8176_v40 = vadd.f32 %v6856_v28, %v8134_v23 }
 0x15c   : > { %v607_v36 = vpop.f32.mrf.mxu0  ;;  %v723_v39 = vmax.f32 %v659_v27, 0.0  ;;  %v671_v41 = vpop.f32.mrf.mxu1  ;;  %v1912_v46 = vshll.u32 %v1880_v24, 16  ;;  %v3552_v47 = vshll.u32 %v8172_v29, 16  ;;  %v3556_v60 = vshrl.u32 %v8172_v29, 16  ;;  %v7500_v25 = vld [vmem:[#allocation9 + $0x28] sm:$0xff]  }
 0x15d   : > { %v6299_v43 = vpack.c.bf16 %v708_v30, %v707_v33  ;;  %v608_v44 = vadd.f32 %v8134_v23, %v607_v36  ;;  %v672_v51 = vadd.f32 %v8134_v23, %v671_v41  ;;  %v8181_v57 = vrot.slane %v1909_v34, 7  ;;  %v7489_v41 = vld [vmem:[#allocation9 + $0x1e8] sm:$0xff]  }
 0x15e   : > { %v6841_v48 = vpop.f32.mrf.mxu0  ;;  %v7482_v49 = vld [vmem:[#allocation2 + $0xc] sm:$0xff]   ;;  %v6339_v50 = vpack.c.bf16 %v724_v22, %v723_v39  ;;  %v6857_v56 = vpop.f32.mrf.mxu1  ;;  %v712_v61 = vmax.f32 %v616_v35, 0.0  ;;  %v728_v1 = vmax.f32 %v8176_v40, 0.0  ;;  %v8195_v27 = vrot.slane %v3552_v47, 5 }
 0x15f   : > { %6507 = vst [vmem:[#allocation2 + $0x20] sm:$0xff] %v6299_v43   ;;  %v710_v58 = vmax.f32 %v608_v44, 0.0  ;;  %v8185_v63 = vadd.f32 %v6841_v48, %v8134_v23  ;;  %6878 = vmatprep.mubr.bf16.mxu1 %v7482_v49  ;;  %6927 = vmatmul.mubr.bf16.vlgmr.msra.gmra.mxu0 %v7482_v49  ;;  %v726_v2 = vmax.f32 %v672_v51, 0.0  ;;  %v1881_v6 = vld [vmem:[#allocation2 + $0x10] sm:$0xf]  ;;  %v8190_v9 = vadd.f32 %v6857_v56, %v8134_v23  ;;  %v7503_v43 = vld [vmem:[#allocation9 + $0x20] sm:$0xff]  }
 0x160   : > { %v610_v0 = vpop.f32.mrf.mxu0  ;;  %6515 = vst [vmem:[#allocation2 + $0x60] sm:$0xff] %v6339_v50   ;;  %v674_v5 = vpop.f32.mrf.mxu1  ;;  %7007 = vmatpush3.bf16.msra.mxu0 %v8128_v20  ;;  %v1914_v11 = vor.u32 %v1912_v46, %v8181_v57  ;;  %v1918_v26 = vshrl.u32 %v1881_v6, 16  ;;  %v1916_v30 = vrot.slane %v8181_v57, 4  ;;  %v8208_v44 = vld [vmem:[#allocation2 + $0x14] sm:$0xf] }
 0x161   : > { %v6304_v7 = vpack.c.bf16 %v710_v58, %v709_v31  ;;  %v611_v8 = vadd.f32 %v8134_v23, %v610_v0  ;;  %v6344_v19 = vpack.c.bf16 %v726_v2, %v725_v37  ;;  %v675_v22 = vadd.f32 %v8134_v23, %v674_v5  ;;  %7008 = vmatprep.subr.bf16.mxu0 %v7498_v45 }
 0x162   : > { %v6844_v12 = vpop.f32.mrf.mxu0  ;;  %v7484_v17 = vld [vmem:[#allocation2 + $0x14] sm:$0xff]   ;;  %v6860_v24 = vpop.f32.mrf.mxu1  ;;  %v713_v20 = vmax.f32 %v8185_v63, 0.0  ;;  %v8203_v36 = vrot.slane %v1918_v26, 7  ;;  %v729_v40 = vmax.f32 %v8190_v9, 0.0  ;;  %v8214_v46 = vsel %vm8093_vm2, %v1907_v54, %v1914_v11  ;;  %v7493_v9 = vld [vmem:[#allocation9 + $0x1e0] sm:$0xff]   ;;  %v7505_v11 = vld [vmem:[#allocation9 + $0x18] sm:$0xff]  }
 0x163   : > { %6508 = vst [vmem:[#allocation2 + $0x28] sm:$0xff] %v6304_v7   ;;  %v711_v28 = vmax.f32 %v611_v8, 0.0  ;;  %6879 = vmatmul.mubr.bf16.vlgmr.msra.gmra.mxu1 %v7484_v17  ;;  %6930 = vmatprep.mubr.bf16.mxu0 %v7484_v17  ;;  %6516 = vst [vmem:[#allocation2 + $0x68] sm:$0xff] %v6344_v19   ;;  %v727_v33 = vmax.f32 %v675_v22, 0.0  ;;  %v8201_v34 = vadd.f32 %v6860_v24, %v8134_v23  ;;  %v1927_v2 = vshrl.u32 %v8208_v44, 16 }
 0x164   : > { %v623_v31 = vpop.f32.mrf.mxu0  ;;  %v687_v35 = vpop.f32.mrf.mxu1  ;;  %6959 = vmatpush3.bf16.msra.mxu1 %v8115_v14  ;;  %7009 = vmatpush3.bf16.msra.mxu0 %v7498_v45  ;;  %v632_v47 = vadd.f32 %v6844_v12, %v8134_v23  ;;  %v1921_v45 = vshll.u32 %v1881_v6, 16  ;;  %v3555_v54 = vsel %vm8118_vm9, %v8149_v42, %v8195_v27  ;;  %v8228_v12 = vld [vmem:[#allocation2 + $0x18] sm:$0xf]  ;;  %v2209_v42 = vshll.u32 %v8143_v38, 16 }
 0x165   : > { %v6309_v37 = vpack.c.bf16 %v712_v61, %v711_v28  ;;  %v624_v39 = vadd.f32 %v8134_v23, %v623_v31  ;;  %v6349_v50 = vpack.c.bf16 %v728_v1, %v727_v33  ;;  %6960 = vmatprep.subr.bf16.mxu1 %v7486_v10  ;;  %v688_v14 = vadd.f32 %v8134_v23, %v687_v35  ;;  %v7497_v35 = vld [vmem:[#allocation9 + $0x1d8] sm:$0xff]  }
 0x166   : > { %v6845_v48 = vpop.f32.mrf.mxu0  ;;  %v7485_v49 = vld [vmem:[#allocation2 + $0x1c] sm:$0xff]   ;;  %v6861_v51 = vpop.f32.mrf.mxu1  ;;  %7010 = vmatprep.subr.bf16.mxu0 %v7500_v25  ;;  %v732_v61 = vmax.f32 %v8201_v34, 0.0  ;;  %v1923_v1 = vor.u32 %v1921_v45, %v8203_v36  ;;  %v1929_v26 = vrot.slane %v1927_v2, 7  ;;  %v716_v28 = vmax.f32 %v632_v47, 0.0  ;;  %v7510_v45 = vld [vmem:[#allocation9 + $0x8] sm:$0xff]  }
 0x167   : > { %6509 = vst [vmem:[#allocation2 + $0x30] sm:$0xff] %v6309_v37   ;;  %v714_v56 = vmax.f32 %v624_v39, 0.0  ;;  %v635_v57 = vadd.f32 %v6845_v48, %v8134_v23  ;;  %v699_v52 = vadd.f32 %v6861_v51, %v8134_v23  ;;  %6882 = vmatprep.mubr.bf16.mxu1 %v7485_v49  ;;  %6931 = vmatmul.mubr.bf16.gmra.mxu0 %v7485_v49  ;;  %6517 = vst [vmem:[#allocation2 + $0x70] sm:$0xff] %v6349_v50   ;;  %v8253_v48 = vld [vmem:[#allocation2 + $0x1c] sm:$0xf]  ;;  %v7614_v39 = vld [vmem:[#allocation9 + $0x238] sm:$0xff]  }
 0x168   : > { %v626_v58 = vpop.f32.mrf.mxu0  ;;  %v730_v63 = vmax.f32 %v688_v14, 0.0  ;;  %v690_v0 = vpop.f32.mrf.mxu1  ;;  %6961 = vmatpush3.bf16.msra.mxu1 %v7486_v10  ;;  %7011 = vmatpush3.bf16.msra.mxu0 %v7500_v25  ;;  %v1924_v24 = vsel %vm8093_vm2, %v1916_v30, %v1923_v1  ;;  %v1925_v33 = vrot.slane %v8203_v36, 4  ;;  %v1936_v34 = vshrl.u32 %v8228_v12, 16  ;;  %v8265_v14 = vld [vmem:[#allocation2 + $0x20] sm:$0xf]  ;;  %v7502_v51 = vld [vmem:[#allocation9 + $0x1d0] sm:$0xff]  }
 0x169   : > { %v6314_v5 = vpack.c.bf16 %v714_v56, %v713_v20  ;;  %v717_v6 = vmax.f32 %v635_v57, 0.0  ;;  %v627_v7 = vadd.f32 %v8134_v23, %v626_v58  ;;  %v733_v8 = vmax.f32 %v699_v52, 0.0  ;;  %6962 = vmatprep.subr.bf16.mxu1 %v7489_v41  ;;  %7012 = vmatprep.subr.bf16.mxu0 %v7503_v43  ;;  %v8287_v2 = vld [vmem:[#allocation2 + $0x54] sm:$0xf] }
 0x16a   : > { %v7487_v17 = vld [vmem:[#allocation2 + $0x24] sm:$0xff]   ;;  %v6354_v19 = vpack.c.bf16 %v730_v63, %v729_v40  ;;  %v691_v22 = vadd.f32 %v8134_v23, %v690_v0  ;;  %v1930_v23 = vshll.u32 %v8208_v44, 16  ;;  %v2266_v37 = vsel %vm8105_vm6, %v1924_v24, 0 }
 0x16b   : > { %6510 = vst [vmem:[#allocation2 + $0x38] sm:$0xff] %v6314_v5   ;;  %v6324_v10 = vpack.c.bf16 %v718_v21, %v717_v6  ;;  %v715_v20 = vmax.f32 %v627_v7, 0.0  ;;  %v6252_v25 = vpack.c.bf16 %v733_v8, %v733_v8  ;;  %6883 = vmatmul.mubr.bf16.gmra.mxu1 %v7487_v17  ;;  %6934 = vmatprep.mubr.bf16.mxu0 %v7487_v17  ;;  %v1939_v21 = vshll.u32 %v8228_v12, 16  ;;  %v8278_v63 = vld [vmem:[#allocation2 + $0x28] sm:$0xf]  ;;  %v7507_v6 = vld [vmem:[#allocation9 + $0x1c8] sm:$0xff]  }
 0x16c   : > { %6518 = vst [vmem:[#allocation2 + $0x78] sm:$0xff] %v6354_v19   ;;  %v731_v31 = vmax.f32 %v691_v22, 0.0  ;;  %6963 = vmatpush3.bf16.msra.mxu1 %v7489_v41  ;;  %7013 = vmatpush3.bf16.msra.mxu0 %v7503_v43  ;;  %v2265_v36 = vsel %vm8099_vm4, %v8214_v46, 0  ;;  %v1932_v43 = vor.u32 %v1930_v23, %v1929_v26  ;;  %v8251_v47 = vrot.slane %v1936_v34, 7  ;;  %2302 = vst [vmem:[#allocation3 + $0xc] sm:$0xf] %v2266_v37 }
 0x16d   : > { %6512 = vst [vmem:[#allocation2 + $0x48] sm:$0xff] %v6324_v10   ;;  %v6319_v30 = vpack.c.bf16 %v716_v28, %v715_v20  ;;  %899 = vst [vmem:[#allocation2 + $0x88] sm:$0xf] %v6252_v25  ;;  %6964 = vmatprep.subr.bf16.mxu1 %v7493_v9  ;;  %7014 = vmatprep.subr.bf16.mxu0 %v7505_v11  ;;  %v1934_v46 = vrot.slane %v1929_v26, 4  ;;  %v3947_v50 = vsel %vm8247_vm11, %v3555_v54, 0  ;;  %v8271_v57 = vrot.slane %v3556_v60, 4 }
 0x16e   : > { %v7488_v40 = vld [vmem:[#allocation2 + $0x2c] sm:$0xff]   ;;  %v6359_v41 = vpack.c.bf16 %v732_v61, %v731_v31  ;;  %2301 = vst [vmem:[#allocation3 + $0x8] sm:$0xf] %v2265_v36  ;;  %v1933_v55 = vsel %vm8093_vm2, %v1925_v33, %v1932_v43  ;;  %v1941_v49 = vor.u32 %v1939_v21, %v8251_v47  ;;  %3983 = vst [vmem:[#allocation3 + $0x4] sm:$0xf] %v3947_v50  ;;  %v1945_v61 = vshrl.u32 %v8253_v48, 16 }
 0x16f   : > { %6511 = vst [vmem:[#allocation2 + $0x40] sm:$0xff] %v6319_v30   ;;  %6886 = vmatprep.mubr.bf16.mxu1 %v7488_v40  ;;  %6935 = vmatmul.mubr.bf16.gmra.mxu0 %v7488_v40  ;;  %v2267_v56 = vsel %vm8099_vm4, %v1933_v55, 0  ;;  %v1954_v60 = vshrl.u32 %v8265_v14, 16  ;;  %v8283_v0 = vld [vmem:[#allocation2 + $0x24] sm:$0xf]  ;;  %v1943_v7 = vrot.slane %v8251_v47, 4  ;;  %v8301_v17 = vor.u32 %v2209_v42, %v8167_v15 }
 0x170   : > { %6519 = vst [vmem:[#allocation2 + $0x80] sm:$0xff] %v6359_v41   ;;  %6965 = vmatpush3.bf16.msra.mxu1 %v7493_v9  ;;  %7015 = vmatpush3.bf16.msra.mxu0 %v7505_v11  ;;  %v1942_v54 = vsel %vm8093_vm2, %v1934_v46, %v1941_v49  ;;  %2303 = vst [vmem:[#allocation3 + $0x10] sm:$0xf] %v2267_v56  ;;  %v8285_v1 = vld [vmem:[#allocation2 + $0x30] sm:$0xf]  ;;  %v1948_v8 = vshll.u32 %v8253_v48, 16  ;;  %v8298_v11 = vor.u32 %v2200_v13, %v8161_v4 }
 0x171   : > { %6966 = vmatprep.subr.bf16.mxu1 %v7497_v35  ;;  %7016 = vmatprep.subr.bf16.mxu0 %v7508_v59  ;;  %v2268_v29 = vsel %vm8105_vm6, %v1942_v54, 0  ;;  %v8289_v5 = vld [vmem:[#allocation2 + $0x58] sm:$0xf]  ;;  %v8293_v9 = vld [vmem:[#allocation2 + $0x2c] sm:$0xf]  ;;  %v6004_v22 = vcombine.low %v8208_v44, %v8228_v12  ;;  %v1947_v24 = vrot.slane %v1945_v61, 7  ;;  %v6005_v13 = vcombine.low %v8253_v48, %v8265_v14 }
 0x172   : > { %v7490_v58 = vld [vmem:[#allocation2 + $0x34] sm:$0xff]   ;;  %2304 = vst [vmem:[#allocation3 + $0x14] sm:$0xf] %v2268_v29  ;;  %v7513_v20 = vld [vmem:[#allocation9] sm:$0xff]   ;;  %v1956_v15 = vrot.slane %v1954_v60, 7  ;;  %v1957_v25 = vshll.u32 %v8265_v14, 16  ;;  %v6006_v31 = vcombine.low %v8283_v0, %v8278_v63  ;;  %v3559_v33 = vor.u32 %v8271_v57, %v8195_v27 }
 0x173   : > { %6887 = vmatmul.mubr.bf16.gmra.mxu1 %v7490_v58  ;;  %6938 = vmatprep.mubr.bf16.mxu0 %v7490_v58  ;;  %v1950_v23 = vor.u32 %v1948_v8, %v1947_v24  ;;  %v1963_v34 = vshrl.u32 %v8283_v0, 16  ;;  %v6007_v30 = vcombine.low %v8293_v9, %v8285_v1  ;;  %v1972_v37 = vshrl.u32 %v8278_v63, 16  ;;  %v7511_v36 = vld [vmem:[#allocation9 + $0x1c0] sm:$0xff]   ;;  %v8324_v55 = vld [vmem:[#allocation9 + $0x1b8] sm:$0xff]   ;;  %v8334_v61 = vld [vmem:[#allocation2 + $0x34] sm:$0xf] }
 0x174   : > { %6967 = vmatpush3.bf16.msra.mxu1 %v7497_v35  ;;  %7017 = vmatpush3.bf16.msra.mxu0 %v7508_v59  ;;  %v1952_v35 = vrot.slane %v1947_v24, 4  ;;  %v1959_v59 = vor.u32 %v1957_v25, %v1956_v15  ;;  %v1961_v21 = vrot.slane %v1956_v15, 4  ;;  %v1966_v43 = vshll.u32 %v8283_v0, 16  ;;  %v7494_v46 = vld [vmem:[#allocation2 + $0x4c] sm:$0xff]   ;;  %v8339_v24 = vld [vmem:[#allocation9 + $0xf8] sm:$0xff]  }
 0x175   : > { %6968 = vmatprep.subr.bf16.mxu1 %v7502_v51  ;;  %7018 = vmatprep.subr.bf16.mxu0 %v7510_v45  ;;  %v1951_v40 = vsel %vm8093_vm2, %v1943_v7, %v1950_v23  ;;  %v1965_v41 = vrot.slane %v1963_v34, 7  ;;  %v1981_v47 = vshrl.u32 %v8293_v9, 16  ;;  %v1984_v54 = vshll.u32 %v8293_v9, 16 }
 0x176   : > { %v7491_v19 = vld [vmem:[#allocation2 + $0x3c] sm:$0xff]   ;;  %v7492_v10 = vld [vmem:[#allocation2 + $0x44] sm:$0xff]   ;;  %v1960_v49 = vsel %vm8093_vm2, %v1952_v35, %v1959_v59  ;;  %v2269_v50 = vsel %vm8099_vm4, %v1951_v40, 0  ;;  %v1990_v8 = vshrl.u32 %v8285_v1, 16  ;;  %v1993_v23 = vshll.u32 %v8285_v1, 16 }
 0x177   : > { %6890 = vmatprep.mubr.bf16.mxu1 %v7491_v19  ;;  %6939 = vmatmul.mubr.bf16.gmra.mxu0 %v7491_v19  ;;  %v2270_v56 = vsel %vm8105_vm6, %v1960_v49, 0  ;;  %2305 = vst [vmem:[#allocation3 + $0x18] sm:$0xf] %v2269_v50  ;;  %v1968_v42 = vor.u32 %v1966_v43, %v1965_v41  ;;  %v1983_v58 = vrot.slane %v1981_v47, 7  ;;  %v1970_v29 = vrot.slane %v1965_v41, 4  ;;  %v7512_v26 = vld [vmem:[#allocation2 + $0x84] sm:$0xff]  }
 0x178   : > { %6942 = vmatprep.mubr.bf16.mxu0 %v7492_v10  ;;  %6969 = vmatpush3.bf16.msra.mxu1 %v7502_v51  ;;  %v1974_v51 = vrot.slane %v1972_v37, 7  ;;  %2306 = vst [vmem:[#allocation3 + $0x1c] sm:$0xf] %v2270_v56  ;;  %v8337_v19 = vld [vmem:[#allocation2 + $0x38] sm:$0xf]  ;;  %v1992_v59 = vrot.slane %v1990_v8, 7 }
 0x179   : > { %6970 = vmatprep.subr.bf16.mxu1 %v7507_v6  ;;  %7019 = vmatpush3.bf16.msra.mxu0 %v7510_v45  ;;  %v1975_v45 = vshll.u32 %v8278_v63, 16  ;;  %v1986_v15 = vor.u32 %v1984_v54, %v1983_v58  ;;  %v1988_v25 = vrot.slane %v1983_v58, 4  ;;  %v1999_v37 = vshrl.u32 %v8334_v61, 16  ;;  %v8358_v47 = vld [vmem:[#allocation2 + $0x5c] sm:$0xf] }
 0x17a   : > { %7020 = vmatprep.subr.bf16.mxu0 %v7513_v20  ;;  %v1979_v7 = vrot.slane %v1974_v51, 4  ;;  %v2002_v41 = vshll.u32 %v8334_v61, 16  ;;  %v2008_v43 = vshrl.u32 %v8337_v19, 16  ;;  %v1995_v49 = vor.u32 %v1993_v23, %v1992_v59  ;;  %v7499_v56 = vld [vmem:[#allocation2 + $0x5c] sm:$0xff]  }
 0x17b   : > { %6891 = vmatmul.mubr.bf16.gmra.mxu1 %v7492_v10  ;;  %v1977_v60 = vor.u32 %v1975_v45, %v1974_v51  ;;  %v1969_v10 = vsel %vm8093_vm2, %v1961_v21, %v1968_v42  ;;  %v1997_v50 = vrot.slane %v1992_v59, 4  ;;  %v2001_v51 = vrot.slane %v1999_v37, 7  ;;  %v8362_v45 = vld [vmem:[#allocation2 + $0x60] sm:$0xf] }
 0x17c   : > { %6894 = vmatprep.mubr.bf16.mxu1 %v7494_v46  ;;  %6971 = vmatpush3.bf16.msra.mxu1 %v7507_v6  ;;  %v7496_v6 = vld [vmem:[#allocation2 + $0x54] sm:$0xff]   ;;  %v2271_v35 = vsel %vm8099_vm4, %v1969_v10, 0  ;;  %v1987_v40 = vsel %vm8093_vm2, %v1979_v7, %v1986_v15  ;;  %v2010_v42 = vrot.slane %v2008_v43, 7  ;;  %v2011_v58 = vshll.u32 %v8337_v19, 16  ;;  %v8366_v54 = vld [vmem:[#allocation2 + $0x40] sm:$0xf] }
 0x17d   : > { %6972 = vmatprep.subr.bf16.mxu1 %v7511_v36  ;;  %7021 = vmatpush3.bf16.msra.mxu0 %v7513_v20  ;;  %v1978_v34 = vsel %vm8093_vm2, %v1970_v29, %v1977_v60  ;;  %v8349_v20 = vld [vmem:[#allocation2 + $0x3c] sm:$0xf]  ;;  %2307 = vst [vmem:[#allocation3 + $0x20] sm:$0xf] %v2271_v35  ;;  %v1996_v60 = vsel %vm8093_vm2, %v1988_v25, %v1995_v49  ;;  %v2006_v8 = vrot.slane %v2001_v51, 4  ;;  %v8381_v37 = vrot.slane %v3559_v33, 4 }
 0x17e   : > { %7102 = vmatprep.subr.bf16.mxu0 %v8324_v55  ;;  %v2272_v21 = vsel %vm8105_vm6, %v1978_v34, 0  ;;  %v2004_v7 = vor.u32 %v2002_v41, %v2001_v51  ;;  %v2020_v10 = vshll.u32 %v8349_v20, 16  ;;  %v8374_v15 = vld [vmem:[#allocation2 + $0x44] sm:$0xf]  ;;  %v2274_v23 = vsel %vm8105_vm6, %v1996_v60, 0 }
 0x17f   : > { %6943 = vmatmul.mubr.bf16.gmra.mxu0 %v7494_v46  ;;  %2308 = vst [vmem:[#allocation3 + $0x24] sm:$0xf] %v2272_v21  ;;  %v2273_v46 = vsel %vm8099_vm4, %v1987_v40, 0  ;;  %v2013_v34 = vor.u32 %v2011_v58, %v2010_v42  ;;  %v2015_v35 = vrot.slane %v2010_v42, 4  ;;  %2310 = vst [vmem:[#allocation3 + $0x2c] sm:$0xf] %v2274_v23 }
 0x180   : > { %6946 = vmatprep.mubr.bf16.mxu0 %v7496_v6  ;;  %6973 = vmatpush3.bf16.msra.mxu1 %v7511_v36  ;;  %2309 = vst [vmem:[#allocation3 + $0x28] sm:$0xf] %v2273_v46  ;;  %v2017_v36 = vshrl.u32 %v8349_v20, 16  ;;  %v2005_v21 = vsel %vm8093_vm2, %v1997_v50, %v2004_v7  ;;  %v8388_v40 = vld [vmem:[#allocation2 + $0x48] sm:$0xf]  ;;  %v2029_v33 = vshll.u32 %v8366_v54, 16 }
 0x181   : > { %7054 = vmatprep.subr.bf16.mxu1 %v8339_v24  ;;  %v8390_v41 = vld [vmem:[#allocation2 + $0x50] sm:$0xf]  ;;  %v7501_v43 = vld [vmem:[#allocation2 + $0x64] sm:$0xff]   ;;  %v2014_v49 = vsel %vm8093_vm2, %v2006_v8, %v2013_v34  ;;  %v2275_v27 = vsel %vm8099_vm4, %v2005_v21, 0  ;;  %v8397_v46 = vld [vmem:[#allocation2 + $0x4c] sm:$0xf] }
 0x182   : > { %v2019_v59 = vrot.slane %v2017_v36, 7  ;;  %v2276_v50 = vsel %vm8105_vm6, %v2014_v49, 0  ;;  %2311 = vst [vmem:[#allocation3 + $0x30] sm:$0xf] %v2275_v27  ;;  %v2035_v58 = vshrl.u32 %v8374_v15, 16  ;;  %v2038_v60 = vshll.u32 %v8374_v15, 16 }
 0x183   : > { %6895 = vmatmul.mubr.bf16.gmra.mxu1 %v7496_v6  ;;  %v2026_v6 = vshrl.u32 %v8366_v54, 16  ;;  %2312 = vst [vmem:[#allocation3 + $0x34] sm:$0xf] %v2276_v50  ;;  %v2044_v7 = vshrl.u32 %v8388_v40, 16  ;;  %v2047_v8 = vshll.u32 %v8388_v40, 16  ;;  %v7504_v49 = vld [vmem:[#allocation2 + $0x6c] sm:$0xff]  }
 0x184   : > { %6898 = vmatprep.mubr.bf16.mxu1 %v7499_v56  ;;  %v2022_v57 = vor.u32 %v2020_v10, %v2019_v59  ;;  %v2024_v51 = vrot.slane %v2019_v59, 4  ;;  %v2037_v59 = vrot.slane %v2035_v58, 7  ;;  %v2071_v28 = vshrl.u32 %v8287_v2, 16  ;;  %v3523_v53 = vld [vmem:[#allocation2 + $0x80] sm:$0xf] }
 0x185   : > { %v2028_v42 = vrot.slane %v2026_v6, 7  ;;  %v2046_v21 = vrot.slane %v2044_v7, 7  ;;  %v2056_v6 = vshll.u32 %v8397_v46, 16 }
 0x186   : > { %v2023_v36 = vsel %vm8093_vm2, %v2015_v35, %v2022_v57  ;;  %v2062_v35 = vshrl.u32 %v8390_v41, 16  ;;  %v2040_v57 = vor.u32 %v2038_v60, %v2037_v59  ;;  %v2042_v50 = vrot.slane %v2037_v59, 4  ;;  %v7506_v59 = vld [vmem:[#allocation2 + $0x74] sm:$0xff]  }
 0x187   : > { %6947 = vmatmul.mubr.bf16.gmra.mxu0 %v7499_v56  ;;  %v2031_v10 = vor.u32 %v2029_v33, %v2028_v42  ;;  %v2033_v23 = vrot.slane %v2028_v42, 4  ;;  %v2277_v34 = vsel %vm8099_vm4, %v2023_v36, 0  ;;  %v2053_v56 = vshrl.u32 %v8397_v46, 16 }
 0x188   : > { %6950 = vmatprep.mubr.bf16.mxu0 %v7501_v43  ;;  %2313 = vst [vmem:[#allocation3 + $0x38] sm:$0xf] %v2277_v34  ;;  %v2065_v33 = vshll.u32 %v8390_v41, 16  ;;  %v2049_v58 = vor.u32 %v2047_v8, %v2046_v21  ;;  %v2051_v36 = vrot.slane %v2046_v21, 4  ;;  %v2064_v52 = vrot.slane %v2062_v35, 7 }
 0x189   : > { %v2032_v27 = vsel %vm8093_vm2, %v2024_v51, %v2031_v10  ;;  %v2055_v7 = vrot.slane %v2053_v56, 7  ;;  %v2041_v34 = vsel %vm8093_vm2, %v2033_v23, %v2040_v57  ;;  %v2074_v51 = vshll.u32 %v8287_v2, 16 }
 0x18a   : > { %v2278_v42 = vsel %vm8105_vm6, %v2032_v27, 0  ;;  %v2050_v60 = vsel %vm8093_vm2, %v2042_v50, %v2049_v58  ;;  %v2067_v56 = vor.u32 %v2065_v33, %v2064_v52  ;;  %v2069_v23 = vrot.slane %v2064_v52, 4  ;;  %v8436_v33 = vld [vmem:[#allocation2 + $0x64] sm:$0xf] }
 0x18b   : > { %6899 = vmatmul.mubr.bf16.gmra.mxu1 %v7501_v43  ;;  %2314 = vst [vmem:[#allocation3 + $0x3c] sm:$0xf] %v2278_v42  ;;  %v2279_v43 = vsel %vm8099_vm4, %v2041_v34, 0  ;;  %v2058_v10 = vor.u32 %v2056_v6, %v2055_v7  ;;  %v2060_v8 = vrot.slane %v2055_v7, 4  ;;  %v2280_v21 = vsel %vm8105_vm6, %v2050_v60, 0  ;;  %v7509_v42 = vld [vmem:[#allocation2 + $0x7c] sm:$0xff]  }
 0x18c   : > { %6902 = vmatprep.mubr.bf16.mxu1 %v7504_v49  ;;  %2315 = vst [vmem:[#allocation3 + $0x40] sm:$0xf] %v2279_v43  ;;  %v2073_v35 = vrot.slane %v2071_v28, 7  ;;  %2316 = vst [vmem:[#allocation3 + $0x44] sm:$0xf] %v2280_v21  ;;  %v2080_v57 = vshrl.u32 %v8289_v5, 16 }
 0x18d   : > { %v2059_v27 = vsel %vm8093_vm2, %v2051_v36, %v2058_v10  ;;  %v2083_v50 = vshll.u32 %v8289_v5, 16  ;;  %v2089_v6 = vshrl.u32 %v8358_v47, 16  ;;  %v2068_v58 = vsel %vm8093_vm2, %v2060_v8, %v2067_v56  ;;  %v8441_v43 = vld [vmem:[#allocation2 + $0x68] sm:$0xf]  ;;  %v8449_v56 = vld [vmem:[#allocation2 + $0x6c] sm:$0xf] }
 0x18e   : > { %v2281_v52 = vsel %vm8099_vm4, %v2059_v27, 0  ;;  %v2076_v28 = vor.u32 %v2074_v51, %v2073_v35  ;;  %v2282_v36 = vsel %vm8105_vm6, %v2068_v58, 0  ;;  %v2082_v7 = vrot.slane %v2080_v57, 7  ;;  %v8453_v58 = vld [vmem:[#allocation2 + $0x70] sm:$0xf] }
 0x18f   : > { %6951 = vmatmul.mubr.bf16.gmra.mxu0 %v7504_v49  ;;  %v2078_v49 = vrot.slane %v2073_v35, 4  ;;  %2317 = vst [vmem:[#allocation3 + $0x48] sm:$0xf] %v2281_v52  ;;  %v2091_v34 = vrot.slane %v2089_v6, 7  ;;  %v2092_v60 = vshll.u32 %v8358_v47, 16  ;;  %v2098_v8 = vshrl.u32 %v8362_v45, 16 }
 0x190   : > { %6954 = vmatprep.mubr.bf16.mxu0 %v7506_v59  ;;  %2318 = vst [vmem:[#allocation3 + $0x4c] sm:$0xf] %v2282_v36  ;;  %v2077_v51 = vsel %vm8093_vm2, %v2069_v23, %v2076_v28  ;;  %v2101_v21 = vshll.u32 %v8362_v45, 16  ;;  %v2085_v35 = vor.u32 %v2083_v50, %v2082_v7  ;;  %v2087_v27 = vrot.slane %v2082_v7, 4 }
 0x191   : > { %v2283_v57 = vsel %vm8099_vm4, %v2077_v51, 0  ;;  %v2094_v6 = vor.u32 %v2092_v60, %v2091_v34  ;;  %v2096_v52 = vrot.slane %v2091_v34, 4  ;;  %v2100_v36 = vrot.slane %v2098_v8, 7 }
 0x192   : > { %2319 = vst [vmem:[#allocation3 + $0x50] sm:$0xf] %v2283_v57  ;;  %v2107_v23 = vshrl.u32 %v8436_v33, 16  ;;  %v2110_v28 = vshll.u32 %v8436_v33, 16  ;;  %v2086_v29 = vsel %vm8093_vm2, %v2078_v49, %v2085_v35  ;;  %v2116_v50 = vshrl.u32 %v8441_v43, 16 }
 0x193   : > { %6903 = vmatmul.mubr.bf16.gmra.mxu1 %v7506_v59  ;;  %v2095_v59 = vsel %vm8093_vm2, %v2087_v27, %v2094_v6  ;;  %v2119_v7 = vshll.u32 %v8441_v43, 16  ;;  %v2284_v34 = vsel %vm8105_vm6, %v2086_v29, 0  ;;  %v2103_v51 = vor.u32 %v2101_v21, %v2100_v36  ;;  %v8469_v57 = vld [vmem:[#allocation2 + $0x74] sm:$0xf] }
 0x194   : > { %6906 = vmatprep.mubr.bf16.mxu1 %v7509_v42  ;;  %v2285_v8 = vsel %vm8099_vm4, %v2095_v59, 0  ;;  %2320 = vst [vmem:[#allocation3 + $0x54] sm:$0xf] %v2284_v34  ;;  %v2105_v49 = vrot.slane %v2100_v36, 4  ;;  %v2109_v35 = vrot.slane %v2107_v23, 7  ;;  %v2118_v27 = vrot.slane %v2116_v50, 7 }
 0x195   : > { %2321 = vst [vmem:[#allocation3 + $0x58] sm:$0xf] %v2285_v8  ;;  %v2125_v6 = vshrl.u32 %v8449_v56, 16  ;;  %v2104_v29 = vsel %vm8093_vm2, %v2096_v52, %v2103_v51  ;;  %v2128_v21 = vshll.u32 %v8449_v56, 16  ;;  %v2134_v59 = vshrl.u32 %v8453_v58, 16 }
 0x196   : > { %v2137_v60 = vshll.u32 %v8453_v58, 16  ;;  %v2112_v36 = vor.u32 %v2110_v28, %v2109_v35  ;;  %v2114_v23 = vrot.slane %v2109_v35, 4  ;;  %v2121_v50 = vor.u32 %v2119_v7, %v2118_v27  ;;  %v8480_v34 = vld [vmem:[#allocation2 + $0x78] sm:$0xf]  ;;  %v8490_v35 = vld [vmem:[#allocation2 + $0x7c] sm:$0xf] }
 0x197   : > { %6955 = vmatmul.mubr.bf16.gmra.mxu0 %v7509_v42  ;;  %v2286_v42 = vsel %vm8105_vm6, %v2104_v29, 0  ;;  %v2123_v8 = vrot.slane %v2118_v27, 4  ;;  %v2127_v52 = vrot.slane %v2125_v6, 7  ;;  %v2136_v51 = vrot.slane %v2134_v59, 7  ;;  %v7541_v27 = vld [vmem:[#allocation9 + $0x1b0] sm:$0xff]  }
 0x198   : > { %7022 = vmatprep.mubr.bf16.mxu0 %v8124_v18  ;;  %2322 = vst [vmem:[#allocation3 + $0x5c] sm:$0xf] %v2286_v42  ;;  %v2113_v10 = vsel %vm8093_vm2, %v2105_v49, %v2112_v36  ;;  %v2122_v25 = vsel %vm8093_vm2, %v2114_v23, %v2121_v50  ;;  %v2143_v28 = vshrl.u32 %v8469_v57, 16  ;;  %v2146_v7 = vshll.u32 %v8469_v57, 16  ;;  %v8499_v59 = vld [vmem:[#allocation2 + $0x80] sm:$0xf] }
 0x199   : > { %v2288_v49 = vsel %vm8105_vm6, %v2122_v25, 0  ;;  %v2130_v6 = vor.u32 %v2128_v21, %v2127_v52  ;;  %v2132_v29 = vrot.slane %v2127_v52, 4  ;;  %v8501_v42 = vld [vmem:[#allocation2 + $0x84] sm:$0xf]  ;;  %v2139_v23 = vor.u32 %v2137_v60, %v2136_v51 }
 0x19a   : > { %v7516_v36 = vld [vmem:[#allocation3 + $0x8] sm:$0xff]   ;;  %2324 = vst [vmem:[#allocation3 + $0x64] sm:$0xf] %v2288_v49  ;;  %v2141_v50 = vrot.slane %v2136_v51, 4  ;;  %v2145_v44 = vrot.slane %v2143_v28, 7  ;;  %v2152_v12 = vshrl.u32 %v8480_v34, 16 }
 0x19b   : > { %6907 = vmatmul.mubr.bf16.gmra.mxu1 %v7512_v26  ;;  %v2287_v26 = vsel %vm8099_vm4, %v2113_v10, 0  ;;  %v2131_v21 = vsel %vm8093_vm2, %v2123_v8, %v2130_v6  ;;  %v2155_v52 = vshll.u32 %v8480_v34, 16  ;;  %v2140_v60 = vsel %vm8093_vm2, %v2132_v29, %v2139_v23  ;;  %v8515_v49 = vld [vmem:[#allocation2 + $0x88] sm:$0xf]  ;;  %v7523_v29 = vld [vmem:[#allocation9 + $0xf0] sm:$0xff]  }
 0x19c   : > { %6974 = vmatprep.mubr.bf16.mxu1 %v6004_v22  ;;  %2323 = vst [vmem:[#allocation3 + $0x60] sm:$0xf] %v2287_v26  ;;  %v7517_v22 = vld [vmem:[#allocation3 + $0x10] sm:$0xff]   ;;  %v2289_v51 = vsel %vm8099_vm4, %v2131_v21, 0  ;;  %v2148_v28 = vor.u32 %v2146_v7, %v2145_v44  ;;  %v2150_v26 = vrot.slane %v2145_v44, 4  ;;  %v2290_v25 = vsel %vm8105_vm6, %v2140_v60, 0 }
 0x19d   : > { %2325 = vst [vmem:[#allocation3 + $0x68] sm:$0xf] %v2289_v51  ;;  %v2154_v8 = vrot.slane %v2152_v12, 7  ;;  %v2161_v6 = vshrl.u32 %v8490_v35, 16  ;;  %2326 = vst [vmem:[#allocation3 + $0x6c] sm:$0xf] %v2290_v25 }
 0x19e   : > { %v2149_v7 = vsel %vm8093_vm2, %v2141_v50, %v2148_v28  ;;  %v2170_v23 = vshrl.u32 %v8499_v59, 16  ;;  %v2173_v44 = vshll.u32 %v8499_v59, 16  ;;  %v8529_v10 = vld [vmem:[#allocation2 + $0x10] sm:$0xf]  ;;  %v2182_v18 = vshll.u32 %v8501_v42, 16 }
 0x19f   : > { %7023 = vmatmul.mubr.bf16.vlgmr.msra.gmra.mxu0 %v7516_v36  ;;  %v2164_v36 = vshll.u32 %v8490_v35, 16  ;;  %v2157_v21 = vor.u32 %v2155_v52, %v2154_v8  ;;  %v2159_v60 = vrot.slane %v2154_v8, 4  ;;  %v2291_v12 = vsel %vm8099_vm4, %v2149_v7, 0  ;;  %v8534_v50 = vld [vmem:[#allocation9 + $0xe8] sm:$0xff]  }
 0x1a0   : > { %7026 = vmatprep.mubr.bf16.mxu0 %v7517_v22  ;;  %7103 = vmatpush3.bf16.msra.mxu0 %v8324_v55  ;;  %v2179_v55 = vshrl.u32 %v8501_v42, 16  ;;  %v7544_v22 = vld [vmem:[#allocation9 + $0x1a8] sm:$0xff]   ;;  %v2163_v51 = vrot.slane %v2161_v6, 7  ;;  %2327 = vst [vmem:[#allocation3 + $0x70] sm:$0xf] %v2291_v12  ;;  %v2172_v25 = vrot.slane %v2170_v23, 7 }
 0x1a1   : > { %7104 = vmatprep.subr.bf16.mxu0 %v7541_v27  ;;  %v2188_v52 = vshrl.u32 %v8515_v49, 16  ;;  %v7521_v8 = vld [vmem:[#allocation3 + $0x18] sm:$0xff]   ;;  %v8542_v6 = vld [vmem:[#allocation9 + $0x1a0] sm:$0xff]   ;;  %v2158_v14 = vsel %vm8093_vm2, %v2150_v26, %v2157_v21  ;;  %v7522_v12 = vld [vmem:[#allocation3 + $0x20] sm:$0xff]   ;;  %v2191_v21 = vshll.u32 %v8515_v49, 16 }
 0x1a2   : > { %v2181_v28 = vrot.slane %v2179_v55, 7  ;;  %v2168_v7 = vrot.slane %v2163_v51, 4  ;;  %v3496_v23 = vld [vmem:[#allocation2 + $0x14] sm:$0xf]  ;;  %v8548_v55 = vld [vmem:[#allocation2 + $0x1c] sm:$0xf]  ;;  %v2175_v0 = vor.u32 %v2173_v44, %v2172_v25 }
 0x1a3   : > { %6975 = vmatmul.mubr.bf16.vlgmr.msra.gmra.mxu1 %v6005_v13  ;;  %v2166_v13 = vor.u32 %v2164_v36, %v2163_v51  ;;  %v2292_v63 = vsel %vm8105_vm6, %v2158_v14, 0  ;;  %v8554_v36 = vrot.slane %v2188_v52, 7  ;;  %v8557_v51 = vld [vmem:[#allocation9 + $0xe0] sm:$0xff]  }
 0x1a4   : > { %7055 = vmatpush3.bf16.msra.mxu1 %v8339_v24  ;;  %6978 = vmatprep.mubr.bf16.mxu1 %v6006_v31  ;;  %v2177_v31 = vrot.slane %v2172_v25, 4  ;;  %v2184_v24 = vor.u32 %v2182_v18, %v2181_v28  ;;  %2328 = vst [vmem:[#allocation3 + $0x74] sm:$0xf] %v2292_v63  ;;  %v2186_v26 = vrot.slane %v2181_v28, 4  ;;  %v3497_v25 = vld [vmem:[#allocation2 + $0x18] sm:$0xf] }
 0x1a5   : > { %7056 = vmatprep.subr.bf16.mxu1 %v7523_v29  ;;  %7105 = vmatpush3.bf16.msra.mxu0 %v7541_v27  ;;  %v2167_v48 = vsel %vm8093_vm2, %v2159_v60, %v2166_v13  ;;  %v2176_v27 = vsel %vm8093_vm2, %v2168_v7, %v2175_v0  ;;  %v3562_v60 = vshll.u32 %v8529_v10, 16  ;;  %v8566_v28 = vld [vmem:[#allocation9 + $0x198] sm:$0xff]   ;;  %v2193_v14 = vor.u32 %v2191_v21, %v8554_v36 }
 0x1a6   : > { %7106 = vmatprep.subr.bf16.mxu0 %v7544_v22  ;;  %v2293_v18 = vsel %vm8099_vm4, %v2167_v48, 0  ;;  %v2185_v44 = vsel %vm8093_vm2, %v2177_v31, %v2184_v24  ;;  %v3499_v13 = vld [vmem:[#allocation2 + $0x20] sm:$0xf]  ;;  %v3566_v7 = vshrl.u32 %v8529_v10, 16  ;;  %v3572_v63 = vshll.u32 %v3496_v23, 16 }
 0x1a7   : > { %7027 = vmatmul.mubr.bf16.gmra.mxu0 %v7521_v8  ;;  %v2294_v8 = vsel %vm8105_vm6, %v2176_v27, 0  ;;  %2329 = vst [vmem:[#allocation3 + $0x78] sm:$0xf] %v2293_v18  ;;  %v2295_v48 = vsel %vm8099_vm4, %v2185_v44, 0  ;;  %v3576_v0 = vshrl.u32 %v3496_v23, 16  ;;  %v2194_v24 = vsel %vm8093_vm2, %v2186_v26, %v2193_v14 }
 0x1a8   : > { %7030 = vmatprep.mubr.bf16.mxu0 %v7522_v12  ;;  %7057 = vmatpush3.bf16.msra.mxu1 %v7523_v29  ;;  %2330 = vst [vmem:[#allocation3 + $0x7c] sm:$0xf] %v2294_v8  ;;  %2331 = vst [vmem:[#allocation3 + $0x80] sm:$0xf] %v2295_v48  ;;  %v3564_v29 = vrot.slane %v3562_v60, 5  ;;  %v8580_v12 = vld [vmem:[#allocation3 + $0x8] sm:$0xff]  }
 0x1a9   : > { %7058 = vmatprep.subr.bf16.mxu1 %v8534_v50  ;;  %7107 = vmatpush3.bf16.msra.mxu0 %v7544_v22  ;;  %v3500_v31 = vld [vmem:[#allocation2 + $0x24] sm:$0xf]  ;;  %v3582_v21 = vshll.u32 %v3497_v25, 16  ;;  %v3586_v27 = vshrl.u32 %v3497_v25, 16  ;;  %v3592_v18 = vshll.u32 %v8548_v55, 16  ;;  %v2296_v10 = vsel %vm8105_vm6, %v2194_v24, 0 }
 0x1aa   : > { %7108 = vmatprep.subr.bf16.mxu0 %v8542_v6  ;;  %v8586_v22 = vld [vmem:[#allocation9 + $0xd8] sm:$0xff]   ;;  %v3565_v23 = vsel %vm8118_vm9, %v8381_v37, %v3564_v29  ;;  %v3568_v26 = vrot.slane %v3566_v7, 4  ;;  %v3574_v44 = vrot.slane %v3572_v63, 5  ;;  %v9643_v25 = vcombine.low %v8334_v61, %v8337_v19  ;;  %2332 = vst [vmem:[#allocation3 + $0x84] sm:$0xf] %v2296_v10  ;;  %v7527_v48 = vld [vmem:[#allocation3 + $0x30] sm:$0xff]  }
 0x1ab   : > { %6979 = vmatmul.mubr.bf16.gmra.mxu1 %v6007_v30  ;;  %v3578_v1 = vrot.slane %v3576_v0, 4  ;;  %v3584_v9 = vrot.slane %v3582_v21, 5  ;;  %v3588_v30 = vrot.slane %v3586_v27, 4  ;;  %v3948_v60 = vsel %vm8105_vm6, %v3565_v23, 0  ;;  %v7526_v8 = vld [vmem:[#allocation3 + $0x28] sm:$0xff]   ;;  %v8603_v21 = vld [vmem:[#allocation9 + $0xd0] sm:$0xff]  }
 0x1ac   : > { %6982 = vmatprep.mubr.bf16.mxu1 %v9643_v25  ;;  %7059 = vmatpush3.bf16.msra.mxu1 %v8534_v50  ;;  %v3569_v37 = vor.u32 %v3568_v26, %v3564_v29  ;;  %3984 = vst [vmem:[#allocation3 + $0x8] sm:$0xf] %v3948_v60  ;;  %v3594_v14 = vrot.slane %v3592_v18, 5  ;;  %v3596_v61 = vshrl.u32 %v8548_v55, 16  ;;  %v3602_v19 = vshll.u32 %v3499_v13, 16  ;;  %v7555_v50 = vld [vmem:[#allocation9 + $0x190] sm:$0xff]  }
 0x1ad   : > { %7060 = vmatprep.subr.bf16.mxu1 %v8557_v51  ;;  %7109 = vmatpush3.bf16.msra.mxu0 %v8542_v6  ;;  %v3579_v7 = vor.u32 %v3578_v1, %v3574_v44  ;;  %v3589_v63 = vor.u32 %v3588_v30, %v3584_v9  ;;  %v3606_v0 = vshrl.u32 %v3499_v13, 16  ;;  %v3612_v24 = vshll.u32 %v3500_v31, 16  ;;  %v8605_v27 = vld [vmem:[#allocation3 + $0x10] sm:$0xff]   ;;  %v8611_v13 = vld [vmem:[#allocation9 + $0x188] sm:$0xff]  }
 0x1ae   : > { %7110 = vmatprep.subr.bf16.mxu0 %v8566_v28  ;;  %v3570_v6 = vrot.slane %v3569_v37, 4  ;;  %v8607_v29 = vld [vmem:[#allocation3 + $0x10] sm:$0xff]   ;;  %v3598_v18 = vrot.slane %v3596_v61, 4  ;;  %v3604_v10 = vrot.slane %v3602_v19, 5  ;;  %v3616_v55 = vshrl.u32 %v3500_v31, 16 }
 0x1af   : > { %7031 = vmatmul.mubr.bf16.gmra.mxu0 %v7526_v8  ;;  %v3501_v23 = vld [vmem:[#allocation2 + $0x28] sm:$0xf]  ;;  %v3502_v26 = vld [vmem:[#allocation2 + $0x2c] sm:$0xf]  ;;  %v3580_v1 = vrot.slane %v3579_v7, 4  ;;  %v3590_v30 = vrot.slane %v3589_v63, 4 }
 0x1b0   : > { %7034 = vmatprep.mubr.bf16.mxu0 %v7527_v48  ;;  %7061 = vmatpush3.bf16.msra.mxu1 %v8557_v51  ;;  %v3608_v60 = vrot.slane %v3606_v0, 4  ;;  %v8613_v8 = vld [vmem:[#allocation2 + $0x30] sm:$0xf]  ;;  %v3575_v31 = vsel %vm8118_vm9, %v3570_v6, %v3574_v44  ;;  %v3599_v37 = vor.u32 %v3598_v18, %v3594_v14  ;;  %v3614_v61 = vrot.slane %v3612_v24, 5 }
 0x1b1   : > { %7062 = vmatprep.subr.bf16.mxu1 %v8586_v22  ;;  %7111 = vmatpush3.bf16.msra.mxu0 %v8566_v28  ;;  %v3618_v19 = vrot.slane %v3616_v55, 4  ;;  %v3585_v51 = vsel %vm8118_vm9, %v3580_v1, %v3584_v9  ;;  %v3949_v48 = vsel %vm8247_vm11, %v3575_v31, 0  ;;  %v8623_v7 = vld [vmem:[#allocation3 + $0x18] sm:$0xff]   ;;  %v3595_v63 = vsel %vm8118_vm9, %v3590_v30, %v3594_v14 }
 0x1b2   : > { %7112 = vmatprep.subr.bf16.mxu0 %v7555_v50  ;;  %v8627_v0 = vld [vmem:[#allocation3 + $0x18] sm:$0xff]   ;;  %v3609_v28 = vor.u32 %v3608_v60, %v3604_v10  ;;  %v9644_v44 = vcombine.low %v8349_v20, %v8366_v54  ;;  %3985 = vst [vmem:[#allocation3 + $0xc] sm:$0xf] %v3949_v48  ;;  %v3950_v9 = vsel %vm8105_vm6, %v3585_v51, 0  ;;  %v3951_v18 = vsel %vm8247_vm11, %v3595_v63, 0  ;;  %v8642_v20 = vld [vmem:[#allocation9 + $0x180] sm:$0xff]  }
 0x1b3   : > { %v7531_v24 = vld [vmem:[#allocation3 + $0x38] sm:$0xff]   ;;  %v3600_v55 = vrot.slane %v3599_v37, 4  ;;  %v3619_v1 = vor.u32 %v3618_v19, %v3614_v61  ;;  %v9645_v14 = vcombine.low %v8374_v15, %v8388_v40  ;;  %3986 = vst [vmem:[#allocation3 + $0x10] sm:$0xf] %v3950_v9  ;;  %3987 = vst [vmem:[#allocation3 + $0x14] sm:$0xf] %v3951_v18 }
 0x1b4   : > { %6983 = vmatmul.mubr.bf16.gmra.mxu1 %v9644_v44  ;;  %v8632_v6 = vld [vmem:[#allocation9 + $0xc8] sm:$0xff]   ;;  %v3610_v54 = vrot.slane %v3609_v28, 4  ;;  %v3622_v30 = vshll.u32 %v3501_v23, 16  ;;  %v3626_v60 = vshrl.u32 %v3501_v23, 16  ;;  %v3632_v31 = vshll.u32 %v3502_v26, 16  ;;  %v7532_v51 = vld [vmem:[#allocation3 + $0x40] sm:$0xff]  }
 0x1b5   : > { %6986 = vmatprep.mubr.bf16.mxu1 %v9645_v14  ;;  %7063 = vmatpush3.bf16.msra.mxu1 %v8586_v22  ;;  %v8645_v37 = vld [vmem:[#allocation3 + $0x20] sm:$0xff]   ;;  %v3605_v15 = vsel %vm8118_vm9, %v3600_v55, %v3604_v10  ;;  %v3620_v40 = vrot.slane %v3619_v1, 4  ;;  %v3636_v19 = vshrl.u32 %v3502_v26, 16  ;;  %v3504_v22 = vld [vmem:[#allocation2 + $0x34] sm:$0xf]  ;;  %v3642_v48 = vshll.u32 %v8613_v8, 16 }
 0x1b6   : > { %7064 = vmatprep.subr.bf16.mxu1 %v8603_v21  ;;  %7113 = vmatpush3.bf16.msra.mxu0 %v7555_v50  ;;  %v3615_v23 = vsel %vm8118_vm9, %v3610_v54, %v3614_v61  ;;  %v3952_v63 = vsel %vm8105_vm6, %v3605_v15, 0  ;;  %v8655_v28 = vld [vmem:[#allocation3 + $0x20] sm:$0xff]   ;;  %v3624_v50 = vrot.slane %v3622_v30, 5  ;;  %v3628_v44 = vrot.slane %v3626_v60, 4  ;;  %v8667_v15 = vld [vmem:[#allocation9 + $0x178] sm:$0xff]  }
 0x1b7   : > { %7114 = vmatprep.subr.bf16.mxu0 %v8611_v13  ;;  %v3505_v9 = vld [vmem:[#allocation2 + $0x38] sm:$0xf]  ;;  %7035 = vmatmul.mubr.bf16.gmra.mxu0 %v7531_v24  ;;  %v3953_v10 = vsel %vm8247_vm11, %v3615_v23, 0  ;;  %3988 = vst [vmem:[#allocation3 + $0x18] sm:$0xf] %v3952_v63  ;;  %v3634_v26 = vrot.slane %v3632_v31, 5 }
 0x1b8   : > { %v3638_v18 = vrot.slane %v3636_v19, 4  ;;  %v3644_v55 = vrot.slane %v3642_v48, 5  ;;  %7038 = vmatprep.mubr.bf16.mxu0 %v7532_v51  ;;  %3989 = vst [vmem:[#allocation3 + $0x1c] sm:$0xf] %v3953_v10  ;;  %v3625_v61 = vsel %vm8118_vm9, %v3620_v40, %v3624_v50  ;;  %v3629_v1 = vor.u32 %v3628_v44, %v3624_v50  ;;  %v3506_v30 = vld [vmem:[#allocation2 + $0x3c] sm:$0xf] }
 0x1b9   : > { %7065 = vmatpush3.bf16.msra.mxu1 %v8603_v21  ;;  %v3646_v14 = vshrl.u32 %v8613_v8, 16  ;;  %v3652_v54 = vshll.u32 %v3504_v22, 16  ;;  %v7560_v24 = vld [vmem:[#allocation9 + $0xc0] sm:$0xff]   ;;  %v3954_v60 = vsel %vm8105_vm6, %v3625_v61, 0  ;;  %v3656_v51 = vshrl.u32 %v3504_v22, 16  ;;  %v8670_v40 = vld [vmem:[#allocation3 + $0x28] sm:$0xff]  }
 0x1ba   : > { %7066 = vmatprep.subr.bf16.mxu1 %v8632_v6  ;;  %7115 = vmatpush3.bf16.msra.mxu0 %v8611_v13  ;;  %v3639_v31 = vor.u32 %v3638_v18, %v3634_v26  ;;  %v3662_v21 = vshll.u32 %v3505_v9, 16  ;;  %v3630_v8 = vrot.slane %v3629_v1, 4  ;;  %3990 = vst [vmem:[#allocation3 + $0x20] sm:$0xf] %v3954_v60  ;;  %v8672_v19 = vld [vmem:[#allocation3 + $0x28] sm:$0xff]   ;;  %v3666_v13 = vshrl.u32 %v3505_v9, 16 }
 0x1bb   : > { %7116 = vmatprep.subr.bf16.mxu0 %v8642_v20  ;;  %v3648_v48 = vrot.slane %v3646_v14, 4  ;;  %v3654_v23 = vrot.slane %v3652_v54, 5  ;;  %v3507_v63 = vld [vmem:[#allocation2 + $0x40] sm:$0xf]  ;;  %v3508_v50 = vld [vmem:[#allocation2 + $0x44] sm:$0xf]  ;;  %v9646_v44 = vcombine.low %v8397_v46, %v8390_v41  ;;  %v9647_v1 = vcombine.low %v8287_v2, %v8289_v5 }
 0x1bc   : > { %v7536_v22 = vld [vmem:[#allocation3 + $0x48] sm:$0xff]   ;;  %v3640_v18 = vrot.slane %v3639_v31, 4  ;;  %v3658_v61 = vrot.slane %v3656_v51, 4  ;;  %v3664_v25 = vrot.slane %v3662_v21, 5  ;;  %v3672_v52 = vshll.u32 %v3506_v30, 16  ;;  %v7538_v5 = vld [vmem:[#allocation3 + $0x50] sm:$0xff]  }
 0x1bd   : > { %6987 = vmatmul.mubr.bf16.gmra.mxu1 %v9646_v44  ;;  %v8677_v10 = vld [vmem:[#allocation9 + $0xb8] sm:$0xff]   ;;  %v3635_v9 = vsel %vm8118_vm9, %v3630_v8, %v3634_v26  ;;  %v3649_v14 = vor.u32 %v3648_v48, %v3644_v55  ;;  %v3668_v54 = vrot.slane %v3666_v13, 4  ;;  %v3676_v41 = vshrl.u32 %v3506_v30, 16  ;;  %v8690_v51 = vld [vmem:[#allocation3 + $0x30] sm:$0xff]  }
 0x1be   : > { %6990 = vmatprep.mubr.bf16.mxu1 %v9647_v1  ;;  %7067 = vmatpush3.bf16.msra.mxu1 %v8632_v6  ;;  %v3955_v46 = vsel %vm8247_vm11, %v3635_v9, 0  ;;  %v3645_v60 = vsel %vm8118_vm9, %v3640_v18, %v3644_v55  ;;  %v3659_v31 = vor.u32 %v3658_v61, %v3654_v23  ;;  %v3674_v2 = vrot.slane %v3672_v52, 5  ;;  %v8694_v30 = vld [vmem:[#allocation3 + $0x30] sm:$0xff]  }
 0x1bf   : > { %7068 = vmatprep.subr.bf16.mxu1 %v7560_v24  ;;  %7117 = vmatpush3.bf16.msra.mxu0 %v8642_v20  ;;  %3991 = vst [vmem:[#allocation3 + $0x24] sm:$0xf] %v3955_v46  ;;  %v3650_v6 = vrot.slane %v3649_v14, 4  ;;  %v3956_v26 = vsel %vm8105_vm6, %v3645_v60, 0  ;;  %v3669_v21 = vor.u32 %v3668_v54, %v3664_v25  ;;  %v3678_v20 = vrot.slane %v3676_v41, 4  ;;  %v8704_v46 = vld [vmem:[#allocation3 + $0x38] sm:$0xff]  }
 0x1c0   : > { %v3509_v8 = vld [vmem:[#allocation2 + $0x48] sm:$0xf]  ;;  %7198 = vmatprep.subr.bf16.mxu0 %v8667_v15  ;;  %7039 = vmatmul.mubr.bf16.gmra.mxu0 %v7536_v22  ;;  %3992 = vst [vmem:[#allocation3 + $0x28] sm:$0xf] %v3956_v26  ;;  %v3660_v55 = vrot.slane %v3659_v31, 4  ;;  %v3682_v48 = vshll.u32 %v3507_v63, 16 }
 0x1c1   : > { %v3686_v52 = vshrl.u32 %v3507_v63, 16  ;;  %v3692_v13 = vshll.u32 %v3508_v50, 16  ;;  %v3510_v44 = vld [vmem:[#allocation2 + $0x4c] sm:$0xf]  ;;  %7042 = vmatprep.mubr.bf16.mxu0 %v7538_v5  ;;  %v3655_v18 = vsel %vm8118_vm9, %v3650_v6, %v3654_v23  ;;  %v3670_v61 = vrot.slane %v3669_v21, 4  ;;  %v8715_v6 = vld [vmem:[#allocation3 + $0x38] sm:$0xff]  }
 0x1c2   : > { %7069 = vmatpush3.bf16.msra.mxu1 %v7560_v24  ;;  %v3679_v1 = vor.u32 %v3678_v20, %v3674_v2  ;;  %v3696_v9 = vshrl.u32 %v3508_v50, 16  ;;  %v3957_v14 = vsel %vm8247_vm11, %v3655_v18, 0  ;;  %v3665_v22 = vsel %vm8118_vm9, %v3660_v55, %v3664_v25  ;;  %v3511_v41 = vld [vmem:[#allocation2 + $0x50] sm:$0xf]  ;;  %v3512_v31 = vld [vmem:[#allocation2 + $0x54] sm:$0xf] }
 0x1c3   : > { %7150 = vmatprep.subr.bf16.mxu1 %v8677_v10  ;;  %v3684_v54 = vrot.slane %v3682_v48, 5  ;;  %v3688_v63 = vrot.slane %v3686_v52, 4  ;;  %3993 = vst [vmem:[#allocation3 + $0x2c] sm:$0xf] %v3957_v14  ;;  %v3675_v24 = vsel %vm8118_vm9, %v3670_v61, %v3674_v2  ;;  %v3958_v23 = vsel %vm8105_vm6, %v3665_v22, 0  ;;  %v7543_v55 = vld [vmem:[#allocation3 + $0x58] sm:$0xff]  }
 0x1c4   : > { %v3680_v50 = vrot.slane %v3679_v1, 4  ;;  %v3694_v60 = vrot.slane %v3692_v13, 5  ;;  %v9648_v5 = vcombine.low %v8358_v47, %v8362_v45  ;;  %v3959_v25 = vsel %vm8247_vm11, %v3675_v24, 0  ;;  %3994 = vst [vmem:[#allocation3 + $0x30] sm:$0xf] %v3958_v23  ;;  %v7545_v13 = vld [vmem:[#allocation3 + $0x60] sm:$0xff]  }
 0x1c5   : > { %v3689_v26 = vor.u32 %v3688_v63, %v3684_v54  ;;  %v3698_v21 = vrot.slane %v3696_v9, 4  ;;  %v3702_v20 = vshll.u32 %v3509_v8, 16  ;;  %v9649_v2 = vcombine.low %v8436_v33, %v8441_v43  ;;  %3995 = vst [vmem:[#allocation3 + $0x34] sm:$0xf] %v3959_v25  ;;  %v8724_v14 = vld [vmem:[#allocation3 + $0x40] sm:$0xff]  }
 0x1c6   : > { %6991 = vmatmul.mubr.bf16.gmra.mxu1 %v9648_v5  ;;  %v3685_v48 = vsel %vm8118_vm9, %v3680_v50, %v3684_v54  ;;  %v3706_v47 = vshrl.u32 %v3509_v8, 16  ;;  %v3712_v45 = vshll.u32 %v3510_v44, 16  ;;  %v3716_v52 = vshrl.u32 %v3510_v44, 16  ;;  %v8728_v54 = vld [vmem:[#allocation3 + $0x40] sm:$0xff]  }
 0x1c7   : > { %6994 = vmatprep.mubr.bf16.mxu1 %v9649_v2  ;;  %v3690_v18 = vrot.slane %v3689_v26, 4  ;;  %v3960_v61 = vsel %vm8105_vm6, %v3685_v48, 0  ;;  %v3699_v1 = vor.u32 %v3698_v21, %v3694_v60  ;;  %v3704_v9 = vrot.slane %v3702_v20, 5  ;;  %v3513_v21 = vld [vmem:[#allocation2 + $0x58] sm:$0xf]  ;;  %v8732_v20 = vld [vmem:[#allocation3 + $0x48] sm:$0xff]  }
 0x1c8   : > { %3996 = vst [vmem:[#allocation3 + $0x38] sm:$0xf] %v3960_v61  ;;  %v3708_v33 = vrot.slane %v3706_v47, 4  ;;  %v3714_v43 = vrot.slane %v3712_v45, 5  ;;  %v3718_v22 = vrot.slane %v3716_v52, 4  ;;  %v3722_v63 = vshll.u32 %v3511_v41, 16  ;;  %7043 = vmatmul.mubr.bf16.gmra.mxu0 %v7543_v55 }
 0x1c9   : > { %v3695_v8 = vsel %vm8118_vm9, %v3690_v18, %v3694_v60  ;;  %v3700_v44 = vrot.slane %v3699_v1, 4  ;;  %v3726_v24 = vshrl.u32 %v3511_v41, 16  ;;  %v3732_v23 = vshll.u32 %v3512_v31, 16  ;;  %7046 = vmatprep.mubr.bf16.mxu0 %v7545_v13  ;;  %v3514_v47 = vld [vmem:[#allocation2 + $0x5c] sm:$0xf]  ;;  %v7550_v61 = vld [vmem:[#allocation3 + $0x68] sm:$0xff]  }
 0x1ca   : > { %v3961_v50 = vsel %vm8247_vm11, %v3695_v8, 0  ;;  %v3709_v5 = vor.u32 %v3708_v33, %v3704_v9  ;;  %v3719_v25 = vor.u32 %v3718_v22, %v3714_v43  ;;  %v3724_v26 = vrot.slane %v3722_v63, 5  ;;  %v8741_v1 = vld [vmem:[#allocation3 + $0x48] sm:$0xff]  }
 0x1cb   : > { %3997 = vst [vmem:[#allocation3 + $0x3c] sm:$0xf] %v3961_v50  ;;  %v3705_v2 = vsel %vm8118_vm9, %v3700_v44, %v3704_v9  ;;  %v3728_v60 = vrot.slane %v3726_v24, 4  ;;  %v3734_v55 = vrot.slane %v3732_v23, 5  ;;  %v3736_v48 = vshrl.u32 %v3512_v31, 16  ;;  %v7552_v50 = vld [vmem:[#allocation3 + $0x70] sm:$0xff]  }
 0x1cc   : > { %v3710_v41 = vrot.slane %v3709_v5, 4  ;;  %v3962_v45 = vsel %vm8105_vm6, %v3705_v2, 0  ;;  %v3720_v52 = vrot.slane %v3719_v25, 4  ;;  %v3742_v13 = vshll.u32 %v3513_v21, 16  ;;  %v3515_v24 = vld [vmem:[#allocation2 + $0x60] sm:$0xf] }
 0x1cd   : > { %v9650_v18 = vcombine.low %v8449_v56, %v8453_v58  ;;  %3998 = vst [vmem:[#allocation3 + $0x40] sm:$0xf] %v3962_v45  ;;  %v3729_v33 = vor.u32 %v3728_v60, %v3724_v26  ;;  %v3738_v9 = vrot.slane %v3736_v48, 4  ;;  %v3746_v22 = vshrl.u32 %v3513_v21, 16  ;;  %v3516_v23 = vld [vmem:[#allocation2 + $0x64] sm:$0xf] }
 0x1ce   : > { %v3752_v63 = vshll.u32 %v3514_v47, 16  ;;  %v9651_v31 = vcombine.low %v8469_v57, %v8480_v34  ;;  %v3715_v8 = vsel %vm8118_vm9, %v3710_v41, %v3714_v43  ;;  %v3725_v44 = vsel %vm8118_vm9, %v3720_v52, %v3724_v26  ;;  %v8754_v34 = vld [vmem:[#allocation3 + $0x50] sm:$0xff]  }
 0x1cf   : > { %6995 = vmatmul.mubr.bf16.gmra.mxu1 %v9650_v18  ;;  %v3744_v56 = vrot.slane %v3742_v13, 5  ;;  %v3756_v58 = vshrl.u32 %v3514_v47, 16  ;;  %v3963_v5 = vsel %vm8247_vm11, %v3715_v8, 0  ;;  %v3730_v25 = vrot.slane %v3729_v33, 4  ;;  %v8758_v47 = vld [vmem:[#allocation3 + $0x50] sm:$0xff]   ;;  %v8766_v8 = vld [vmem:[#allocation3 + $0x58] sm:$0xff]  }
 0x1d0   : > { %6998 = vmatprep.mubr.bf16.mxu1 %v9651_v31  ;;  %v3964_v21 = vsel %vm8105_vm6, %v3725_v44, 0  ;;  %v3739_v57 = vor.u32 %v3738_v9, %v3734_v55  ;;  %3999 = vst [vmem:[#allocation3 + $0x44] sm:$0xf] %v3963_v5  ;;  %v3748_v43 = vrot.slane %v3746_v22, 4  ;;  %v3754_v2 = vrot.slane %v3752_v63, 5  ;;  %7047 = vmatmul.mubr.bf16.gmra.mxu0 %v7550_v61 }
 0x1d1   : > { %4000 = vst [vmem:[#allocation3 + $0x48] sm:$0xf] %v3964_v21  ;;  %v3758_v26 = vrot.slane %v3756_v58, 4  ;;  %v3762_v60 = vshll.u32 %v3515_v24, 16  ;;  %v3735_v48 = vsel %vm8118_vm9, %v3730_v25, %v3734_v55  ;;  %v3766_v45 = vshrl.u32 %v3515_v24, 16  ;;  %7050 = vmatprep.mubr.bf16.mxu0 %v7552_v50 }
 0x1d2   : > { %v3740_v41 = vrot.slane %v3739_v57, 4  ;;  %v3772_v52 = vshll.u32 %v3516_v23, 16  ;;  %v3965_v13 = vsel %vm8247_vm11, %v3735_v48, 0  ;;  %v3749_v18 = vor.u32 %v3748_v43, %v3744_v56  ;;  %v3517_v50 = vld [vmem:[#allocation2 + $0x68] sm:$0xf]  ;;  %v7557_v48 = vld [vmem:[#allocation3 + $0x78] sm:$0xff]  }
 0x1d3   : > { %v3759_v33 = vor.u32 %v3758_v26, %v3754_v2  ;;  %v3764_v9 = vrot.slane %v3762_v60, 5  ;;  %4001 = vst [vmem:[#allocation3 + $0x4c] sm:$0xf] %v3965_v13  ;;  %v3768_v61 = vrot.slane %v3766_v45, 4  ;;  %v3776_v31 = vshrl.u32 %v3516_v23, 16  ;;  %v8783_v13 = vld [vmem:[#allocation3 + $0x60] sm:$0xff]  }
 0x1d4   : > { %v3745_v22 = vsel %vm8118_vm9, %v3740_v41, %v3744_v56  ;;  %v3774_v63 = vrot.slane %v3772_v52, 5  ;;  %v6018_v55 = vcombine.low %v8501_v42, %v8515_v49  ;;  %v3750_v44 = vrot.slane %v3749_v18, 4  ;;  %v8773_v56 = vld [vmem:[#allocation3 + $0x58] sm:$0xff]   ;;  %v3518_v23 = vld [vmem:[#allocation2 + $0x6c] sm:$0xf] }
 0x1d5   : > { %v3966_v58 = vsel %vm8105_vm6, %v3745_v22, 0  ;;  %v3760_v24 = vrot.slane %v3759_v33, 4  ;;  %v9652_v5 = vcombine.low %v8490_v35, %v8499_v59  ;;  %v3769_v25 = vor.u32 %v3768_v61, %v3764_v9  ;;  %v3519_v52 = vld [vmem:[#allocation2 + $0x70] sm:$0xf] }
 0x1d6   : > { %4002 = vst [vmem:[#allocation3 + $0x50] sm:$0xf] %v3966_v58  ;;  %v3778_v21 = vrot.slane %v3776_v31, 4  ;;  %v3782_v57 = vshll.u32 %v3517_v50, 16  ;;  %v3786_v42 = vshrl.u32 %v3517_v50, 16  ;;  %v3755_v49 = vsel %vm8118_vm9, %v3750_v44, %v3754_v2  ;;  %v8787_v31 = vld [vmem:[#allocation3 + $0x60] sm:$0xff]  }
 0x1d7   : > { %6999 = vmatmul.mubr.bf16.gmra.mxu1 %v9652_v5  ;;  %v3765_v43 = vsel %vm8118_vm9, %v3760_v24, %v3764_v9  ;;  %v3792_v26 = vshll.u32 %v3518_v23, 16  ;;  %v3796_v60 = vshrl.u32 %v3518_v23, 16  ;;  %v3967_v35 = vsel %vm8247_vm11, %v3755_v49, 0  ;;  %v3520_v9 = vld [vmem:[#allocation2 + $0x74] sm:$0xf]  ;;  %v8792_v23 = vld [vmem:[#allocation3 + $0x68] sm:$0xff]  }
 0x1d8   : > { %7002 = vmatprep.mubr.bf16.mxu1 %v6018_v55  ;;  %v3770_v59 = vrot.slane %v3769_v25, 4  ;;  %v3968_v41 = vsel %vm8105_vm6, %v3765_v43, 0  ;;  %v3779_v45 = vor.u32 %v3778_v21, %v3774_v63  ;;  %4003 = vst [vmem:[#allocation3 + $0x54] sm:$0xf] %v3967_v35  ;;  %v3784_v2 = vrot.slane %v3782_v57, 5  ;;  %7051 = vmatmul.mubr.bf16.gmra.mxu0 %v7557_v48  ;;  %v8803_v35 = vld [vmem:[#allocation9 + $0x170] sm:$0xff]  }
 0x1d9   : > { %4004 = vst [vmem:[#allocation3 + $0x58] sm:$0xf] %v3968_v41  ;;  %v3788_v18 = vrot.slane %v3786_v42, 4  ;;  %v3794_v33 = vrot.slane %v3792_v26, 5  ;;  %v3798_v22 = vrot.slane %v3796_v60, 4  ;;  %v3802_v44 = vshll.u32 %v3519_v52, 16  ;;  %7118 = vmatprep.mubr.bf16.mxu0 %v8605_v27 }
 0x1da   : > { %v3775_v61 = vsel %vm8118_vm9, %v3770_v59, %v3774_v63  ;;  %v3780_v55 = vrot.slane %v3779_v45, 4  ;;  %v3806_v58 = vshrl.u32 %v3519_v52, 16  ;;  %v3812_v25 = vshll.u32 %v3520_v9, 16  ;;  %v8796_v63 = vld [vmem:[#allocation3 + $0x68] sm:$0xff]   ;;  %v3521_v41 = vld [vmem:[#allocation2 + $0x78] sm:$0xf] }
 0x1db   : > { %v3969_v24 = vsel %vm8247_vm11, %v3775_v61, 0  ;;  %v3789_v50 = vor.u32 %v3788_v18, %v3784_v2  ;;  %v3799_v5 = vor.u32 %v3798_v22, %v3794_v33  ;;  %v3804_v57 = vrot.slane %v3802_v44, 5  ;;  %v3522_v45 = vld [vmem:[#allocation2 + $0x7c] sm:$0xf] }
 0x1dc   : > { %4005 = vst [vmem:[#allocation3 + $0x5c] sm:$0xf] %v3969_v24  ;;  %v3785_v21 = vsel %vm8118_vm9, %v3780_v55, %v3784_v2  ;;  %v3808_v42 = vrot.slane %v3806_v58, 4  ;;  %v3816_v49 = vshrl.u32 %v3520_v9, 16  ;;  %v3814_v60 = vrot.slane %v3812_v25, 5  ;;  %v8827_v24 = vld [vmem:[#allocation9 + $0xb0] sm:$0xff]  }
 0x1dd   : > { %v3790_v43 = vrot.slane %v3789_v50, 4  ;;  %v3970_v27 = vsel %vm8105_vm6, %v3785_v21, 0  ;;  %v3800_v26 = vrot.slane %v3799_v5, 4  ;;  %v9653_v48 = vcombine.low %v8139_v32, %v8143_v38  ;;  %v8824_v58 = vld [vmem:[#allocation2 + $0x84] sm:$0xf]  ;;  %v8829_v50 = vld [vmem:[#allocation3 + $0x70] sm:$0xff]  }
 0x1de   : > { %4006 = vst [vmem:[#allocation3 + $0x60] sm:$0xf] %v3970_v27  ;;  %v3809_v59 = vor.u32 %v3808_v42, %v3804_v57  ;;  %v9654_v52 = vrot.slane %v8554_v36, 4  ;;  %v9655_v18 = vrot.slane %v8161_v4, 4  ;;  %v3818_v22 = vrot.slane %v3816_v49, 4  ;;  %v7592_v49 = vld [vmem:[#allocation9 + $0x168] sm:$0xff]  }
 0x1df   : > { %7003 = vmatmul.mubr.bf16.gmra.mxu1 %v9653_v48  ;;  %v3795_v32 = vsel %vm8118_vm9, %v3790_v43, %v3794_v33  ;;  %v3805_v38 = vsel %vm8118_vm9, %v3800_v26, %v3804_v57  ;;  %v3822_v61 = vshll.u32 %v3521_v41, 16  ;;  %v3826_v55 = vshrl.u32 %v3521_v41, 16  ;;  %v3526_v42 = vld [vmem:[#allocation2 + $0x8c] sm:$0xf]  ;;  %v3527_v48 = vld [vmem:[#allocation2 + $0x90] sm:$0xf] }
 0x1e0   : > { %v2203_v2 = vsel %vm8093_vm2, %v9654_v52, %v8298_v11  ;;  %v2212_v9 = vsel %vm8093_vm2, %v9655_v18, %v8301_v17  ;;  %7070 = vmatprep.mubr.bf16.mxu1 %v8580_v12  ;;  %v3971_v36 = vsel %vm8247_vm11, %v3795_v32, 0  ;;  %v3810_v11 = vrot.slane %v3809_v59, 4  ;;  %7119 = vmatmul.mubr.bf16.vlgmr.msra.gmra.mxu0 %v8623_v7  ;;  %v3528_v52 = vld [vmem:[#allocation2 + $0x94] sm:$0x1] }
 0x1e1   : > { %v3972_v4 = vsel %vm8105_vm6, %v3805_v38, 0  ;;  %4007 = vst [vmem:[#allocation3 + $0x64] sm:$0xf] %v3971_v36  ;;  %v3819_v17 = vor.u32 %v3818_v22, %v3814_v60  ;;  %v3824_v12 = vrot.slane %v3822_v61, 5  ;;  %v3832_v44 = vshll.u32 %v3522_v45, 16  ;;  %7122 = vmatprep.mubr.bf16.mxu0 %v8645_v37  ;;  %7199 = vmatpush3.bf16.msra.mxu0 %v8667_v15  ;;  %v7576_v22 = vld [vmem:[#allocation9 + $0xa8] sm:$0xff]  }
 0x1e2   : > { %4008 = vst [vmem:[#allocation3 + $0x68] sm:$0xf] %v3972_v4  ;;  %v3836_v33 = vshrl.u32 %v3522_v45, 16  ;;  %v3815_v5 = vsel %vm8118_vm9, %v3810_v11, %v3814_v60  ;;  %v3828_v25 = vrot.slane %v3826_v55, 4  ;;  %v3842_v21 = vshll.u32 %v3523_v53, 16  ;;  %7200 = vmatprep.subr.bf16.mxu0 %v8803_v35  ;;  %v8838_v60 = vld [vmem:[#allocation3 + $0x70] sm:$0xff]  }
 0x1e3   : > { %v3846_v57 = vshrl.u32 %v3523_v53, 16  ;;  %v3973_v43 = vsel %vm8247_vm11, %v3815_v5, 0  ;;  %v3820_v7 = vrot.slane %v3819_v17, 4  ;;  %v3834_v27 = vrot.slane %v3832_v44, 5  ;;  %v8848_v61 = vld [vmem:[#allocation3 + $0x78] sm:$0xff]  }
 0x1e4   : > { %v3838_v26 = vrot.slane %v3836_v33, 4  ;;  %4009 = vst [vmem:[#allocation3 + $0x6c] sm:$0xf] %v3973_v43  ;;  %v3829_v59 = vor.u32 %v3828_v25, %v3824_v12  ;;  %v3844_v41 = vrot.slane %v3842_v21, 5  ;;  %v3852_v37 = vshll.u32 %v8824_v58, 16  ;;  %v8860_v17 = vld [vmem:[#allocation3 + $0x78] sm:$0xff]  }
 0x1e5   : > { %v3848_v45 = vrot.slane %v3846_v57, 4  ;;  %v3825_v15 = vsel %vm8118_vm9, %v3820_v7, %v3824_v12  ;;  %v2297_v32 = vsel %vm8099_vm4, %v2203_v2, 0  ;;  %v2298_v38 = vsel %vm8105_vm6, %v2212_v9, 0  ;;  %7201 = vmatpush3.bf16.msra.mxu0 %v8803_v35 }
 0x1e6   : > { %v3839_v18 = vor.u32 %v3838_v26, %v3834_v27  ;;  %v3830_v36 = vrot.slane %v3829_v59, 4  ;;  %v3974_v11 = vsel %vm8105_vm6, %v3825_v15, 0  ;;  %v8852_v55 = vrot.slane %v3852_v37, 5  ;;  %2333 = vst [vmem:[#allocation3 + $0x88] sm:$0xf] %v2297_v32  ;;  %7202 = vmatprep.subr.bf16.mxu0 %v7592_v49 }
 0x1e7   : > { %7071 = vmatmul.mubr.bf16.vlgmr.msra.gmra.mxu1 %v8607_v29  ;;  %v3849_v4 = vor.u32 %v3848_v45, %v3844_v41  ;;  %2334 = vst [vmem:[#allocation3 + $0x8c] sm:$0xf] %v2298_v38  ;;  %4010 = vst [vmem:[#allocation3 + $0x70] sm:$0xf] %v3974_v11  ;;  %v3872_v2 = vshll.u32 %v3526_v42, 16  ;;  %v3876_v29 = vshrl.u32 %v3526_v42, 16 }
 0x1e8   : > { %7151 = vmatpush3.bf16.msra.mxu1 %v8677_v10  ;;  %7074 = vmatprep.mubr.bf16.mxu1 %v8627_v0  ;;  %v3840_v62 = vrot.slane %v3839_v18, 4  ;;  %v3882_v9 = vshll.u32 %v3527_v48, 16  ;;  %v3835_v53 = vsel %vm8118_vm9, %v3830_v36, %v3834_v27  ;;  %v3886_v44 = vshrl.u32 %v3527_v48, 16  ;;  %v3525_v10 = vld [vmem:[#allocation2 + $0x88] sm:$0xf] }
 0x1e9   : > { %7152 = vmatprep.subr.bf16.mxu1 %v8827_v24  ;;  %v3850_v12 = vrot.slane %v3849_v4, 4  ;;  %v3892_v33 = vshll.u32 %v3528_v52, 16  ;;  %v7596_v0 = vld [vmem:[#allocation9 + $0x160] sm:$0xff]   ;;  %v3975_v5 = vsel %vm8247_vm11, %v3835_v53, 0  ;;  %v3874_v21 = vrot.slane %v3872_v2, 5  ;;  %7123 = vmatmul.mubr.bf16.gmra.mxu0 %v8670_v40  ;;  %v7599_v52 = vld [vmem:[#allocation9 + $0x158] sm:$0xff]  }
 0x1ea   : > { %v3845_v25 = vsel %vm8118_vm9, %v3840_v62, %v3844_v41  ;;  %v3878_v57 = vrot.slane %v3876_v29, 4  ;;  %4011 = vst [vmem:[#allocation3 + $0x74] sm:$0xf] %v3975_v5  ;;  %v3884_v43 = vrot.slane %v3882_v9, 5  ;;  %v3888_v7 = vrot.slane %v3886_v44, 4  ;;  %7126 = vmatprep.mubr.bf16.mxu0 %v8690_v51  ;;  %v7581_v27 = vld [vmem:[#allocation9 + $0xa0] sm:$0xff]   ;;  %7203 = vmatpush3.bf16.msra.mxu0 %v7592_v49 }
 0x1eb   : > { %v3855_v35 = vsel %vm8118_vm9, %v3850_v12, %v8852_v55  ;;  %v3976_v42 = vsel %vm8105_vm6, %v3845_v25, 0  ;;  %v3894_v48 = vrot.slane %v3892_v33, 5  ;;  %v3856_v59 = vshrl.u32 %v8824_v58, 16  ;;  %7204 = vmatprep.subr.bf16.mxu0 %v7596_v0  ;;  %v7600_v62 = vld [vmem:[#allocation3 + $0x80] sm:$0xff]   ;;  %v7606_v44 = vld [vmem:[#allocation9 + $0x148] sm:$0xff]  }
 0x1ec   : > { %7153 = vmatpush3.bf16.msra.mxu1 %v8827_v24  ;;  %v3977_v26 = vsel %vm8247_vm11, %v3855_v35, 0  ;;  %4012 = vst [vmem:[#allocation3 + $0x78] sm:$0xf] %v3976_v42  ;;  %v3879_v40 = vor.u32 %v3878_v57, %v3874_v21  ;;  %v3889_v41 = vor.u32 %v3888_v7, %v3884_v43  ;;  %v3862_v45 = vshll.u32 %v3525_v10, 16  ;;  %v7587_v24 = vld [vmem:[#allocation9 + $0x98] sm:$0xff]   ;;  %v7609_v9 = vld [vmem:[#allocation3 + $0x80] sm:$0xff]  }
 0x1ed   : > { %7154 = vmatprep.subr.bf16.mxu1 %v7576_v22  ;;  %4013 = vst [vmem:[#allocation3 + $0x7c] sm:$0xf] %v3977_v26  ;;  %v3866_v37 = vshrl.u32 %v3525_v10, 16  ;;  %v3858_v18 = vrot.slane %v3856_v59, 4  ;;  %v7594_v53 = vld [vmem:[#allocation9 + $0x90] sm:$0xff]   ;;  %v7618_v10 = vld [vmem:[#allocation3 + $0x28] sm:$0xff]  }
 0x1ee   : > { %v3880_v51 = vrot.slane %v3879_v40, 4  ;;  %v3890_v15 = vrot.slane %v3889_v41, 4  ;;  %v3864_v32 = vrot.slane %v3862_v45, 5  ;;  %7205 = vmatpush3.bf16.msra.mxu0 %v7596_v0  ;;  %v8881_v49 = vld [vmem:[#allocation3 + $0x88] sm:$0xff]   ;;  %v7620_v35 = vld [vmem:[#allocation3 + $0x18] sm:$0xff]   ;;  %v7629_v42 = vld [vmem:[#allocation9 + $0x220] sm:$0xff]  }
 0x1ef   : > { %7075 = vmatmul.mubr.bf16.gmra.mxu1 %v8655_v28  ;;  %v3868_v38 = vrot.slane %v3866_v37, 4  ;;  %v3859_v11 = vor.u32 %v3858_v18, %v8852_v55  ;;  %7206 = vmatprep.subr.bf16.mxu0 %v7599_v52  ;;  %v7621_v7 = vld [vmem:[#allocation3 + $0x20] sm:$0xff]   ;;  %v7622_v41 = vld [vmem:[#allocation3 + $0x30] sm:$0xff]   ;;  %v7634_v45 = vld [vmem:[#allocation9 + $0x218] sm:$0xff]  }
 0x1f0   : > { %7078 = vmatprep.mubr.bf16.mxu1 %v8672_v19  ;;  %7155 = vmatpush3.bf16.msra.mxu1 %v7576_v22  ;;  %v3885_v58 = vsel %vm8118_vm9, %v3880_v51, %v3884_v43  ;;  %v3895_v36 = vsel %vm8118_vm9, %v3890_v15, %v3894_v48  ;;  %v7603_v19 = vld [vmem:[#allocation9 + $0x150] sm:$0xff]  }
 0x1f1   : > { %7156 = vmatprep.subr.bf16.mxu1 %v7581_v27  ;;  %v3980_v28 = vsel %vm8105_vm6, %v3885_v58, 0  ;;  %v3869_v4 = vor.u32 %v3868_v38, %v3864_v32  ;;  %v3981_v22 = vsel %vm8247_vm11, %v3895_v36, 0  ;;  %7127 = vmatmul.mubr.bf16.gmra.mxu0 %v8704_v46  ;;  %v3860_v2 = vrot.slane %v3859_v11, 4  ;;  %v7625_v38 = vld [vmem:[#allocation3 + $0x28] sm:$0xff]   ;;  %v7639_v58 = vld [vmem:[#allocation9 + $0x210] sm:$0xff]   ;;  %v7626_v36 = vld [vmem:[#allocation3 + $0x30] sm:$0xff]  }
 0x1f2   : > { %4016 = vst [vmem:[#allocation3 + $0x88] sm:$0xf] %v3980_v28  ;;  %4017 = vst [vmem:[#allocation3 + $0x8c] sm:$0xf] %v3981_v22  ;;  %7130 = vmatprep.mubr.bf16.mxu0 %v8724_v14  ;;  %7207 = vmatpush3.bf16.msra.mxu0 %v7599_v52  ;;  %v7601_v14 = vld [vmem:[#allocation9 + $0x88] sm:$0xff]   ;;  %v7627_v22 = vld [vmem:[#allocation3 + $0x40] sm:$0xff]  }
 0x1f3   : > { %v3870_v29 = vrot.slane %v3869_v4, 4  ;;  %v3865_v55 = vsel %vm8118_vm9, %v3860_v2, %v3864_v32  ;;  %7208 = vmatprep.subr.bf16.mxu0 %v7603_v19  ;;  %v7623_v52 = vld [vmem:[#allocation3 + $0x38] sm:$0xff]  }
 0x1f4   : > { %7157 = vmatpush3.bf16.msra.mxu1 %v7581_v27  ;;  %v3978_v46 = vsel %vm8105_vm6, %v3865_v55, 0  ;;  %v7644_v2 = vld [vmem:[#allocation9 + $0x208] sm:$0xff]  }
 0x1f5   : > { %7158 = vmatprep.subr.bf16.mxu1 %v7587_v24  ;;  %v3875_v12 = vsel %vm8118_vm9, %v3870_v29, %v3874_v21  ;;  %4014 = vst [vmem:[#allocation3 + $0x80] sm:$0xf] %v3978_v46 }
 0x1f6   : > { %v3979_v33 = vsel %vm8247_vm11, %v3875_v12, 0  ;;  %7209 = vmatpush3.bf16.msra.mxu0 %v7603_v19 }
 0x1f7   : > { %7079 = vmatmul.mubr.bf16.gmra.mxu1 %v8694_v30  ;;  %4015 = vst [vmem:[#allocation3 + $0x84] sm:$0xf] %v3979_v33  ;;  %7210 = vmatprep.subr.bf16.mxu0 %v7606_v44  ;;  %v7607_v30 = vld [vmem:[#allocation3 + $0x8] sm:$0xff]   ;;  %v7630_v33 = vld [vmem:[#allocation3 + $0x38] sm:$0xff]  }
 0x1f8   : > { %7082 = vmatprep.mubr.bf16.mxu1 %v8715_v6  ;;  %7159 = vmatpush3.bf16.msra.mxu1 %v7587_v24  ;;  %v7611_v6 = vld [vmem:[#allocation3] sm:$0xff]  }
 0x1f9   : > { %7160 = vmatprep.subr.bf16.mxu1 %v7594_v53  ;;  %7131 = vmatmul.mubr.bf16.gmra.mxu0 %v8732_v20  ;;  %v7613_v20 = vld [vmem:[#allocation3 + $0x18] sm:$0xff]  }
 0x1fa   : > { %7134 = vmatprep.mubr.bf16.mxu0 %v8754_v34  ;;  %7211 = vmatpush3.bf16.msra.mxu0 %v7606_v44 }
 0x1fb   : > { %7212 = vmatprep.subr.bf16.mxu0 %v7610_v16 }
 0x1fc   : > { %7161 = vmatpush3.bf16.msra.mxu1 %v7594_v53 }
 0x1fd   : > { %7162 = vmatprep.subr.bf16.mxu1 %v7601_v14 }
 0x1fe   : > { %7213 = vmatpush3.bf16.msra.mxu0 %v7610_v16 }
 0x1ff   : > { %7083 = vmatmul.mubr.bf16.gmra.mxu1 %v8728_v54  ;;  %v7612_v54 = vld [vmem:[#allocation3 + $0x10] sm:$0xff]  }
 0x200   : > { %7086 = vmatprep.mubr.bf16.mxu1 %v8741_v1  ;;  %7163 = vmatpush3.bf16.msra.mxu1 %v7601_v14  ;;  %v7648_v14 = vld [vmem:[#allocation9 + $0x200] sm:$0xff]  }
 0x201   : > { %7164 = vmatprep.subr.bf16.mxu1 %v7608_v3  ;;  %7135 = vmatmul.mubr.bf16.gmra.mxu0 %v8766_v8  ;;  %v7619_v8 = vld [vmem:[#allocation9 + $0x230] sm:$0xff]  }
 0x202   : > { %7138 = vmatprep.mubr.bf16.mxu0 %v8783_v13 }
 0x204   : > { %7165 = vmatpush3.bf16.msra.mxu1 %v7608_v3  ;;  %v7631_v3 = vld [vmem:[#allocation3 + $0x40] sm:$0xff]  }
 0x205   : > { %7246 = vmatprep.subr.bf16.mxu1 %v7614_v39 }
 0x207   : > { %7087 = vmatmul.mubr.bf16.gmra.mxu1 %v8758_v47  ;;  %v7615_v47 = vld [vmem:[#allocation3 + $0x8] sm:$0xff]  }
 0x208   : > { %7090 = vmatprep.mubr.bf16.mxu1 %v8773_v56  ;;  %v7616_v56 = vld [vmem:[#allocation3 + $0x10] sm:$0xff]  }
 0x209   : > { %7139 = vmatmul.mubr.bf16.gmra.mxu0 %v8792_v23 }
 0x20a   : > { %7142 = vmatprep.mubr.bf16.mxu0 %v8829_v50 }
 0x20f   : > { %7091 = vmatmul.mubr.bf16.gmra.mxu1 %v8787_v31 }
 0x210   : > { %7094 = vmatprep.mubr.bf16.mxu1 %v8796_v63 }
 0x211   : > { %7143 = vmatmul.mubr.bf16.gmra.mxu0 %v8848_v61  ;;  %v7624_v61 = vld [vmem:[#allocation9 + $0x228] sm:$0xff]  }
 0x212   : > { %7146 = vmatprep.mubr.bf16.mxu0 %v7600_v62 }
 0x217   : > { %7095 = vmatmul.mubr.bf16.gmra.mxu1 %v8838_v60  ;;  %v7617_v60 = vld [vmem:[#allocation3 + $0x20] sm:$0xff]  }
 0x218   : > { %7098 = vmatprep.mubr.bf16.mxu1 %v8860_v17 }
 0x219   : > { %7147 = vmatmul.mubr.bf16.gmra.mxu0 %v8881_v49 }
 0x21a   : > { %7214 = vmatprep.mubr.bf16.mxu0 %v7607_v30 }
 0x21f   : > { %7099 = vmatmul.mubr.bf16.gmra.mxu1 %v7609_v9  ;;  %v6928_v1 = vpop.f32.mrf.mxu0  ;;  %v7628_v9 = vld [vmem:[#allocation3 + $0x48] sm:$0xff]  }
 0x220   : > { %7166 = vmatprep.mubr.bf16.mxu1 %v7611_v6 }
 0x221   : > { %7215 = vmatmul.mubr.bf16.vlgmr.msra.gmra.mxu0 %v7612_v54  ;;  %v1361_v34 = vpop.f32.mrf.mxu0 }
 0x222   : > { %7218 = vmatprep.mubr.bf16.mxu0 %v7613_v20 }
 0x223   : > { %v6880_v13 = vpop.f32.mrf.mxu1  ;;  %v6929_v31 = vpop.f32.mrf.mxu0 }
 0x224   : > { %v8918_v23 = vadd.f32 %v6928_v1, %v6880_v13  ;;  %v7632_v1 = vld [vmem:[#allocation3 + $0x50] sm:$0xff]  }
 0x225   : > { %v1146_v63 = vpop.f32.mrf.mxu1  ;;  %v1364_v50 = vpop.f32.mrf.mxu0 }
 0x226   : > { %v8920_v17 = vadd.f32 %v1361_v34, %v1146_v63 }
 0x227   : > { %7167 = vmatmul.mubr.bf16.vlgmr.msra.gmra.mxu1 %v7615_v47  ;;  %v6881_v0 = vpop.f32.mrf.mxu1  ;;  %v6932_v5 = vpop.f32.mrf.mxu0  ;;  %v7633_v47 = vld [vmem:[#allocation3 + $0x58] sm:$0xff]  }
 0x228   : > { %7247 = vmatpush3.bf16.msra.mxu1 %v7614_v39  ;;  %7170 = vmatprep.mubr.bf16.mxu1 %v7616_v56  ;;  %v8922_v25 = vadd.f32 %v6929_v31, %v6881_v0 }
 0x229   : > { %7248 = vmatprep.subr.bf16.mxu1 %v7619_v8  ;;  %7219 = vmatmul.mubr.bf16.gmra.mxu0 %v7617_v60  ;;  %v1149_v21 = vpop.f32.mrf.mxu1  ;;  %v1377_v57 = vpop.f32.mrf.mxu0 }
 0x22a   : > { %7222 = vmatprep.mubr.bf16.mxu0 %v7618_v10  ;;  %v8924_v43 = vadd.f32 %v1364_v50, %v1149_v21  ;;  %v7635_v50 = vld [vmem:[#allocation3 + $0x48] sm:$0xff]  }
 0x22b   : > { %v6884_v27 = vpop.f32.mrf.mxu1  ;;  %v6933_v26 = vpop.f32.mrf.mxu0 }
 0x22c   : > { %7249 = vmatpush3.bf16.msra.mxu1 %v7619_v8  ;;  %v8926_v40 = vadd.f32 %v6932_v5, %v6884_v27 }
 0x22d   : > { %7250 = vmatprep.subr.bf16.mxu1 %v7624_v61  ;;  %v1162_v48 = vpop.f32.mrf.mxu1  ;;  %v1380_v59 = vpop.f32.mrf.mxu0 }
 0x22e   : > { %v8928_v37 = vadd.f32 %v1377_v57, %v1162_v48 }
 0x22f   : > { %7171 = vmatmul.mubr.bf16.gmra.mxu1 %v7620_v35  ;;  %v6885_v51 = vpop.f32.mrf.mxu1  ;;  %v6936_v24 = vpop.f32.mrf.mxu0  ;;  %v7637_v35 = vld [vmem:[#allocation3 + $0x60] sm:$0xff]  }
 0x230   : > { %7174 = vmatprep.mubr.bf16.mxu1 %v7621_v7  ;;  %7251 = vmatpush3.bf16.msra.mxu1 %v7624_v61  ;;  %v8930_v15 = vadd.f32 %v6933_v26, %v6885_v51  ;;  %v7636_v61 = vld [vmem:[#allocation3 + $0x50] sm:$0xff]   ;;  %v7638_v7 = vld [vmem:[#allocation3 + $0x68] sm:$0xff]  }
 0x231   : > { %7252 = vmatprep.subr.bf16.mxu1 %v7629_v42  ;;  %7223 = vmatmul.mubr.bf16.gmra.mxu0 %v7622_v41  ;;  %v1165_v18 = vpop.f32.mrf.mxu1  ;;  %v1393_v32 = vpop.f32.mrf.mxu0 }
 0x232   : > { %7226 = vmatprep.mubr.bf16.mxu0 %v7623_v52  ;;  %v8932_v49 = vadd.f32 %v1380_v59, %v1165_v18  ;;  %v7641_v52 = vld [vmem:[#allocation3 + $0x60] sm:$0xff]  }
 0x233   : > { %v6888_v28 = vpop.f32.mrf.mxu1  ;;  %v6937_v11 = vpop.f32.mrf.mxu0 }
 0x234   : > { %7253 = vmatpush3.bf16.msra.mxu1 %v7629_v42  ;;  %v8934_v4 = vadd.f32 %v6936_v24, %v6888_v28  ;;  %v7643_v28 = vld [vmem:[#allocation3 + $0x78] sm:$0xff]  }
 0x235   : > { %7254 = vmatprep.subr.bf16.mxu1 %v7634_v45  ;;  %v1178_v62 = vpop.f32.mrf.mxu1  ;;  %v1396_v19 = vpop.f32.mrf.mxu0 }
 0x236   : > { %v8936_v29 = vadd.f32 %v1393_v32, %v1178_v62 }
 0x237   : > { %7175 = vmatmul.mubr.bf16.gmra.mxu1 %v7625_v38  ;;  %v6889_v53 = vpop.f32.mrf.mxu1  ;;  %v6940_v55 = vpop.f32.mrf.mxu0 }
 0x238   : > { %7178 = vmatprep.mubr.bf16.mxu1 %v7626_v36  ;;  %7255 = vmatpush3.bf16.msra.mxu1 %v7634_v45  ;;  %v8938_v12 = vadd.f32 %v6937_v11, %v6889_v53  ;;  %v7640_v45 = vld [vmem:[#allocation3 + $0x58] sm:$0xff]   ;;  %v7646_v53 = vld [vmem:[#allocation3 + $0x70] sm:$0xff]  }
 0x239   : > { %7256 = vmatprep.subr.bf16.mxu1 %v7639_v58  ;;  %7227 = vmatmul.mubr.bf16.gmra.mxu0 %v7627_v22  ;;  %v1181_v44 = vpop.f32.mrf.mxu1  ;;  %v1409_v46 = vpop.f32.mrf.mxu0 }
 0x23a   : > { %7230 = vmatprep.mubr.bf16.mxu0 %v7628_v9  ;;  %v8940_v16 = vadd.f32 %v1396_v19, %v1181_v44  ;;  %v7645_v9 = vld [vmem:[#allocation3 + $0x68] sm:$0xff]  }
 0x23b   : > { %v6892_v39 = vpop.f32.mrf.mxu1  ;;  %v6941_v30 = vpop.f32.mrf.mxu0 }
 0x23c   : > { %7257 = vmatpush3.bf16.msra.mxu1 %v7639_v58  ;;  %v8942_v6 = vadd.f32 %v6940_v55, %v6892_v39  ;;  %v7642_v58 = vld [vmem:[#allocation3 + $0x70] sm:$0xff]  }
 0x23d   : > { %7258 = vmatprep.subr.bf16.mxu1 %v7644_v2  ;;  %v1194_v54 = vpop.f32.mrf.mxu1  ;;  %v1412_v20 = vpop.f32.mrf.mxu0 }
 0x23e   : > { %v8944_v34 = vadd.f32 %v1409_v46, %v1194_v54 }
 0x23f   : > { %7179 = vmatmul.mubr.bf16.gmra.mxu1 %v7630_v33  ;;  %v6893_v8 = vpop.f32.mrf.mxu1  ;;  %v6944_v56 = vpop.f32.mrf.mxu0 }
 0x240   : > { %7182 = vmatprep.mubr.bf16.mxu1 %v7631_v3  ;;  %7259 = vmatpush3.bf16.msra.mxu1 %v7644_v2  ;;  %v8946_v13 = vadd.f32 %v6941_v30, %v6893_v8  ;;  %v7647_v3 = vld [vmem:[#allocation3 + $0x80] sm:$0xff]   ;;  %v7649_v8 = vld [vmem:[#allocation3 + $0x78] sm:$0xff]  }
 0x241   : > { %7260 = vmatprep.subr.bf16.mxu1 %v7648_v14  ;;  %7231 = vmatmul.mubr.bf16.gmra.mxu0 %v7632_v1  ;;  %v1197_v31 = vpop.f32.mrf.mxu1  ;;  %v1425_v63 = vpop.f32.mrf.mxu0 }
 0x242   : > { %7234 = vmatprep.mubr.bf16.mxu0 %v7633_v47  ;;  %v8948_v60 = vadd.f32 %v1412_v20, %v1197_v31 }
 0x243   : > { %v6896_v10 = vpop.f32.mrf.mxu1  ;;  %v6945_v0 = vpop.f32.mrf.mxu0 }
 0x244   : > { %7261 = vmatpush3.bf16.msra.mxu1 %v7648_v14  ;;  %v8950_v5 = vadd.f32 %v6944_v56, %v6896_v10  ;;  %v7650_v56 = vld [vmem:[#allocation3 + $0x10] sm:$0xff]  }
 0x245   : > { %v1210_v21 = vpop.f32.mrf.mxu1  ;;  %v8952_v57 = vpop.f32.mrf.mxu0 }
 0x246   : > { %v8954_v42 = vadd.f32 %v1425_v63, %v1210_v21 }
 0x247   : > { %7183 = vmatmul.mubr.bf16.gmra.mxu1 %v7635_v50  ;;  %v6897_v27 = vpop.f32.mrf.mxu1  ;;  %v6948_v26 = vpop.f32.mrf.mxu0 }
 0x248   : > { %7186 = vmatprep.mubr.bf16.mxu1 %v7636_v61  ;;  %v8956_v48 = vadd.f32 %v6945_v0, %v6897_v27 }
 0x249   : > { %7235 = vmatmul.mubr.bf16.gmra.mxu0 %v7637_v35  ;;  %v8958_v59 = vpop.f32.mrf.mxu1  ;;  %v1441_v41 = vpop.f32.mrf.mxu0 }
 0x24a   : > { %7238 = vmatprep.mubr.bf16.mxu0 %v7638_v7 }
 0x24b   : > { %v6900_v51 = vpop.f32.mrf.mxu1  ;;  %v6949_v24 = vpop.f32.mrf.mxu0 }
 0x24c   : > { %v8960_v18 = vadd.f32 %v6948_v26, %v6900_v51 }
 0x24d   : > { %v1226_v32 = vpop.f32.mrf.mxu1  ;;  %v8962_v38 = vpop.f32.mrf.mxu0 }
 0x24e   : > { %v8964_v36 = vadd.f32 %v1441_v41, %v1226_v32  ;;  %v7651_v41 = vld [vmem:[#allocation3 + $0x18] sm:$0xff]  }
 0x24f   : > { %7187 = vmatmul.mubr.bf16.gmra.mxu1 %v7640_v45  ;;  %v6901_v11 = vpop.f32.mrf.mxu1  ;;  %v6952_v62 = vpop.f32.mrf.mxu0  ;;  %v7652_v45 = vld [vmem:[#allocation3 + $0x20] sm:$0xff]  }
 0x250   : > { %7190 = vmatprep.mubr.bf16.mxu1 %v7641_v52  ;;  %v8966_v19 = vadd.f32 %v6949_v24, %v6901_v11 }
 0x251   : > { %7239 = vmatmul.mubr.bf16.gmra.mxu0 %v7642_v58  ;;  %v8968_v22 = vpop.f32.mrf.mxu1  ;;  %v1457_v2 = vpop.f32.mrf.mxu0 }
 0x252   : > { %7242 = vmatprep.mubr.bf16.mxu0 %v7643_v28 }
 0x253   : > { %v6904_v55 = vpop.f32.mrf.mxu1  ;;  %v6953_v44 = vpop.f32.mrf.mxu0 }
 0x254   : > { %v8970_v46 = vadd.f32 %v6952_v62, %v6904_v55 }
 0x255   : > { %v1242_v33 = vpop.f32.mrf.mxu1  ;;  %v8972_v14 = vpop.f32.mrf.mxu0 }
 0x256   : > { %v8974_v39 = vadd.f32 %v1457_v2, %v1242_v33  ;;  %v7653_v33 = vld [vmem:[#allocation3 + $0x28] sm:$0xff]  }
 0x257   : > { %7191 = vmatmul.mubr.bf16.gmra.mxu1 %v7645_v9  ;;  %v6905_v30 = vpop.f32.mrf.mxu1  ;;  %v6956_v54 = vpop.f32.mrf.mxu0 }
 0x258   : > { %7194 = vmatprep.mubr.bf16.mxu1 %v7646_v53  ;;  %v8976_v20 = vadd.f32 %v6953_v44, %v6905_v30 }
 0x259   : > { %7243 = vmatmul.mubr.bf16.gmra.mxu0 %v7647_v3  ;;  %v8978_v1 = vpop.f32.mrf.mxu1  ;;  %v1473_v47 = vpop.f32.mrf.mxu0 }
 0x25b   : > { %v6908_v31 = vpop.f32.mrf.mxu1  ;;  %v6957_v63 = vpop.f32.mrf.mxu0 }
 0x25c   : > { %v8980_v50 = vadd.f32 %v6956_v54, %v6908_v31 }
 0x25d   : > { %v1258_v61 = vpop.f32.mrf.mxu1  ;;  %v8982_v10 = vpop.f32.mrf.mxu0 }
 0x25e   : > { %v8984_v0 = vadd.f32 %v1473_v47, %v1258_v61 }
 0x25f   : > { %7195 = vmatmul.mubr.bf16.gmra.mxu1 %v7649_v8  ;;  %v6909_v21 = vpop.f32.mrf.mxu1  ;;  %v7024_v35 = vpop.f32.mrf.mxu0 }
 0x260   : > { %7262 = vmatprep.mubr.bf16.mxu1 %v7650_v56  ;;  %v8986_v7 = vadd.f32 %v6957_v63, %v6909_v21 }
 0x261   : > { %v8988_v27 = vpop.f32.mrf.mxu1  ;;  %v2561_v26 = vpop.f32.mrf.mxu0 }
 0x263   : > { %v6976_v52 = vpop.f32.mrf.mxu1  ;;  %v7025_v51 = vpop.f32.mrf.mxu0 }
 0x264   : > { %v1844_v24 = vadd.f32 %v6976_v52, %v8918_v23  ;;  %v7654_v23 = vld [vmem:[#allocation3 + $0x30] sm:$0xff]  }
 0x265   : > { %v1715_v32 = vpop.f32.mrf.mxu1  ;;  %v8991_v58 = vpop.f32.mrf.mxu0 }
 0x266   : > { %v1842_v28 = vadd.f32 %v1715_v32, %v8920_v17  ;;  %v8994_v11 = vadd.f32 %v7024_v35, %v1844_v24 }
 0x267   : > { %7263 = vmatmul.mubr.bf16.vlgmr.msra.gmra.mxu1 %v7651_v41  ;;  %v6977_v62 = vpop.f32.mrf.mxu1  ;;  %v7028_v2 = vpop.f32.mrf.mxu0  ;;  %v7655_v41 = vld [vmem:[#allocation3 + $0x38] sm:$0xff]  }
 0x268   : > { %7266 = vmatprep.mubr.bf16.mxu1 %v7652_v45  ;;  %v1845_v9 = vadd.f32 %v6977_v62, %v8922_v25  ;;  %v8997_v53 = vadd.f32 %v2561_v26, %v1842_v28 }
 0x269   : > { %v1718_v55 = vpop.f32.mrf.mxu1  ;;  %v2577_v44 = vpop.f32.mrf.mxu0 }
 0x26a   : > { %v9000_v3 = vadd.f32 %v1718_v55, %v8924_v43  ;;  %v9002_v30 = vadd.f32 %v7025_v51, %v1845_v9  ;;  %v7666_v51 = vld [vmem:[#allocation10 + $0x38] sm:$0xff]  }
 0x26b   : > { %v6980_v54 = vpop.f32.mrf.mxu1  ;;  %v7029_v47 = vpop.f32.mrf.mxu0  ;;  %7294 = vmatprep.subr.bf16.mxu0 %v7666_v51 }
 0x26c   : > { %v1848_v17 = vadd.f32 %v6980_v54, %v8926_v40  ;;  %v7656_v40 = vld [vmem:[#allocation3 + $0x40] sm:$0xff]   ;;  %7295 = vmatpush3.bf16.msra.mxu0 %v7666_v51  ;;  %v7657_v54 = vld [vmem:[#allocation3 + $0x48] sm:$0xff]  }
 0x26d   : > { %v1731_v8 = vpop.f32.mrf.mxu1  ;;  %v9005_v56 = vpop.f32.mrf.mxu0 }
 0x26e   : > { %v1846_v25 = vadd.f32 %v1731_v8, %v8928_v37  ;;  %v9008_v31 = vadd.f32 %v7028_v2, %v1848_v17  ;;  %v7667_v8 = vld [vmem:[#allocation10 + $0x30] sm:$0xff]  }
 0x26f   : > { %7267 = vmatmul.mubr.bf16.gmra.mxu1 %v7653_v33  ;;  %v6981_v63 = vpop.f32.mrf.mxu1  ;;  %v7032_v61 = vpop.f32.mrf.mxu0  ;;  %7296 = vmatprep.subr.bf16.mxu0 %v7667_v8 }
 0x270   : > { %7270 = vmatprep.mubr.bf16.mxu1 %v7654_v23  ;;  %v1849_v43 = vadd.f32 %v6981_v63, %v8930_v15  ;;  %v9011_v21 = vadd.f32 %v2577_v44, %v1846_v25  ;;  %7297 = vmatpush3.bf16.msra.mxu0 %v7667_v8 }
 0x271   : > { %v1734_v35 = vpop.f32.mrf.mxu1  ;;  %v2593_v26 = vpop.f32.mrf.mxu0 }
 0x272   : > { %v9014_v45 = vadd.f32 %v1734_v35, %v8932_v49  ;;  %v9016_v52 = vadd.f32 %v7029_v47, %v1849_v43  ;;  %v7658_v47 = vld [vmem:[#allocation3 + $0x50] sm:$0xff]  }
 0x273   : > { %v7033_v37 = vpop.f32.mrf.mxu0 }
 0x274   : > { %v6984_v24 = vpop.f32.mrf.mxu1 }
 0x275   : > { %v1852_v32 = vadd.f32 %v6984_v24, %v8934_v4  ;;  %v9019_v28 = vpop.f32.mrf.mxu0 }
 0x276   : > { %v1747_v15 = vpop.f32.mrf.mxu1 }
 0x277   : > { %7271 = vmatmul.mubr.bf16.gmra.mxu1 %v7655_v41  ;;  %v1850_v62 = vadd.f32 %v1747_v15, %v8936_v29  ;;  %v9022_v2 = vadd.f32 %v7032_v61, %v1852_v32  ;;  %v7036_v9 = vpop.f32.mrf.mxu0  ;;  %v7660_v32 = vld [vmem:[#allocation3 + $0x60] sm:$0xff]  }
 0x278   : > { %7274 = vmatprep.mubr.bf16.mxu1 %v7656_v40  ;;  %v6985_v49 = vpop.f32.mrf.mxu1 }
 0x279   : > { %v1853_v55 = vadd.f32 %v6985_v49, %v8938_v12  ;;  %v9025_v44 = vadd.f32 %v2593_v26, %v1850_v62  ;;  %v2609_v23 = vpop.f32.mrf.mxu0  ;;  %v7668_v62 = vld [vmem:[#allocation10 + $0x28] sm:$0xff]  }
 0x27a   : > { %v1750_v33 = vpop.f32.mrf.mxu1  ;;  %7298 = vmatprep.subr.bf16.mxu0 %v7668_v62 }
 0x27b   : > { %v9028_v4 = vadd.f32 %v1750_v33, %v8940_v16  ;;  %v9030_v17 = vadd.f32 %v7033_v37, %v1853_v55  ;;  %v7037_v29 = vpop.f32.mrf.mxu0  ;;  %v7659_v37 = vld [vmem:[#allocation3 + $0x58] sm:$0xff]   ;;  %7299 = vmatpush3.bf16.msra.mxu0 %v7668_v62 }
 0x27d   : > { %v6988_v25 = vpop.f32.mrf.mxu1  ;;  %v9033_v61 = vpop.f32.mrf.mxu0 }
 0x27e   : > { %v1856_v63 = vadd.f32 %v6988_v25, %v8942_v6 }
 0x27f   : > { %7275 = vmatmul.mubr.bf16.gmra.mxu1 %v7657_v54  ;;  %v1763_v12 = vpop.f32.mrf.mxu1 }
 0x280   : > { %7278 = vmatprep.mubr.bf16.mxu1 %v7658_v47  ;;  %v1854_v43 = vadd.f32 %v1763_v12, %v8944_v34  ;;  %v9036_v35 = vadd.f32 %v7036_v9, %v1856_v63  ;;  %v7040_v26 = vpop.f32.mrf.mxu0  ;;  %v1429_v47 = vadd.f32 %v8952_v57, %v8958_v59  ;;  %v7661_v63 = vld [vmem:[#allocation3 + $0x68] sm:$0xff]  }
 0x281   : > { %v6989_v16 = vpop.f32.mrf.mxu1 }
 0x282   : > { %v1857_v41 = vadd.f32 %v6989_v16, %v8946_v13  ;;  %v9039_v40 = vadd.f32 %v2609_v23, %v1854_v43  ;;  %v2625_v24 = vpop.f32.mrf.mxu0  ;;  %v7662_v43 = vld [vmem:[#allocation3 + $0x70] sm:$0xff]  }
 0x283   : > { %v1766_v51 = vpop.f32.mrf.mxu1 }
 0x284   : > { %v9042_v6 = vadd.f32 %v1766_v51, %v8948_v60  ;;  %v9044_v15 = vadd.f32 %v7037_v29, %v1857_v41  ;;  %v7041_v34 = vpop.f32.mrf.mxu0  ;;  %v7669_v41 = vld [vmem:[#allocation10 + $0x20] sm:$0xff]  }
 0x285   : > { %7300 = vmatprep.subr.bf16.mxu0 %v7669_v41 }
 0x286   : > { %v6992_v49 = vpop.f32.mrf.mxu1  ;;  %v2628_v55 = vpop.f32.mrf.mxu0  ;;  %7301 = vmatpush3.bf16.msra.mxu0 %v7669_v41  ;;  %v7665_v41 = vld [vmem:[#allocation3 + $0x88] sm:$0xff]  }
 0x287   : > { %7279 = vmatmul.mubr.bf16.gmra.mxu1 %v7659_v37  ;;  %v1860_v9 = vadd.f32 %v6992_v49, %v8950_v5  ;;  %v1445_v49 = vadd.f32 %v8962_v38, %v8968_v22 }
 0x288   : > { %7282 = vmatprep.mubr.bf16.mxu1 %v7660_v32  ;;  %v1779_v13 = vpop.f32.mrf.mxu1  ;;  %v7044_v54 = vpop.f32.mrf.mxu0 }
 0x289   : > { %v1858_v33 = vadd.f32 %v1779_v13, %v8954_v42  ;;  %v9048_v23 = vadd.f32 %v7040_v26, %v1860_v9 }
 0x28a   : > { %v6993_v60 = vpop.f32.mrf.mxu1  ;;  %v2641_v5 = vpop.f32.mrf.mxu0 }
 0x28b   : > { %v1861_v8 = vadd.f32 %v6993_v60, %v8956_v48  ;;  %v9053_v25 = vadd.f32 %v2625_v24, %v1858_v33  ;;  %v7664_v60 = vld [vmem:[#allocation3 + $0x80] sm:$0xff]  }
 0x28c   : > { %v1782_v29 = vpop.f32.mrf.mxu1  ;;  %v7045_v26 = vpop.f32.mrf.mxu0 }
 0x28d   : > { %v1859_v12 = vadd.f32 %v1782_v29, %v1429_v47  ;;  %v9055_v16 = vadd.f32 %v7041_v34, %v1861_v8  ;;  %v7670_v8 = vld [vmem:[#allocation10 + $0x18] sm:$0xff]  }
 0x28e   : > { %v2644_v48 = vpop.f32.mrf.mxu0  ;;  %7302 = vmatprep.subr.bf16.mxu0 %v7670_v8 }
 0x28f   : > { %v6996_v42 = vpop.f32.mrf.mxu1  ;;  %7283 = vmatmul.mubr.bf16.gmra.mxu1 %v7661_v63  ;;  %v9058_v37 = vadd.f32 %v2628_v55, %v1859_v12  ;;  %v7663_v55 = vld [vmem:[#allocation3 + $0x78] sm:$0xff]   ;;  %7303 = vmatpush3.bf16.msra.mxu0 %v7670_v8 }
 0x290   : > { %v1864_v51 = vadd.f32 %v6996_v42, %v8960_v18  ;;  %7286 = vmatprep.mubr.bf16.mxu1 %v7662_v43  ;;  %v7048_v62 = vpop.f32.mrf.mxu0  ;;  %v1461_v42 = vadd.f32 %v8972_v14, %v8978_v1 }
 0x291   : > { %v1795_v57 = vpop.f32.mrf.mxu1 }
 0x292   : > { %v1862_v59 = vadd.f32 %v1795_v57, %v8964_v36  ;;  %v9061_v24 = vadd.f32 %v7044_v54, %v1864_v51  ;;  %v2657_v13 = vpop.f32.mrf.mxu0 }
 0x293   : > { %v6997_v32 = vpop.f32.mrf.mxu1 }
 0x294   : > { %v1865_v34 = vadd.f32 %v6997_v32, %v8966_v19  ;;  %v9066_v9 = vadd.f32 %v2641_v5, %v1862_v59  ;;  %v7049_v54 = vpop.f32.mrf.mxu0  ;;  %v7671_v32 = vld [vmem:[#allocation10 + $0x10] sm:$0xff]  }
 0x295   : > { %v1798_v18 = vpop.f32.mrf.mxu1  ;;  %7304 = vmatprep.subr.bf16.mxu0 %v7671_v32 }
 0x296   : > { %v1863_v33 = vadd.f32 %v1798_v18, %v1445_v49  ;;  %v9068_v47 = vadd.f32 %v7045_v26, %v1865_v34  ;;  %v2660_v19 = vpop.f32.mrf.mxu0  ;;  %7305 = vmatpush3.bf16.msra.mxu0 %v7671_v32 }
 0x297   : > { %v7000_v36 = vpop.f32.mrf.mxu1  ;;  %7287 = vmatmul.mubr.bf16.gmra.mxu1 %v7663_v55 }
 0x298   : > { %v1868_v29 = vadd.f32 %v7000_v36, %v8970_v46  ;;  %7290 = vmatprep.mubr.bf16.mxu1 %v7664_v60  ;;  %v9071_v63 = vadd.f32 %v2644_v48, %v1863_v33  ;;  %v7052_v43 = vpop.f32.mrf.mxu0  ;;  %v1477_v33 = vadd.f32 %v8982_v10, %v8988_v27 }
 0x299   : > { %v1811_v38 = vpop.f32.mrf.mxu1 }
 0x29a   : > { %v1866_v22 = vadd.f32 %v1811_v38, %v8974_v39  ;;  %v9074_v5 = vadd.f32 %v7048_v62, %v1868_v29  ;;  %v2673_v57 = vpop.f32.mrf.mxu0  ;;  %v7672_v38 = vld [vmem:[#allocation10 + $0x8] sm:$0xff]  }
 0x29b   : > { %v7001_v12 = vpop.f32.mrf.mxu1  ;;  %7306 = vmatprep.subr.bf16.mxu0 %v7672_v38 }
 0x29c   : > { %v1869_v26 = vadd.f32 %v7001_v12, %v8976_v20  ;;  %v9079_v46 = vadd.f32 %v2657_v13, %v1866_v22  ;;  %v7053_v39 = vpop.f32.mrf.mxu0  ;;  %7307 = vmatpush3.bf16.msra.mxu0 %v7672_v38 }
 0x29d   : > { %v1814_v51 = vpop.f32.mrf.mxu1 }
 0x29e   : > { %v1867_v48 = vadd.f32 %v1814_v51, %v1461_v42  ;;  %v9081_v59 = vadd.f32 %v7049_v54, %v1869_v26  ;;  %v2676_v14 = vpop.f32.mrf.mxu0  ;;  %v2689_v51 = vadd.f32 %v8991_v58, %v9000_v3 }
 0x29f   : > { %v7004_v49 = vpop.f32.mrf.mxu1  ;;  %7291 = vmatmul.mubr.bf16.gmra.mxu1 %v7665_v41 }
 0x2a0   : > { %v1872_v62 = vadd.f32 %v7004_v49, %v8980_v50  ;;  %v9084_v34 = vadd.f32 %v2660_v19, %v1867_v48  ;;  %v7120_v55 = vpop.f32.mrf.mxu0 }
 0x2a1   : > { %v1827_v18 = vpop.f32.mrf.mxu1 }
 0x2a2   : > { %v1870_v20 = vadd.f32 %v1827_v18, %v8984_v0  ;;  %v9087_v1 = vadd.f32 %v7052_v43, %v1872_v62  ;;  %v3333_v36 = vpop.f32.mrf.mxu0 }
 0x2a3   : > { %v7005_v13 = vpop.f32.mrf.mxu1 }
 0x2a4   : > { %v1873_v60 = vadd.f32 %v7005_v13, %v8986_v7  ;;  %v9092_v8 = vadd.f32 %v2673_v57, %v1870_v20  ;;  %v9096_v22 = vpop.f32.mrf.mxu0  ;;  %v7673_v20 = vld [vmem:[#allocation10] sm:$0xff]  }
 0x2a5   : > { %v1830_v50 = vpop.f32.mrf.mxu1  ;;  %7308 = vmatprep.subr.bf16.mxu0 %v7673_v20 }
 0x2a6   : > { %v1871_v54 = vadd.f32 %v1830_v50, %v1477_v33  ;;  %v9094_v29 = vadd.f32 %v7053_v39, %v1873_v60  ;;  %v9101_v10 = vpop.f32.mrf.mxu0  ;;  %7309 = vmatpush3.bf16.msra.mxu0 %v7673_v20  ;;  %v2701_v20 = vadd.f32 %v9033_v61, %v9042_v6 }
 0x2a7   : > { %v7072_v19 = vpop.f32.mrf.mxu1 }
 0x2a8   : > { %v3076_v0 = vadd.f32 %v7072_v19, %v8994_v11  ;;  %v9099_v12 = vadd.f32 %v2676_v14, %v1871_v54 }
 0x2a9   : > { %v2947_v43 = vpop.f32.mrf.mxu1  ;;  %v7124_v42 = vpop.f32.mrf.mxu0 }
 0x2aa   : > { %v3074_v7 = vadd.f32 %v2947_v43, %v8997_v53  ;;  %v9104_v27 = vadd.f32 %v7120_v55, %v3076_v0  ;;  %v2693_v55 = vadd.f32 %v9005_v56, %v9014_v45 }
 0x2ab   : > { %v7073_v41 = vpop.f32.mrf.mxu1  ;;  %v3349_v48 = vpop.f32.mrf.mxu0 }
 0x2ac   : > { %v9107_v26 = vadd.f32 %v7073_v41, %v9002_v30  ;;  %v9111_v11 = vadd.f32 %v3333_v36, %v3074_v7  ;;  %v2697_v7 = vadd.f32 %v9019_v28, %v9028_v4 }
 0x2ad   : > { %v2950_v57 = vpop.f32.mrf.mxu1  ;;  %v9115_v39 = vpop.f32.mrf.mxu0 }
 0x2ae   : > { %v9113_v32 = vadd.f32 %v2950_v57, %v2689_v51 }
 0x2af   : > { %v7076_v49 = vpop.f32.mrf.mxu1  ;;  %v9118_v18 = vpop.f32.mrf.mxu0 }
 0x2b0   : > { %v3080_v53 = vadd.f32 %v7076_v49, %v9008_v31 }
 0x2b1   : > { %v2963_v62 = vpop.f32.mrf.mxu1  ;;  %v7128_v3 = vpop.f32.mrf.mxu0 }
 0x2b2   : > { %v3078_v30 = vadd.f32 %v2963_v62, %v9011_v21  ;;  %v9121_v14 = vadd.f32 %v7124_v42, %v3080_v53 }
 0x2b3   : > { %v7077_v58 = vpop.f32.mrf.mxu1  ;;  %v3365_v60 = vpop.f32.mrf.mxu0 }
 0x2b4   : > { %v9124_v13 = vadd.f32 %v7077_v58, %v9016_v52  ;;  %v9128_v33 = vadd.f32 %v3349_v48, %v3078_v30 }
 0x2b5   : > { %v2966_v31 = vpop.f32.mrf.mxu1  ;;  %v9132_v36 = vpop.f32.mrf.mxu0 }
 0x2b6   : > { %v9130_v50 = vadd.f32 %v2966_v31, %v2693_v55 }
 0x2b7   : > { %v7080_v21 = vpop.f32.mrf.mxu1  ;;  %v9135_v19 = vpop.f32.mrf.mxu0 }
 0x2b8   : > { %v3084_v54 = vadd.f32 %v7080_v21, %v9022_v2 }
 0x2b9   : > { %v2979_v38 = vpop.f32.mrf.mxu1  ;;  %v7132_v45 = vpop.f32.mrf.mxu0 }
 0x2ba   : > { %v3082_v52 = vadd.f32 %v2979_v38, %v9025_v44  ;;  %v9138_v0 = vadd.f32 %v7128_v3, %v3084_v54 }
 0x2bb   : > { %v7081_v56 = vpop.f32.mrf.mxu1  ;;  %v3381_v51 = vpop.f32.mrf.mxu0 }
 0x2bc   : > { %v9141_v43 = vadd.f32 %v7081_v56, %v9030_v17  ;;  %v9145_v41 = vadd.f32 %v3365_v60, %v3082_v52 }
 0x2bd   : > { %v2982_v42 = vpop.f32.mrf.mxu1  ;;  %v9149_v48 = vpop.f32.mrf.mxu0 }
 0x2be   : > { %v9147_v2 = vadd.f32 %v2982_v42, %v2697_v7 }
 0x2bf   : > { %v7084_v57 = vpop.f32.mrf.mxu1  ;;  %v9152_v53 = vpop.f32.mrf.mxu0 }
 0x2c0   : > { %v3088_v44 = vadd.f32 %v7084_v57, %v9036_v35 }
 0x2c1   : > { %v2995_v49 = vpop.f32.mrf.mxu1  ;;  %v7136_v28 = vpop.f32.mrf.mxu0 }
 0x2c2   : > { %v3086_v17 = vadd.f32 %v2995_v49, %v9039_v40  ;;  %v9155_v62 = vadd.f32 %v7132_v45, %v3088_v44 }
 0x2c3   : > { %v7085_v30 = vpop.f32.mrf.mxu1  ;;  %v3397_v55 = vpop.f32.mrf.mxu0 }
 0x2c4   : > { %v9158_v4 = vadd.f32 %v7085_v30, %v9044_v15  ;;  %v9162_v58 = vadd.f32 %v3381_v51, %v3086_v17 }
 0x2c5   : > { %v2998_v3 = vpop.f32.mrf.mxu1  ;;  %v9166_v60 = vpop.f32.mrf.mxu0 }
 0x2c6   : > { %v9164_v35 = vadd.f32 %v2998_v3, %v2701_v20 }
 0x2c7   : > { %v7088_v31 = vpop.f32.mrf.mxu1  ;;  %v9169_v54 = vpop.f32.mrf.mxu0 }
 0x2c8   : > { %v3092_v40 = vadd.f32 %v7088_v31, %v9048_v23  ;;  %9656 = vst [vmem:[#allocation17_spill] sm:$0xff] %v9169_v54 }
 0x2c9   : > { %v3011_v21 = vpop.f32.mrf.mxu1  ;;  %v7140_v61 = vpop.f32.mrf.mxu0 }
 0x2ca   : > { %v3090_v15 = vadd.f32 %v3011_v21, %v9053_v25  ;;  %v9172_v38 = vadd.f32 %v7136_v28, %v3092_v40 }
 0x2cb   : > { %v7089_v52 = vpop.f32.mrf.mxu1  ;;  %v3413_v7 = vpop.f32.mrf.mxu0 }
 0x2cc   : > { %v9175_v6 = vadd.f32 %v7089_v52, %v9055_v16  ;;  %v9177_v56 = vadd.f32 %v3397_v55, %v3090_v15 }
 0x2cd   : > { %v3014_v45 = vpop.f32.mrf.mxu1  ;;  %v9182_v51 = vpop.f32.mrf.mxu0 }
 0x2ce   : > { %v9180_v42 = vadd.f32 %v3014_v45, %v9058_v37  ;;  %9657 = vst [vmem:[#allocation18_spill] sm:$0xff] %v9182_v51 }
 0x2cf   : > { %v7092_v23 = vpop.f32.mrf.mxu1  ;;  %v9185_v44 = vpop.f32.mrf.mxu0 }
 0x2d0   : > { %v3096_v57 = vadd.f32 %v7092_v23, %v9061_v24  ;;  %9658 = vst [vmem:[#allocation19_spill] sm:$0xff] %v9185_v44 }
 0x2d1   : > { %v3027_v25 = vpop.f32.mrf.mxu1  ;;  %v7144_v30 = vpop.f32.mrf.mxu0 }
 0x2d2   : > { %v3094_v49 = vadd.f32 %v3027_v25, %v9066_v9  ;;  %v9188_v17 = vadd.f32 %v7140_v61, %v3096_v57 }
 0x2d3   : > { %v7093_v16 = vpop.f32.mrf.mxu1  ;;  %v3429_v3 = vpop.f32.mrf.mxu0 }
 0x2d4   : > { %v9191_v28 = vadd.f32 %v7093_v16, %v9068_v47  ;;  %v9193_v20 = vadd.f32 %v3413_v7, %v3094_v49 }
 0x2d5   : > { %v3030_v37 = vpop.f32.mrf.mxu1  ;;  %v9198_v31 = vpop.f32.mrf.mxu0 }
 0x2d6   : > { %9659 = vst [vmem:[#allocation20_spill] sm:$0xff] %v9191_v28  ;;  %v9196_v55 = vadd.f32 %v3030_v37, %v9071_v63  ;;  %9661 = vst [vmem:[#allocation22_spill] sm:$0xff] %v9198_v31 }
 0x2d7   : > { %v7096_v24 = vpop.f32.mrf.mxu1  ;;  %v9201_v21 = vpop.f32.mrf.mxu0 }
 0x2d8   : > { %9660 = vst [vmem:[#allocation21_spill] sm:$0xff] %v9196_v55  ;;  %v3100_v40 = vadd.f32 %v7096_v24, %v9074_v5  ;;  %9662 = vst [vmem:[#allocation23_spill] sm:$0xff] %v9201_v21 }
 0x2d9   : > { %v3043_v9 = vpop.f32.mrf.mxu1  ;;  %v7148_v61 = vpop.f32.mrf.mxu0 }
 0x2da   : > { %v3098_v15 = vadd.f32 %v3043_v9, %v9079_v46  ;;  %v9204_v52 = vadd.f32 %v7144_v30, %v3100_v40 }
 0x2db   : > { %v7097_v47 = vpop.f32.mrf.mxu1  ;;  %v3445_v23 = vpop.f32.mrf.mxu0 }
 0x2dc   : > { %v9207_v45 = vadd.f32 %v7097_v47, %v9081_v59  ;;  %v9209_v7 = vadd.f32 %v3429_v3, %v3098_v15 }
 0x2dd   : > { %v3046_v63 = vpop.f32.mrf.mxu1  ;;  %v9214_v25 = vpop.f32.mrf.mxu0 }
 0x2de   : > { %9663 = vst [vmem:[#allocation24_spill] sm:$0xff] %v9207_v45  ;;  %v9212_v57 = vadd.f32 %v3046_v63, %v9084_v34  ;;  %9665 = vst [vmem:[#allocation26_spill] sm:$0xff] %v9214_v25 }
 0x2df   : > { %v7100_v5 = vpop.f32.mrf.mxu1  ;;  %v9220_v37 = vpop.f32.mrf.mxu0 }
 0x2e0   : > { %9664 = vst [vmem:[#allocation25_spill] sm:$0xff] %v9212_v57  ;;  %v3104_v49 = vadd.f32 %v7100_v5, %v9087_v1  ;;  %9666 = vst [vmem:[#allocation27_spill] sm:$0xff] %v9220_v37 }
 0x2e1   : > { %v3059_v46 = vpop.f32.mrf.mxu1  ;;  %v9230_v9 = vpop.f32.mrf.mxu0 }
 0x2e2   : > { %v3102_v16 = vadd.f32 %v3059_v46, %v9092_v8  ;;  %v9218_v30 = vadd.f32 %v7148_v61, %v3104_v49 }
 0x2e3   : > { %v7101_v59 = vpop.f32.mrf.mxu1  ;;  %v9238_v61 = vpop.f32.mrf.mxu0 }
 0x2e4   : > { %v9223_v3 = vadd.f32 %v7101_v59, %v9094_v29  ;;  %v9225_v24 = vadd.f32 %v3445_v23, %v3102_v16 }
 0x2e5   : > { %v3062_v34 = vpop.f32.mrf.mxu1  ;;  %v9242_v23 = vpop.f32.mrf.mxu0 }
 0x2e6   : > { %9667 = vst [vmem:[#allocation28_spill] sm:$0xff] %v9223_v3  ;;  %v9228_v40 = vadd.f32 %v3062_v34, %v9099_v12 }
 0x2e7   : > { %v7168_v1 = vpop.f32.mrf.mxu1 }
 0x2e8   : > { %9668 = vst [vmem:[#allocation29_spill] sm:$0xff] %v9228_v40  ;;  %v9233_v15 = vadd.f32 %v7168_v1, %v9104_v27  ;;  %v9250_v27 = vpop.f32.mrf.mxu0 }
 0x2e9   : > { %v4245_v8 = vpop.f32.mrf.mxu1 }
 0x2ea   : > { %v9236_v47 = vadd.f32 %v4245_v8, %v9111_v11  ;;  %v9256_v59 = vpop.f32.mrf.mxu0 }
 0x2eb   : > { %v7169_v29 = vpop.f32.mrf.mxu1 }
 0x2ed   : > { %v9240_v63 = vpop.f32.mrf.mxu1 }
 0x2ef   : > { %v7172_v5 = vpop.f32.mrf.mxu1 }
 0x2f0   : > { %v9245_v12 = vadd.f32 %v7172_v5, %v9121_v14  ;;  %v9264_v5 = vpop.f32.mrf.mxu0 }
 0x2f1   : > { %v4261_v49 = vpop.f32.mrf.mxu1 }
 0x2f2   : > { %v9248_v46 = vadd.f32 %v4261_v49, %v9128_v33  ;;  %v9270_v37 = vpop.f32.mrf.mxu0 }
 0x2f3   : > { %v9252_v16 = vpop.f32.mrf.mxu1 }
 0x2f5   : > { %v9254_v11 = vpop.f32.mrf.mxu1 }
 0x2f7   : > { %v7176_v34 = vpop.f32.mrf.mxu1 }
 0x2f8   : > { %v9259_v1 = vadd.f32 %v7176_v34, %v9138_v0  ;;  %v9278_v34 = vpop.f32.mrf.mxu0 }
 0x2f9   : > { %v4277_v8 = vpop.f32.mrf.mxu1 }
 0x2fa   : > { %v9262_v14 = vadd.f32 %v4277_v8, %v9145_v41  ;;  %v9284_v21 = vpop.f32.mrf.mxu0 }
 0x2fb   : > { %v9266_v33 = vpop.f32.mrf.mxu1 }
 0x2fd   : > { %v9268_v49 = vpop.f32.mrf.mxu1 }
 0x2ff   : > { %v7180_v40 = vpop.f32.mrf.mxu1 }
 0x300   : > { %v9273_v25 = vadd.f32 %v7180_v40, %v9155_v62  ;;  %v9292_v40 = vpop.f32.mrf.mxu0 }
 0x301   : > { %v4293_v3 = vpop.f32.mrf.mxu1 }
 0x302   : > { %v9276_v0 = vadd.f32 %v4293_v3, %v9162_v58  ;;  %v9298_v44 = vpop.f32.mrf.mxu0 }
 0x303   : > { %v9280_v41 = vpop.f32.mrf.mxu1 }
 0x305   : > { %v9282_v8 = vpop.f32.mrf.mxu1 }
 0x307   : > { %v7184_v57 = vpop.f32.mrf.mxu1 }
 0x308   : > { %v9287_v31 = vadd.f32 %v7184_v57, %v9172_v38  ;;  %v9306_v57 = vpop.f32.mrf.mxu0 }
 0x309   : > { %v4309_v45 = vpop.f32.mrf.mxu1 }
 0x30a   : > { %9669 = vst [vmem:[#allocation30_spill] sm:$0xff] %v9287_v31  ;;  %v9290_v62 = vadd.f32 %v4309_v45, %v9177_v56 }
 0x30b   : > { %v9294_v58 = vpop.f32.mrf.mxu1 }
 0x30c   : > { %9670 = vst [vmem:[#allocation31_spill] sm:$0xff] %v9290_v62  ;;  %v9312_v62 = vpop.f32.mrf.mxu0 }
 0x30d   : > { %v9296_v3 = vpop.f32.mrf.mxu1 }
 0x30e   : > { %9671 = vst [vmem:[#allocation32_spill] sm:$0xff] %v9296_v3 }
 0x30f   : > { %v7188_v55 = vpop.f32.mrf.mxu1 }
 0x310   : > { %v9301_v51 = vadd.f32 %v7188_v55, %v9188_v17  ;;  %v9320_v55 = vpop.f32.mrf.mxu0 }
 0x311   : > { %v4325_v28 = vpop.f32.mrf.mxu1 }
 0x312   : > { %9672 = vst [vmem:[#allocation33_spill] sm:$0xff] %v9301_v51  ;;  %v9304_v38 = vadd.f32 %v4325_v28, %v9193_v20 }
 0x313   : > { %v9308_v56 = vpop.f32.mrf.mxu1 }
 0x314   : > { %9673 = vst [vmem:[#allocation34_spill] sm:$0xff] %v9304_v38  ;;  %9674 = vst [vmem:[#allocation35_spill] sm:$0xff] %v9308_v56  ;;  %v9326_v38 = vpop.f32.mrf.mxu0 }
 0x315   : > { %v9310_v45 = vpop.f32.mrf.mxu1 }
 0x316   : > { %9675 = vst [vmem:[#allocation36_spill] sm:$0xff] %v9310_v45 }
 0x317   : > { %v7192_v31 = vpop.f32.mrf.mxu1 }
 0x318   : > { %v9315_v3 = vadd.f32 %v7192_v31, %v9204_v52  ;;  %v9334_v52 = vpop.f32.mrf.mxu0 }
 0x319   : > { %v4341_v54 = vpop.f32.mrf.mxu1 }
 0x31a   : > { %9676 = vst [vmem:[#allocation37_spill] sm:$0xff] %v9315_v3  ;;  %v9318_v17 = vadd.f32 %v4341_v54, %v9209_v7  ;;  %v3463_v7 = vadd.f32 %v9096_v22, %v9107_v26  ;;  %v3461_v3 = vadd.f32 %v9101_v10, %v9113_v32  ;;  %v9354_v22 = vld [vmem:[%s9607_s4] ss:$0 sm:$0xff]  ;;  %v3467_v32 = vadd.f32 %v9115_v39, %v9124_v13 }
 0x31b   : > { %v9322_v28 = vpop.f32.mrf.mxu1  ;;  %v4764_v39 = vadd.f32 %v9256_v59, %v9245_v12 }
 0x31c   : > { %9677 = vst [vmem:[#allocation38_spill] sm:$0xff] %v9318_v17 }
 0x31d   : > { %v9324_v20 = vpop.f32.mrf.mxu1 }
 0x31e   : > { %9678 = vst [vmem:[#allocation39_spill] sm:$0xff] %v9324_v20  ;;  %v4375_v20 = vadd.f32 %v7169_v29, %v3463_v7  ;;  %v3465_v7 = vadd.f32 %v9118_v18, %v9130_v50 }
 0x31f   : > { %v7196_v51 = vpop.f32.mrf.mxu1 }
 0x320   : > { %v9329_v45 = vadd.f32 %v7196_v51, %v9218_v30  ;;  %v4760_v51 = vadd.f32 %v9230_v9, %v9233_v15  ;;  %v9346_v30 = vpop.f32.mrf.mxu0  ;;  %v4761_v10 = vadd.f32 %v9242_v23, %v4375_v20  ;;  %v4377_v13 = vadd.f32 %v9254_v11, %v3465_v7 }
 0x321   : > { %v4357_v56 = vpop.f32.mrf.mxu1  ;;  %v3471_v11 = vadd.f32 %v9132_v36, %v9141_v43  ;;  %v4768_v43 = vadd.f32 %v9284_v21, %v9259_v1 }
 0x322   : > { %9679 = vst [vmem:[#allocation40_spill] sm:$0xff] %v9329_v45  ;;  %v9332_v31 = vadd.f32 %v4357_v56, %v9225_v24  ;;  %v4373_v56 = vadd.f32 %v9240_v63, %v3461_v3  ;;  %v4758_v45 = vadd.f32 %v9238_v61, %v9236_v47  ;;  %v9359_v9 = vpop.f32.mrf.mxu0  ;;  %v4379_v61 = vadd.f32 %v9252_v16, %v3467_v32 }
 0x323   : > { %v9336_v54 = vpop.f32.mrf.mxu1  ;;  %v4383_v7 = vadd.f32 %v9266_v33, %v3471_v11  ;;  %v4766_v33 = vadd.f32 %v9292_v40, %v9262_v14 }
 0x324   : > { %9680 = vst [vmem:[#allocation41_spill] sm:$0xff] %v9332_v31  ;;  %v4759_v47 = vadd.f32 %v9250_v27, %v4373_v56  ;;  %v4762_v27 = vadd.f32 %v9264_v5, %v9248_v46 }
 0x325   : > { %v9340_v17 = vpop.f32.mrf.mxu1 }
 0x327   : > { %v7264_v24 = vpop.f32.mrf.mxu1 }
 0x328   : > { %v5146_v31 = vadd.f32 %v7264_v24, %v4760_v51 }
 0x329   : > { %v5017_v26 = vpop.f32.mrf.mxu1 }
 0x32a   : > { %v5144_v29 = vadd.f32 %v5017_v26, %v4758_v45  ;;  %v5185_v63 = vadd.f32 %v9354_v22, %v5146_v31  ;;  %v9371_v31 = vpop.f32.mrf.mxu0 }
 0x32b   : > { %v7265_v15 = vpop.f32.mrf.mxu1 }
 0x32c   : > { %v5147_v3 = vadd.f32 %v7265_v15, %v4761_v10  ;;  %v5183_v45 = vadd.f32 %v9354_v22, %v5144_v29  ;;  %v5217_v16 = vmax.f32 %v5185_v63, 0.0  ;;  %v4765_v29 = vadd.f32 %v9270_v37, %v4379_v61  ;;  %v9379_v59 = vpop.f32.mrf.mxu0 }
 0x32d   : > { %v5020_v51 = vpop.f32.mrf.mxu1  ;;  %v4763_v63 = vadd.f32 %v9278_v34, %v4377_v13  ;;  %v3469_v37 = vadd.f32 %v9135_v19, %v9147_v2 }
 0x32e   : > { %v5186_v23 = vadd.f32 %v9354_v22, %v5147_v3  ;;  %v5145_v20 = vadd.f32 %v5020_v51, %v4759_v47  ;;  %v5215_v10 = vmax.f32 %v5183_v45, 0.0 }
 0x32f   : > { %v7268_v24 = vpop.f32.mrf.mxu1 }
 0x330   : > { %v5218_v56 = vmax.f32 %v5186_v23, 0.0  ;;  %v5184_v18 = vadd.f32 %v9354_v22, %v5145_v20  ;;  %v5150_v50 = vadd.f32 %v7268_v24, %v4764_v39  ;;  %v4381_v23 = vadd.f32 %v9268_v49, %v3469_v37  ;;  %v9391_v20 = vpop.f32.mrf.mxu0 }
 0x331   : > { %v5033_v26 = vpop.f32.mrf.mxu1  ;;  %v3475_v49 = vadd.f32 %v9149_v48, %v9158_v4  ;;  %v4772_v4 = vadd.f32 %v9312_v62, %v9273_v25 }
 0x332   : > { %v5248_v32 = vpack.c.bf16 %v5218_v56, %v5217_v16  ;;  %v5216_v15 = vmax.f32 %v5184_v18, 0.0  ;;  %v5148_v12 = vadd.f32 %v5033_v26, %v4762_v27  ;;  %v5189_v46 = vadd.f32 %v9354_v22, %v5150_v50  ;;  %v9399_v18 = vpop.f32.mrf.mxu0 }
 0x333   : > { %v7269_v3 = vpop.f32.mrf.mxu1  ;;  %v4769_v27 = vadd.f32 %v9298_v44, %v4383_v7  ;;  %v4767_v26 = vadd.f32 %v9306_v57, %v4381_v23  ;;  %v3473_v44 = vadd.f32 %v9152_v53, %v9164_v35 }
 0x334   : > { %v5151_v5 = vadd.f32 %v7269_v3, %v4765_v29  ;;  %v5247_v47 = vpack.c.bf16 %v5216_v15, %v5215_v10  ;;  %v5187_v51 = vadd.f32 %v9354_v22, %v5148_v12  ;;  %v5221_v19 = vmax.f32 %v5189_v46, 0.0  ;;  %v9411_v3 = vpop.f32.mrf.mxu0 }
 0x335   : > { %v5036_v61 = vpop.f32.mrf.mxu1  ;;  %v4387_v10 = vadd.f32 %v9280_v41, %v3475_v49  ;;  %v4385_v11 = vadd.f32 %v9282_v8, %v3473_v44  ;;  %v4770_v41 = vadd.f32 %v9320_v55, %v9276_v0  ;;  %v3479_v8 = vadd.f32 %v9166_v60, %v9175_v6  ;;  %v9682_v6 = vld [vmem:[#allocation30_spill] sm:$0xff] }
 0x336   : > { %v5190_v45 = vadd.f32 %v9354_v22, %v5151_v5  ;;  %v5149_v36 = vadd.f32 %v5036_v61, %v4763_v63  ;;  %7310 = vmatprep.mubr.bf16.mxu0 %v5247_v47  ;;  %v5219_v16 = vmax.f32 %v5187_v51, 0.0  ;;  %v9419_v61 = vpop.f32.mrf.mxu0 }
 0x337   : > { %v7272_v34 = vpop.f32.mrf.mxu1  ;;  %7311 = vmatmul.mubr.bf16.vlgmr.msra.gmra.mxu0 %v5248_v32  ;;  %v4773_v47 = vadd.f32 %v9326_v38, %v4387_v10  ;;  %v9681_v38 = vld [vmem:[#allocation17_spill] sm:$0xff] }
 0x338   : > { %v5222_v2 = vmax.f32 %v5190_v45, 0.0  ;;  %v5188_v39 = vadd.f32 %v9354_v22, %v5149_v36  ;;  %v5154_v13 = vadd.f32 %v7272_v34, %v4768_v43  ;;  %v4771_v45 = vadd.f32 %v9334_v52, %v4385_v11 }
 0x339   : > { %v5049_v24 = vpop.f32.mrf.mxu1  ;;  %v4391_v43 = vadd.f32 %v9294_v58, %v3479_v8  ;;  %v3477_v23 = vadd.f32 %v9681_v38, %v9180_v42 }
 0x33a   : > { %v5250_v56 = vpack.c.bf16 %v5222_v2, %v5221_v19  ;;  %v5220_v21 = vmax.f32 %v5188_v39, 0.0  ;;  %v5152_v1 = vadd.f32 %v5049_v24, %v4766_v33  ;;  %v5193_v14 = vadd.f32 %v9354_v22, %v5154_v13  ;;  %v9683_v39 = vld [vmem:[#allocation32_spill] sm:$0xff]  ;;  %v7240_v24 = vpop.f32.mrf.mxu0 }
 0x33b   : > { %v7273_v50 = vpop.f32.mrf.mxu1  ;;  %v4776_v2 = vadd.f32 %v9346_v30, %v9682_v6  ;;  %v4389_v13 = vadd.f32 %v9683_v39, %v3477_v23  ;;  %v4777_v49 = vadd.f32 %v9371_v31, %v4391_v43 }
 0x33c   : > { %v5155_v40 = vadd.f32 %v7273_v50, %v4769_v27  ;;  %v5249_v29 = vpack.c.bf16 %v5220_v21, %v5219_v16  ;;  %v5191_v15 = vadd.f32 %v9354_v22, %v5152_v1  ;;  %v5225_v53 = vmax.f32 %v5193_v14, 0.0  ;;  %v9684_v27 = vld [vmem:[#allocation31_spill] sm:$0xff]  ;;  %v4727_v44 = vpop.f32.mrf.mxu0 }
 0x33d   : > { %v5052_v32 = vpop.f32.mrf.mxu1  ;;  %v4774_v58 = vadd.f32 %v9359_v9, %v9684_v27 }
 0x33e   : > { %v5194_v12 = vadd.f32 %v9354_v22, %v5155_v40  ;;  %v5153_v48 = vadd.f32 %v5052_v32, %v4767_v26  ;;  %7314 = vmatprep.mubr.bf16.mxu0 %v5249_v29  ;;  %v5223_v7 = vmax.f32 %v5191_v15, 0.0  ;;  %v9685_v26 = vld [vmem:[#allocation20_spill] sm:$0xff]  ;;  %v9686_v29 = vld [vmem:[#allocation18_spill] sm:$0xff] }
 0x33f   : > { %v7276_v57 = vpop.f32.mrf.mxu1  ;;  %7315 = vmatmul.mubr.bf16.gmra.mxu0 %v5250_v56  ;;  %v3483_v10 = vadd.f32 %v9686_v29, %v9685_v26 }
 0x340   : > { %v5226_v35 = vmax.f32 %v5194_v12, 0.0  ;;  %v5192_v46 = vadd.f32 %v9354_v22, %v5153_v48  ;;  %v5158_v5 = vadd.f32 %v7276_v57, %v4772_v4  ;;  %v4775_v12 = vadd.f32 %v9379_v59, %v4389_v13  ;;  %v9687_v4 = vld [vmem:[#allocation35_spill] sm:$0xff]  ;;  %v9688_v57 = vld [vmem:[#allocation21_spill] sm:$0xff] }
 0x341   : > { %v5065_v63 = vpop.f32.mrf.mxu1  ;;  %v4395_v11 = vadd.f32 %v9687_v4, %v3483_v10 }
 0x342   : > { %v5252_v37 = vpack.c.bf16 %v5226_v35, %v5225_v53  ;;  %v5224_v25 = vmax.f32 %v5192_v46, 0.0  ;;  %v5156_v62 = vadd.f32 %v5065_v63, %v4770_v41  ;;  %v5197_v0 = vadd.f32 %v9354_v22, %v5158_v5  ;;  %v9689_v41 = vld [vmem:[#allocation19_spill] sm:$0xff]  ;;  %v9690_v63 = vld [vmem:[#allocation33_spill] sm:$0xff] }
 0x343   : > { %v7277_v51 = vpop.f32.mrf.mxu1  ;;  %v3481_v31 = vadd.f32 %v9689_v41, %v9688_v57  ;;  %v4781_v43 = vadd.f32 %v9411_v3, %v4395_v11 }
 0x344   : > { %v5159_v55 = vadd.f32 %v7277_v51, %v4773_v47  ;;  %v5251_v36 = vpack.c.bf16 %v5224_v25, %v5223_v7  ;;  %v5195_v33 = vadd.f32 %v9354_v22, %v5156_v62  ;;  %v5229_v16 = vmax.f32 %v5197_v0, 0.0  ;;  %v9691_v7 = vld [vmem:[#allocation36_spill] sm:$0xff]  ;;  %v7241_v25 = vpop.f32.mrf.mxu0  ;;  %v9692_v62 = vld [vmem:[#allocation34_spill] sm:$0xff] }
 0x345   : > { %v5068_v34 = vpop.f32.mrf.mxu1  ;;  %v4780_v47 = vadd.f32 %v9391_v20, %v9690_v63  ;;  %v4778_v8 = vadd.f32 %v9399_v18, %v9692_v62 }
 0x346   : > { %v5198_v19 = vadd.f32 %v9354_v22, %v5159_v55  ;;  %v5157_v60 = vadd.f32 %v5068_v34, %v4771_v45  ;;  %7318 = vmatprep.mubr.bf16.mxu0 %v5251_v36  ;;  %v5227_v50 = vmax.f32 %v5195_v33, 0.0  ;;  %v4730_v33 = vpop.f32.mrf.mxu0 }
 0x347   : > { %v7280_v52 = vpop.f32.mrf.mxu1  ;;  %7319 = vmatmul.mubr.bf16.gmra.mxu0 %v5252_v37  ;;  %v4393_v37 = vadd.f32 %v9691_v7, %v3481_v31  ;;  %v9701_v31 = vld [vmem:[#allocation26_spill] sm:$0xff]  ;;  %v9702_v7 = vld [vmem:[#allocation29_spill] sm:$0xff] }
 0x348   : > { %v5230_v42 = vmax.f32 %v5198_v19, 0.0  ;;  %v5196_v56 = vadd.f32 %v9354_v22, %v5157_v60  ;;  %v5162_v21 = vadd.f32 %v7280_v52, %v4776_v2  ;;  %v9693_v19 = vld [vmem:[#allocation24_spill] sm:$0xff]  ;;  %v9694_v60 = vld [vmem:[#allocation22_spill] sm:$0xff] }
 0x349   : > { %v5081_v1 = vpop.f32.mrf.mxu1  ;;  %v3487_v6 = vadd.f32 %v9694_v60, %v9693_v19  ;;  %v4779_v13 = vadd.f32 %v9419_v61, %v4393_v37  ;;  %v9699_v61 = vld [vmem:[#allocation38_spill] sm:$0xff]  ;;  %v9703_v37 = vld [vmem:[#allocation27_spill] sm:$0xff] }
 0x34a   : > { %v5254_v14 = vpack.c.bf16 %v5230_v42, %v5229_v16  ;;  %v5228_v40 = vmax.f32 %v5196_v56, 0.0  ;;  %v5160_v30 = vadd.f32 %v5081_v1, %v4774_v58  ;;  %v5201_v15 = vadd.f32 %v9354_v22, %v5162_v21  ;;  %v9695_v58 = vld [vmem:[#allocation25_spill] sm:$0xff]  ;;  %v9696_v16 = vld [vmem:[#allocation23_spill] sm:$0xff] }
 0x34b   : > { %v7281_v32 = vpop.f32.mrf.mxu1  ;;  %v4399_v27 = vadd.f32 %v9322_v28, %v3487_v6  ;;  %v3485_v3 = vadd.f32 %v9696_v16, %v9695_v58  ;;  %v4782_v29 = vadd.f32 %v4727_v44, %v9699_v61  ;;  %v9483_v61 = vld [vmem:[%s9609_s6] ss:$0 sm:$0xff] }
 0x34c   : > { %v5163_v9 = vadd.f32 %v7281_v32, %v4777_v49  ;;  %v5253_v48 = vpack.c.bf16 %v5228_v40, %v5227_v50  ;;  %v5199_v35 = vadd.f32 %v9354_v22, %v5160_v30  ;;  %v5233_v51 = vmax.f32 %v5201_v15, 0.0  ;;  %v9697_v49 = vld [vmem:[#allocation37_spill] sm:$0xff]  ;;  %v9698_v40 = vld [vmem:[#allocation39_spill] sm:$0xff] }
 0x34d   : > { %v5084_v53 = vpop.f32.mrf.mxu1  ;;  %v4784_v50 = vadd.f32 %v7240_v24, %v9697_v49  ;;  %v4397_v30 = vadd.f32 %v9698_v40, %v3485_v3  ;;  %v9700_v24 = vld [vmem:[#allocation28_spill] sm:$0xff] }
 0x34e   : > { %v5202_v46 = vadd.f32 %v9354_v22, %v5163_v9  ;;  %v5161_v5 = vadd.f32 %v5084_v53, %v4775_v12  ;;  %7322 = vmatprep.mubr.bf16.mxu0 %v5253_v48  ;;  %v5231_v38 = vmax.f32 %v5199_v35, 0.0  ;;  %v4785_v12 = vadd.f32 %v7241_v25, %v4399_v27 }
 0x34f   : > { %v7284_v59 = vpop.f32.mrf.mxu1  ;;  %7323 = vmatmul.mubr.bf16.gmra.mxu0 %v5254_v14  ;;  %v7244_v14 = vpop.f32.mrf.mxu0  ;;  %v3491_v53 = vadd.f32 %v9701_v31, %v9700_v24  ;;  %v4783_v44 = vadd.f32 %v4730_v33, %v4397_v30  ;;  %v6522_v24 = vld [vmem:[%s8058_s12 + $0x18] sm:$0xff]  }
 0x350   : > { %v5234_v0 = vmax.f32 %v5202_v46, 0.0  ;;  %v5200_v55 = vadd.f32 %v9354_v22, %v5161_v5  ;;  %v5166_v45 = vadd.f32 %v7284_v59, %v4780_v47  ;;  %v3489_v59 = vadd.f32 %v9703_v37, %v9702_v7 }
 0x351   : > { %v5097_v36 = vpop.f32.mrf.mxu1  ;;  %v4743_v41 = vpop.f32.mrf.mxu0  ;;  %v4403_v47 = vadd.f32 %v9336_v54, %v3491_v53 }
 0x352   : > { %v5256_v23 = vpack.c.bf16 %v5234_v0, %v5233_v51  ;;  %v5232_v34 = vmax.f32 %v5200_v55, 0.0  ;;  %v5164_v20 = vadd.f32 %v5097_v36, %v4778_v8  ;;  %v5205_v39 = vadd.f32 %v9354_v22, %v5166_v45  ;;  %v9704_v0 = vld [vmem:[#allocation40_spill] sm:$0xff] }
 0x353   : > { %v7285_v2 = vpop.f32.mrf.mxu1  ;;  %v4788_v55 = vadd.f32 %v7244_v14, %v9704_v0  ;;  %v7245_v45 = vpop.f32.mrf.mxu0  ;;  %v4401_v36 = vadd.f32 %v9340_v17, %v3489_v59 }
 0x354   : > { %v5167_v18 = vadd.f32 %v7285_v2, %v4781_v43  ;;  %v5255_v52 = vpack.c.bf16 %v5232_v34, %v5231_v38  ;;  %v5203_v56 = vadd.f32 %v9354_v22, %v5164_v20  ;;  %v5237_v28 = vmax.f32 %v5205_v39, 0.0  ;;  %v9705_v38 = vld [vmem:[#allocation41_spill] sm:$0xff] }
 0x355   : > { %v5100_v42 = vpop.f32.mrf.mxu1  ;;  %v4789_v60 = vadd.f32 %v7245_v45, %v4403_v47 }
 0x356   : > { %v5206_v21 = vadd.f32 %v9354_v22, %v5167_v18  ;;  %v5165_v1 = vadd.f32 %v5100_v42, %v4779_v13  ;;  %7326 = vmatprep.mubr.bf16.mxu0 %v5255_v52  ;;  %v5235_v48 = vmax.f32 %v5203_v56, 0.0  ;;  %v4746_v13 = vpop.f32.mrf.mxu0 }
 0x357   : > { %v7288_v26 = vpop.f32.mrf.mxu1  ;;  %7327 = vmatmul.mubr.bf16.gmra.mxu0 %v5256_v23  ;;  %v4786_v23 = vadd.f32 %v4743_v41, %v9705_v38  ;;  %v4787_v58 = vadd.f32 %v4746_v13, %v4401_v36 }
 0x358   : > { %v5238_v10 = vmax.f32 %v5206_v21, 0.0  ;;  %v5204_v32 = vadd.f32 %v9354_v22, %v5165_v1  ;;  %v5170_v15 = vadd.f32 %v7288_v26, %v4784_v50 }
 0x359   : > { %v5113_v9 = vpop.f32.mrf.mxu1 }
 0x35a   : > { %v5258_v4 = vpack.c.bf16 %v5238_v10, %v5237_v28  ;;  %v5236_v11 = vmax.f32 %v5204_v32, 0.0  ;;  %v5168_v57 = vadd.f32 %v5113_v9, %v4782_v29  ;;  %v5209_v46 = vadd.f32 %v9354_v22, %v5170_v15  ;;  %v6520_v29 = vld [vmem:[%s8058_s12 + $0x8] sm:$0xff]   ;;  %v6362_v10 = vld [vmem:[%s8058_s12] sm:$0xff]  }
 0x35b   : > { %v7289_v35 = vpop.f32.mrf.mxu1  ;;  %v6367_v15 = vunpack.c.l.bf16 %v6520_v29  ;;  %v6364_v41 = vunpack.c.h.bf16 %v6362_v10 }
 0x35c   : > { %v5171_v5 = vadd.f32 %v7289_v35, %v4785_v12  ;;  %v5257_v63 = vpack.c.bf16 %v5236_v11, %v5235_v48  ;;  %v5207_v62 = vadd.f32 %v9354_v22, %v5168_v57  ;;  %v5241_v54 = vmax.f32 %v5209_v46, 0.0 }
 0x35d   : > { %v5116_v25 = vpop.f32.mrf.mxu1  ;;  %v6363_v12 = vunpack.c.l.bf16 %v6362_v10  ;;  %v6368_v48 = vunpack.c.h.bf16 %v6520_v29 }
 0x35e   : > { %v5210_v8 = vadd.f32 %v9354_v22, %v5171_v5  ;;  %v5169_v51 = vadd.f32 %v5116_v25, %v4783_v44  ;;  %7330 = vmatprep.mubr.bf16.mxu0 %v5257_v63  ;;  %v5239_v6 = vmax.f32 %v5207_v62, 0.0  ;;  %v6521_v5 = vld [vmem:[%s8058_s12 + $0x10] sm:$0xff]   ;;  %v6375_v63 = vunpack.c.l.bf16 %v6522_v24 }
 0x35f   : > { %v7292_v43 = vpop.f32.mrf.mxu1  ;;  %7331 = vmatmul.mubr.bf16.gmra.mxu0 %v5258_v4  ;;  %v6371_v62 = vunpack.c.l.bf16 %v6521_v5 }
 0x360   : > { %v5242_v34 = vmax.f32 %v5210_v8, 0.0  ;;  %v5208_v20 = vadd.f32 %v9354_v22, %v5169_v51  ;;  %v5174_v33 = vadd.f32 %v7292_v43, %v4788_v55  ;;  %v6376_v8 = vunpack.c.h.bf16 %v6522_v24 }
 0x361   : > { %v5129_v19 = vpop.f32.mrf.mxu1 }
 0x362   : > { %v5260_v2 = vpack.c.bf16 %v5242_v34, %v5241_v54  ;;  %v5240_v39 = vmax.f32 %v5208_v20, 0.0  ;;  %v5172_v18 = vadd.f32 %v5129_v19, %v4786_v23  ;;  %v5213_v27 = vadd.f32 %v9354_v22, %v5174_v33  ;;  %v6524_v34 = vld [vmem:[%s8058_s12 + $0x28] sm:$0xff]  }
 0x363   : > { %v7293_v52 = vpop.f32.mrf.mxu1  ;;  %v6372_v54 = vunpack.c.h.bf16 %v6521_v5 }
 0x364   : > { %v5175_v17 = vadd.f32 %v7293_v52, %v4789_v60  ;;  %v5259_v16 = vpack.c.bf16 %v5240_v39, %v5239_v6  ;;  %v5211_v42 = vadd.f32 %v9354_v22, %v5172_v18  ;;  %v5245_v1 = vmax.f32 %v5213_v27, 0.0  ;;  %v6523_v6 = vld [vmem:[%s8058_s12 + $0x20] sm:$0xff]  }
 0x365   : > { %v5132_v3 = vpop.f32.mrf.mxu1  ;;  %v6383_v39 = vunpack.c.l.bf16 %v6524_v34 }
 0x366   : > { %v5214_v56 = vadd.f32 %v9354_v22, %v5175_v17  ;;  %v5173_v21 = vadd.f32 %v5132_v3, %v4787_v58  ;;  %7334 = vmatprep.mubr.bf16.mxu0 %v5259_v16  ;;  %v5243_v14 = vmax.f32 %v5211_v42, 0.0  ;;  %v6379_v58 = vunpack.c.l.bf16 %v6523_v6 }
 0x367   : > { %7335 = vmatmul.mubr.bf16.gmra.mxu0 %v5260_v2  ;;  %v6384_v16 = vunpack.c.h.bf16 %v6524_v34 }
 0x368   : > { %v5246_v49 = vmax.f32 %v5214_v56, 0.0  ;;  %v5212_v50 = vadd.f32 %v9354_v22, %v5173_v21 }
 0x36a   : > { %v5262_v40 = vpack.c.bf16 %v5246_v49, %v5245_v1  ;;  %v5244_v30 = vmax.f32 %v5212_v50, 0.0 }
 0x36c   : > { %v5261_v26 = vpack.c.bf16 %v5244_v30, %v5243_v14  ;;  %v6526_v30 = vld [vmem:[%s8058_s12 + $0x38] sm:$0xff]  }
 0x36e   : > { %7338 = vmatprep.mubr.bf16.mxu0 %v5261_v26 }
 0x36f   : > { %7339 = vmatmul.mubr.bf16.gmra.mxu0 %v5262_v40  ;;  %v6380_v40 = vunpack.c.h.bf16 %v6523_v6 }
 0x3f7   : > { %v7312_v28 = vpop.f32.mrf.mxu0 }
 0x3f8   : > { %v5377_v32 = vadd.f32 %v7312_v28, %v9483_v61 }
 0x3f9   : > { %v5368_v22 = vpop.f32.mrf.mxu0 }
 0x3fa   : > { %v5369_v9 = vadd.f32 %v9483_v61, %v5368_v22  ;;  %v5561_v11 = vadd.f32 %v6367_v15, %v5377_v32  ;;  %v6525_v32 = vld [vmem:[%s8058_s12 + $0x30] sm:$0xff]   ;;  %v6391_v22 = vunpack.c.l.bf16 %v6526_v30 }
 0x3fb   : > { %v7313_v4 = vpop.f32.mrf.mxu0 }
 0x3fc   : > { %v5380_v57 = vadd.f32 %v7313_v4, %v9483_v61  ;;  %v5559_v53 = vadd.f32 %v6363_v12, %v5369_v9  ;;  %v5593_v47 = vmax.f32 %v5561_v11, 0.0 }
 0x3fd   : > { %v5371_v31 = vpop.f32.mrf.mxu0 }
 0x3fe   : > { %v5562_v35 = vadd.f32 %v6368_v48, %v5380_v57  ;;  %v5372_v46 = vadd.f32 %v9483_v61, %v5371_v31  ;;  %v5591_v51 = vmax.f32 %v5559_v53, 0.0  ;;  %v6387_v57 = vunpack.c.l.bf16 %v6525_v32 }
 0x3ff   : > { %v7316_v44 = vpop.f32.mrf.mxu0 }
 0x400   : > { %v5594_v7 = vmax.f32 %v5562_v35, 0.0  ;;  %v5560_v37 = vadd.f32 %v6364_v41, %v5372_v46  ;;  %v5393_v59 = vadd.f32 %v7316_v44, %v9483_v61  ;;  %v6392_v41 = vunpack.c.h.bf16 %v6526_v30 }
 0x401   : > { %v5384_v25 = vpop.f32.mrf.mxu0 }
 0x402   : > { %v6433_v0 = vpack.c.bf16 %v5594_v7, %v5593_v47  ;;  %v5592_v55 = vmax.f32 %v5560_v37, 0.0  ;;  %v5385_v45 = vadd.f32 %v9483_v61, %v5384_v25  ;;  %v5565_v38 = vadd.f32 %v6375_v63, %v5393_v59  ;;  %v6528_v7 = vld [vmem:[%s8058_s12 + $0x48] sm:$0xff]  }
 0x403   : > { %v7317_v36 = vpop.f32.mrf.mxu0  ;;  %v6388_v47 = vunpack.c.h.bf16 %v6525_v32 }
 0x404   : > { %6535 = vst [vmem:[%s9497_s11 + $0x8] sm:$0xff] %v6433_v0   ;;  %v6428_v43 = vpack.c.bf16 %v5592_v55, %v5591_v51  ;;  %v5396_v23 = vadd.f32 %v7317_v36, %v9483_v61  ;;  %v5563_v33 = vadd.f32 %v6371_v62, %v5385_v45  ;;  %v5597_v18 = vmax.f32 %v5565_v38, 0.0 }
 0x405   : > { %v5387_v20 = vpop.f32.mrf.mxu0  ;;  %v6399_v0 = vunpack.c.l.bf16 %v6528_v7 }
 0x406   : > { %6429 = vst [vmem:[%s9497_s11] sm:$0xff] %v6428_v43   ;;  %v5566_v19 = vadd.f32 %v6376_v8, %v5396_v23  ;;  %v5388_v60 = vadd.f32 %v9483_v61, %v5387_v20  ;;  %v5595_v3 = vmax.f32 %v5563_v33, 0.0  ;;  %v6527_v8 = vld [vmem:[%s8058_s12 + $0x40] sm:$0xff]  }
 0x407   : > { %v7320_v2 = vpop.f32.mrf.mxu0  ;;  %v6395_v23 = vunpack.c.l.bf16 %v6527_v8 }
 0x408   : > { %v5598_v13 = vmax.f32 %v5566_v19, 0.0  ;;  %v5564_v52 = vadd.f32 %v6372_v54, %v5388_v60  ;;  %v5409_v27 = vadd.f32 %v7320_v2, %v9483_v61  ;;  %v6400_v54 = vunpack.c.h.bf16 %v6528_v7 }
 0x409   : > { %v5400_v17 = vpop.f32.mrf.mxu0 }
 0x40a   : > { %v6443_v42 = vpack.c.bf16 %v5598_v13, %v5597_v18  ;;  %v5596_v56 = vmax.f32 %v5564_v52, 0.0  ;;  %v5401_v21 = vadd.f32 %v9483_v61, %v5400_v17  ;;  %v5569_v50 = vadd.f32 %v6383_v39, %v5409_v27  ;;  %v6530_v13 = vld [vmem:[%s8058_s12 + $0x58] sm:$0xff]  }
 0x40b   : > { %v7321_v1 = vpop.f32.mrf.mxu0  ;;  %v6396_v18 = vunpack.c.h.bf16 %v6527_v8 }
 0x40c   : > { %6537 = vst [vmem:[%s9497_s11 + $0x18] sm:$0xff] %v6443_v42   ;;  %v6438_v49 = vpack.c.bf16 %v5596_v56, %v5595_v3  ;;  %v5412_v14 = vadd.f32 %v7321_v1, %v9483_v61  ;;  %v5567_v29 = vadd.f32 %v6379_v58, %v5401_v21  ;;  %v5601_v9 = vmax.f32 %v5569_v50, 0.0 }
 0x40d   : > { %v5403_v26 = vpop.f32.mrf.mxu0  ;;  %v6407_v42 = vunpack.c.l.bf16 %v6530_v13 }
 0x40e   : > { %6536 = vst [vmem:[%s9497_s11 + $0x10] sm:$0xff] %v6438_v49   ;;  %v5570_v28 = vadd.f32 %v6384_v16, %v5412_v14  ;;  %v5404_v10 = vadd.f32 %v9483_v61, %v5403_v26  ;;  %v5599_v24 = vmax.f32 %v5567_v29, 0.0  ;;  %v6529_v16 = vld [vmem:[%s8058_s12 + $0x50] sm:$0xff]  }
 0x40f   : > { %v7324_v15 = vpop.f32.mrf.mxu0  ;;  %v6403_v14 = vunpack.c.l.bf16 %v6529_v16 }
 0x410   : > { %v5602_v12 = vmax.f32 %v5570_v28, 0.0  ;;  %v5568_v48 = vadd.f32 %v6380_v40, %v5404_v10  ;;  %v5425_v4 = vadd.f32 %v7324_v15, %v9483_v61  ;;  %v6408_v40 = vunpack.c.h.bf16 %v6530_v13 }
 0x411   : > { %v5416_v11 = vpop.f32.mrf.mxu0 }
 0x412   : > { %v6453_v31 = vpack.c.bf16 %v5602_v12, %v5601_v9  ;;  %v5600_v53 = vmax.f32 %v5568_v48, 0.0  ;;  %v5417_v35 = vadd.f32 %v9483_v61, %v5416_v11  ;;  %v5573_v44 = vadd.f32 %v6391_v22, %v5425_v4  ;;  %v6532_v12 = vld [vmem:[%s8058_s12 + $0x68] sm:$0xff]  }
 0x413   : > { %v7325_v46 = vpop.f32.mrf.mxu0  ;;  %v6404_v9 = vunpack.c.h.bf16 %v6529_v16 }
 0x414   : > { %6539 = vst [vmem:[%s9497_s11 + $0x28] sm:$0xff] %v6453_v31   ;;  %v6448_v5 = vpack.c.bf16 %v5600_v53, %v5599_v24  ;;  %v5428_v63 = vadd.f32 %v7325_v46, %v9483_v61  ;;  %v5571_v59 = vadd.f32 %v6387_v57, %v5417_v35  ;;  %v5605_v55 = vmax.f32 %v5573_v44, 0.0 }
 0x415   : > { %v5419_v37 = vpop.f32.mrf.mxu0  ;;  %v6415_v31 = vunpack.c.l.bf16 %v6532_v12 }
 0x416   : > { %6538 = vst [vmem:[%s9497_s11 + $0x20] sm:$0xff] %v6448_v5   ;;  %v5574_v25 = vadd.f32 %v6392_v41, %v5428_v63  ;;  %v5420_v62 = vadd.f32 %v9483_v61, %v5419_v37  ;;  %v5603_v34 = vmax.f32 %v5571_v59, 0.0  ;;  %v6531_v41 = vld [vmem:[%s8058_s12 + $0x60] sm:$0xff]  }
 0x417   : > { %v7328_v51 = vpop.f32.mrf.mxu0  ;;  %v6411_v63 = vunpack.c.l.bf16 %v6531_v41 }
 0x418   : > { %v5606_v45 = vmax.f32 %v5574_v25, 0.0  ;;  %v5572_v36 = vadd.f32 %v6388_v47, %v5420_v62  ;;  %v5441_v43 = vadd.f32 %v7328_v51, %v9483_v61  ;;  %v6416_v47 = vunpack.c.h.bf16 %v6532_v12 }
 0x419   : > { %v5432_v38 = vpop.f32.mrf.mxu0 }
 0x41a   : > { %v6463_v20 = vpack.c.bf16 %v5606_v45, %v5605_v55  ;;  %v5604_v33 = vmax.f32 %v5572_v36, 0.0  ;;  %v5433_v19 = vadd.f32 %v9483_v61, %v5432_v38  ;;  %v5577_v2 = vadd.f32 %v6399_v0, %v5441_v43  ;;  %v6534_v45 = vld [vmem:[%s8058_s12 + $0x78] sm:$0xff]  }
 0x41b   : > { %v7329_v60 = vpop.f32.mrf.mxu0  ;;  %v6412_v55 = vunpack.c.h.bf16 %v6531_v41 }
 0x41c   : > { %6541 = vst [vmem:[%s9497_s11 + $0x38] sm:$0xff] %v6463_v20   ;;  %v6458_v6 = vpack.c.bf16 %v5604_v33, %v5603_v34  ;;  %v5444_v39 = vadd.f32 %v7329_v60, %v9483_v61  ;;  %v5575_v27 = vadd.f32 %v6395_v23, %v5433_v19  ;;  %v5609_v56 = vmax.f32 %v5577_v2, 0.0 }
 0x41d   : > { %v5435_v52 = vpop.f32.mrf.mxu0  ;;  %v6423_v20 = vunpack.c.l.bf16 %v6534_v45 }
 0x41e   : > { %6540 = vst [vmem:[%s9497_s11 + $0x30] sm:$0xff] %v6458_v6   ;;  %v5578_v17 = vadd.f32 %v6400_v54, %v5444_v39  ;;  %v5436_v58 = vadd.f32 %v9483_v61, %v5435_v52  ;;  %v5607_v30 = vmax.f32 %v5575_v27, 0.0  ;;  %v6533_v54 = vld [vmem:[%s8058_s12 + $0x70] sm:$0xff]   ;;  %s7780_s12 = scalar_lea.vmem %s9558_s22, 2048 }
 0x41f   : > { %v7332_v3 = vpop.f32.mrf.mxu0  ;;  %v6419_v39 = vunpack.c.l.bf16 %v6533_v54  ;;  %p7781_p7 = scmp.ne.s32.totalorder %s9558_s22, %s7780_s12  ;;  %p7788_p0 = scmp.lt.s32.totalorder %s7786_s9, %s7780_s12 }
 0x420   : > { %v5610_v21 = vmax.f32 %v5578_v17, 0.0  ;;  %v5576_v1 = vadd.f32 %v6396_v18, %v5436_v58  ;;  %v5457_v49 = vadd.f32 %v7332_v3, %v9483_v61  ;;  %v6424_v18 = vunpack.c.h.bf16 %v6534_v45 }
 0x421   : > { %v5448_v50 = vpop.f32.mrf.mxu0  ;;  %p7782_p12 = pnand %p7781_p7, %p9706_p1  ;;  %p7789_p2 = por %p7788_p0, %p7787_p13 }
 0x422   : > { %v6473_v26 = vpack.c.bf16 %v5610_v21, %v5609_v56  ;;  %v5608_v29 = vmax.f32 %v5576_v1, 0.0  ;;  %v5449_v28 = vadd.f32 %v9483_v61, %v5448_v50  ;;  %v5581_v15 = vadd.f32 %v6407_v42, %v5457_v49 }
 0x423   : > { %v7333_v10 = vpop.f32.mrf.mxu0  ;;  %v6420_v56 = vunpack.c.h.bf16 %v6533_v54  ;;  %p7783_p9 = pneg %p7782_p12 }
 0x424   : > { %6543 = vst [vmem:[%s9497_s11 + $0x48] sm:$0xff] %v6473_v26   ;;  %v6468_v32 = vpack.c.bf16 %v5608_v29, %v5607_v30  ;;  %v5460_v22 = vadd.f32 %v7333_v10, %v9483_v61  ;;  %v5579_v4 = vadd.f32 %v6403_v14, %v5449_v28  ;;  %v5613_v53 = vmax.f32 %v5581_v15, 0.0 }
 0x425   : > { %v5451_v48 = vpop.f32.mrf.mxu0  ;;  %p7790_p10 = pnand %p7789_p2, %p7783_p9 }
 0x426   : > { %6542 = vst [vmem:[%s9497_s11 + $0x40] sm:$0xff] %v6468_v32   ;;  %v5582_v11 = vadd.f32 %v6408_v40, %v5460_v22  ;;  %v5452_v57 = vadd.f32 %v9483_v61, %v5451_v48  ;;  %v5611_v7 = vmax.f32 %v5579_v4, 0.0 }
 0x427   : > { %v7336_v24 = vpop.f32.mrf.mxu0 }
 0x428   : > { %v5614_v35 = vmax.f32 %v5582_v11, 0.0  ;;  %v5580_v46 = vadd.f32 %v6404_v9, %v5452_v57  ;;  %v5473_v5 = vadd.f32 %v7336_v24, %v9483_v61 }
 0x429   : > { %v5464_v44 = vpop.f32.mrf.mxu0 }
 0x42a   : > { %v6483_v37 = vpack.c.bf16 %v5614_v35, %v5613_v53  ;;  %v5612_v59 = vmax.f32 %v5580_v46, 0.0  ;;  %v5465_v25 = vadd.f32 %v9483_v61, %v5464_v44  ;;  %v5585_v51 = vadd.f32 %v6415_v31, %v5473_v5 }
 0x42b   : > { %v7337_v62 = vpop.f32.mrf.mxu0 }
 0x42c   : > { %6545 = vst [vmem:[%s9497_s11 + $0x58] sm:$0xff] %v6483_v37   ;;  %v6478_v8 = vpack.c.bf16 %v5612_v59, %v5611_v7  ;;  %v5476_v0 = vadd.f32 %v7337_v62, %v9483_v61  ;;  %v5583_v43 = vadd.f32 %v6411_v63, %v5465_v25  ;;  %v5617_v33 = vmax.f32 %v5585_v51, 0.0 }
 0x42d   : > { %v5467_v36 = vpop.f32.mrf.mxu0 }
 0x42e   : > { %6544 = vst [vmem:[%s9497_s11 + $0x50] sm:$0xff] %v6478_v8   ;;  %v5586_v38 = vadd.f32 %v6416_v47, %v5476_v0  ;;  %v5468_v23 = vadd.f32 %v9483_v61, %v5467_v36  ;;  %v5615_v13 = vmax.f32 %v5583_v43, 0.0 }
 0x42f   : > { %v7340_v34 = vpop.f32.mrf.mxu0 }
 0x430   : > { %v5618_v19 = vmax.f32 %v5586_v38, 0.0  ;;  %v5584_v60 = vadd.f32 %v6412_v55, %v5468_v23  ;;  %v5489_v6 = vadd.f32 %v7340_v34, %v9483_v61 }
 0x431   : > { %v5480_v2 = vpop.f32.mrf.mxu0 }
 0x432   : > { %v6493_v52 = vpack.c.bf16 %v5618_v19, %v5617_v33  ;;  %v5616_v27 = vmax.f32 %v5584_v60, 0.0  ;;  %v5481_v17 = vadd.f32 %v9483_v61, %v5480_v2  ;;  %v5589_v3 = vadd.f32 %v6423_v20, %v5489_v6 }
 0x433   : > { %v7341_v58 = vpop.f32.mrf.mxu0 }
 0x434   : > { %6547 = vst [vmem:[%s9497_s11 + $0x68] sm:$0xff] %v6493_v52   ;;  %v6488_v16 = vpack.c.bf16 %v5616_v27, %v5615_v13  ;;  %v5492_v42 = vadd.f32 %v7341_v58, %v9483_v61  ;;  %v5587_v1 = vadd.f32 %v6419_v39, %v5481_v17  ;;  %v5621_v14 = vmax.f32 %v5589_v3, 0.0 }
 0x435   : > { %v5483_v21 = vpop.f32.mrf.mxu0 }
 0x436   : > { %6546 = vst [vmem:[%s9497_s11 + $0x60] sm:$0xff] %v6488_v16   ;;  %v5590_v49 = vadd.f32 %v6424_v18, %v5492_v42  ;;  %v5484_v50 = vadd.f32 %v9483_v61, %v5483_v21  ;;  %v5619_v26 = vmax.f32 %v5587_v1, 0.0 }
 0x438   : > { %v5622_v40 = vmax.f32 %v5590_v49, 0.0  ;;  %v5588_v30 = vadd.f32 %v6420_v56, %v5484_v50 }
 0x43a   : > { %v6503_v29 = vpack.c.bf16 %v5622_v40, %v5621_v14  ;;  %v5620_v28 = vmax.f32 %v5588_v30, 0.0 }
 0x43c   : > { %6549 = vst [vmem:[%s9497_s11 + $0x78] sm:$0xff] %v6503_v29   ;;  %v6498_v61 = vpack.c.bf16 %v5620_v28, %v5619_v26 }
 0x43e   : > { %6548 = vst [vmem:[%s9497_s11 + $0x70] sm:$0xff] %v6498_v61  }
 0x43f   : > { %7793 = shalt.err (!%p7790_p10)
}
 0x440   : > { %s7794_s10 = scalar_lea.hbm %s9556_s1, 2048  ;;  %s7798_s29 = scalar_lea.hbm %s9610_s7, 4096 }
 0x441   : > { %p7795_p6 = scmp.ne.s32.totalorder %s9556_s1, %s7794_s10  ;;  %p7799_p3 = scmp.lt.s32.totalorder %s9556_s1, %s9610_s7 }
 0x442   : > { %p7800_p11 = scmp.lt.s32.totalorder %s7798_s29, %s7794_s10 }
 0x443   : > { %p7796_p4 = pnand %p7795_p6, %p9706_p1 }
 0x444   : > { %p7801_p5 = por %p7800_p11, %p7799_p3 }
 0x445   : > { %p7797_p8 = pneg %p7796_p4 }
 0x447   : > { %p7802_p7 = pnand %p7801_p5, %p7797_p8 }
 0x449   : > { %7805 = shalt.err (!%p7802_p7)
}
 0x44a   : > { %s7863_s18 = smov 64   ;;  %s7864_s23 = smov 4  }
 0x44b   : > { %7372 = dma.vmem_to_hbm [thread:$0]  (%p9706_p1), %s9558_s22, 2048, %s9556_s1, %s5784_s16, %s7863_s18, %s7863_s18, %s7864_s23  }
 0x44c PF: > { %s5812_s12 = sand.u32 1, %s7840_s24   ;;  %p9707_p12 = scmp.ne.s32.totalorder %s9619_s8, 0 }
 0x44d   : > { %p9708_p9 = scmp.ge.s32.totalorder %s7852_s27, 2  ;;  %s5813_s28 = scalar_lea.sflag [#allocation6], %s5812_s12 }
 0x44f   : > { %p7389_p13 = pnand %p9708_p9, %p9707_p12 }
 0x451   : > { %p7390_p0 = pneg %p7389_p13 }
 0x453   : > { %7835 = dma.done.wait (%p7390_p0), %s5813_s28, 2048  }
 0x454   : > { %7837 = vsyncadd (%p7390_p0), %s5813_s28, 4294965248  ;;  %p22_p2 = scmp.ge.s32.totalorder %s7994_s14, 4   ;;  %s9709_s24 = smov %s7844_s25 }
 0x455   : > { %s9710_s25 = smov %s7848_s26  ;;  %s9711_s26 = smov %s8004_s17 }
 0x456   : > { %s9712_s27 = smov %s7994_s14  ;;  %24 = sbr.rel (!%p22_p2) target bundleno = 9 (0x9), region = 113 }
 0x45b   :  { %5818 = vsyncpa [#allocation5], 1 }
 0x45c   :  { %5820 = vsyncpa [#allocation5 + $0x1], 1 }
 0x45d   :  { %5821 = vsyncpa [#allocation8], 1 }
 0x45e   :  { %5822 = vsyncpa [#allocation11], 1 }
 0x45f   :  { %5823 = vsyncpa [#allocation6], 1 }
 0x460   :  { %5825 = vsyncpa [#allocation6 + $0x1], 1 }

</bundles_post_ra>
